<compile_context>
chip_gen: v7x
topology: tpu7x:2x2x1
jax: 0.10.0
libtpu: 0.0.40
codegen_flags: <defaults>
</compile_context>

<pallas_src>
import functools

import jax
import jax.numpy as jnp
from jax.experimental import pallas as pl
from jax.experimental.pallas import tpu as pltpu

_LANE = 128
_BN_EPS = 1e-5


def _encoder_fused_kernel(x_ref,
                          w0_hbm, w1_hbm, w2_hbm, w3_hbm,
                          scale_ref, bias_ref,
                          o_ref,
                          w0_v, w1_v, w2_v, w3_v, sems):
    """4-layer relu-chained MLP; BN folded + int8 weights dequantized in-kernel.

    x_ref: (B, K0) bf16 (VMEM).  w*_hbm: int8 in HBM (pl.ANY), DMA'd manually.
    scale_ref/bias_ref: (4, 1024) f32 packed per-layer scales / BN-folded biases.
    o_ref: (B, N3_pad) f32.  MXU accumulates f32; epilogue stays f32.
    """
    f32, bf16 = jnp.float32, jnp.bfloat16
    n_pad = o_ref.shape[1]

    # Kick off every weight DMA immediately; each layer waits only for its own
    # weight, so compute overlaps the remaining in-flight transfers.
    copies = [
        pltpu.make_async_copy(w0_hbm, w0_v, sems.at[0]),
        pltpu.make_async_copy(w1_hbm, w1_v, sems.at[1]),
        pltpu.make_async_copy(w2_hbm, w2_v, sems.at[2]),
        pltpu.make_async_copy(w3_hbm, w3_v, sems.at[3]),
    ]
    for c in copies:
        c.start()

    def layer(h_bf16, w_v, s, b):
        # int8 -> bf16 dequant on the VPU (exact for |q| <= 127), MXU bf16 dot,
        # per-output-channel quant scale + BN-folded bias + ReLU in f32.
        acc = jnp.dot(h_bf16, w_v[...].astype(bf16), preferred_element_type=f32)
        return jnp.maximum(acc * s + b, 0.0)

    copies[0].wait()
    h = layer(x_ref[...], w0_v, scale_ref[0:1, :], bias_ref[0:1, :])
    copies[1].wait()
    h = layer(h.astype(bf16), w1_v, scale_ref[1:2, :], bias_ref[1:2, :])
    copies[2].wait()
    h = layer(h.astype(bf16), w2_v, scale_ref[2:3, :], bias_ref[2:3, :])
    copies[3].wait()
    h = layer(h.astype(bf16), w3_v, scale_ref[3:4, :n_pad], bias_ref[3:4, :n_pad])

    o_ref[...] = h.astype(o_ref.dtype)


def encoder_pallas(x_bf16, w0q, w1q, w2q, w3q, scales, biases):
    """One fused pallas_call over the whole 4-layer encoder. Returns (B, N3_pad) f32."""
    B = x_bf16.shape[0]
    n_pad = w3q.shape[1]
    hbm = pl.BlockSpec(memory_space=pl.ANY)
    return pl.pallas_call(
        _encoder_fused_kernel,
        out_shape=jax.ShapeDtypeStruct((B, n_pad), jnp.float32),
        grid_spec=pltpu.PrefetchScalarGridSpec(
            num_scalar_prefetch=0,
            grid=(1,),
            in_specs=[
                pl.BlockSpec(x_bf16.shape, lambda i: (0, 0)),   # x -> VMEM (tiny)
                hbm, hbm, hbm, hbm,                              # weights stay in HBM
                pl.BlockSpec(scales.shape, lambda i: (0, 0)),    # (4,1024) f32
                pl.BlockSpec(biases.shape, lambda i: (0, 0)),    # (4,1024) f32
            ],
            out_specs=pl.BlockSpec((B, n_pad), lambda i: (0, 0)),
            scratch_shapes=[
                pltpu.VMEM(w0q.shape, jnp.int8),     # single-buffered weight scratch
                pltpu.VMEM(w1q.shape, jnp.int8),
                pltpu.VMEM(w2q.shape, jnp.int8),
                pltpu.VMEM(w3q.shape, jnp.int8),
                pltpu.SemaphoreType.DMA((4,)),
            ],
        ),
        compiler_params=pltpu.CompilerParams(
            dimension_semantics=("arbitrary",),
            # ~2.3 MiB int8 weight scratch + one ~2 MiB bf16 dequant temp + small
            # pipelined operands: 16 MiB leaves ample headroom, incl. v7x (64 MiB).
            vmem_limit_bytes=16 * 1024 * 1024,
        ),
    )(x_bf16, w0q, w1q, w2q, w3q, scales, biases)


def init_encoder_params(key, input_dim, feature_dim):
    """Parameters matching the PyTorch module's shapes (with non-trivial BN running
    stats so the eval-mode BN-folding path is actually exercised)."""
    dims = [(input_dim, 1024), (1024, 1024), (1024, 1024), (1024, feature_dim)]
    params = []
    for fan_in, fan_out in dims:
        key, kw, kb, kg, kbt, km, kv = jax.random.split(key, 7)
        bound = 1.0 / jnp.sqrt(jnp.float32(fan_in))
        params.append(dict(
            w=jax.random.uniform(kw, (fan_in, fan_out), jnp.float32, -bound, bound),
            b=jax.random.uniform(kb, (fan_out,), jnp.float32, -bound, bound),
            gamma=1.0 + 0.1 * jax.random.normal(kg, (fan_out,), jnp.float32),
            beta=0.1 * jax.random.normal(kbt, (fan_out,), jnp.float32),
            mean=0.1 * jax.random.normal(km, (fan_out,), jnp.float32),
            var=1.0 + 0.1 * jax.random.uniform(kv, (fan_out,), jnp.float32),
        ))
    return params


def fold_params(params, eps=_BN_EPS):
    """Fold eval-mode BatchNorm into each Linear (kept in f32; quantized later)."""
    folded = []
    for p in params:
        scale = p["gamma"] / jnp.sqrt(p["var"] + eps)                  # (N,)
        w = (p["w"] * scale[None, :]).astype(jnp.float32)              # (K, N)
        b = ((p["b"] - p["mean"]) * scale + p["beta"]).astype(jnp.float32)
        folded.append((w, b))
    return folded


def _quantize_per_col(w):
    """Symmetric per-output-channel int8 quantization of a (K, N) f32 weight."""
    amax = jnp.maximum(jnp.max(jnp.abs(w), axis=0), 1e-8)              # (N,)
    scale = (amax / 127.0).astype(jnp.float32)
    q = jnp.clip(jnp.round(w / scale[None, :]), -127, 127).astype(jnp.int8)
    return q, scale


def prepare_encoder(params, eps=_BN_EPS):
    """One-time host-side prep: BN fold, int8 per-channel quantization, lane/row
    padding, and packing of scales/biases into two (4, 1024) f32 arrays."""
    (w0, b0), (w1, b1), (w2, b2), (w3, b3) = fold_params(params, eps)

    # Lane-pad the last layer's outputs to a multiple of 128 (unmasked vst).
    n = w3.shape[1]
    n_pad = ((n + _LANE - 1) // _LANE) * _LANE
    if n_pad != n:
        w3 = jnp.pad(w3, ((0, 0), (0, n_pad - n)))
        b3 = jnp.pad(b3, (0, n_pad - n))

    # Row-pad the first layer's inputs to a multiple of 32 (int8 sublane tiling).
    k0 = w0.shape[0]
    k0_pad = ((k0 + 31) // 32) * 32
    if k0_pad != k0:
        w0 = jnp.pad(w0, ((0, k0_pad - k0), (0, 0)))

    qws, scales, biases = [], [], []
    for w, b in ((w0, b0), (w1, b1), (w2, b2), (w3, b3)):
        q, s = _quantize_per_col(w)
        qws.append(q)
        scales.append(jnp.pad(s, (0, 1024 - s.shape[0])))
        biases.append(jnp.pad(b, (0, 1024 - b.shape[0])))
    scales = jnp.stack(scales).astype(jnp.float32)   # (4, 1024)
    biases = jnp.stack(biases).astype(jnp.float32)   # (4, 1024)
    return tuple(qws) + (scales, biases)


@functools.partial(jax.jit, static_argnames=("feature_dim",))
def encoder_forward(x, packed, *, feature_dim):
    """x: (B, input_dim) f32 -> (B, feature_dim) f32. Eval-mode forward."""
    w0, w1, w2, w3, scales, biases = packed
    k0_pad = w0.shape[0]
    x_b = x.astype(jnp.bfloat16)
    if x_b.shape[1] != k0_pad:
        x_b = jnp.pad(x_b, ((0, 0), (0, k0_pad - x_b.shape[1])))
    out_pad = encoder_pallas(x_b, w0, w1, w2, w3, scales, biases)
    return out_pad[:, :feature_dim]


if __name__ == "__main__":
    key = jax.random.PRNGKey(0)
    B, input_dim, feature_dim = 8, 32, 64

    kx, kp = jax.random.split(key)
    x = jax.random.normal(kx, (B, input_dim), jnp.float32)
    params = init_encoder_params(kp, input_dim, feature_dim)
    packed = prepare_encoder(params)

    out = encoder_forward(x, packed, feature_dim=feature_dim)
    out = jax.block_until_ready(out)
    assert out.shape == (B, feature_dim)

    # Reference 1: identical int8/bf16 math in pure JAX -> isolates the Pallas lowering.
    w0, w1, w2, w3, scales, biases = packed
    h = x.astype(jnp.bfloat16)
    if h.shape[1] != w0.shape[0]:
        h = jnp.pad(h, ((0, 0), (0, w0.shape[0] - h.shape[1])))
    qref = None
    for i, w in enumerate((w0, w1, w2, w3)):
        nn = w.shape[1]
        acc = jnp.dot(h, w.astype(jnp.bfloat16), preferred_element_type=jnp.float32)
        qref = jnp.maximum(acc * scales[i, :nn] + biases[i, :nn], 0.0)
        h = qref.astype(jnp.bfloat16)
    qref = qref[:, :feature_dim]
    err_q = float(jnp.max(jnp.abs(out - qref)))
    assert jnp.allclose(out, qref, atol=1e-2, rtol=1e-2), (
        "kernel vs quantized reference: max abs err = %f" % err_q)

    # Reference 2: full-precision (f32, BN-folded) eval-mode forward — bounds the
    # end-to-end drift of bf16 activations + int8 per-channel weights.
    hf = x
    fref = None
    for (wf, bf) in fold_params(params):
        fref = jnp.maximum(jnp.dot(hf, wf) + bf, 0.0)
        hf = fref
    fref = fref[:, :feature_dim]
    err_f = float(jnp.max(jnp.abs(out - fref)))
    assert err_f < 0.3, (
        "quantization drift vs f32 reference too large: max abs err = %f" % err_f)

    print("KERNEL_OK")
</pallas_src>

<mosaic_0001>
module attributes {stable_mosaic.version = 11 : i64} {
  func.func @_encoder_fused_kernel(%arg0: i32, %arg1: memref<8x32xbf16, #tpu.memory_space<vmem>>, %arg2: memref<32x1024xi8, #tpu.memory_space<any>>, %arg3: memref<1024x1024xi8, #tpu.memory_space<any>>, %arg4: memref<1024x1024xi8, #tpu.memory_space<any>>, %arg5: memref<1024x128xi8, #tpu.memory_space<any>>, %arg6: memref<4x1024xf32, #tpu.memory_space<vmem>>, %arg7: memref<4x1024xf32, #tpu.memory_space<vmem>>, %arg8: memref<8x128xf32, #tpu.memory_space<vmem>>, %arg9: memref<32x1024xi8, #tpu.memory_space<vmem>>, %arg10: memref<1024x1024xi8, #tpu.memory_space<vmem>>, %arg11: memref<1024x1024xi8, #tpu.memory_space<vmem>>, %arg12: memref<1024x128xi8, #tpu.memory_space<vmem>>, %arg13: memref<4x!tpu.dma_semaphore, #tpu.memory_space<semaphore_mem>>) attributes {dimension_semantics = [#tpu.dimension_semantics<arbitrary>], iteration_bounds = array<i64: 1>, scalar_prefetch = 0 : i64, scratch_operands = 5 : i64, tpu.core_type = #tpu.core_type<tc>, window_params = [{pipeline_mode = #tpu.pipeline_mode<synchronous>, transform_indices = @transform_0, window_bounds = array<i64: 8, 32>}, {}, {}, {}, {}, {pipeline_mode = #tpu.pipeline_mode<synchronous>, transform_indices = @transform_5, window_bounds = array<i64: 4, 1024>}, {pipeline_mode = #tpu.pipeline_mode<synchronous>, transform_indices = @transform_6, window_bounds = array<i64: 4, 1024>}, {pipeline_mode = #tpu.pipeline_mode<synchronous>, transform_indices = @transform_7, window_bounds = array<i64: 8, 128>}]} {
    %c0_i32 = arith.constant 0 : i32
    %0 = tpu.memref_slice %arg13[%c0_i32] : memref<4x!tpu.dma_semaphore, #tpu.memory_space<semaphore_mem>> -> memref<1x!tpu.dma_semaphore, #tpu.memory_space<semaphore_mem>>
    %1 = tpu.memref_squeeze %0 : memref<1x!tpu.dma_semaphore, #tpu.memory_space<semaphore_mem>> -> memref<!tpu.dma_semaphore, #tpu.memory_space<semaphore_mem>>
    tpu.enqueue_dma source(%arg2 : memref<32x1024xi8, #tpu.memory_space<any>>) target(%arg9 : memref<32x1024xi8, #tpu.memory_space<vmem>>) target_semaphore(%1 : memref<!tpu.dma_semaphore, #tpu.memory_space<semaphore_mem>>)
    %c1_i32 = arith.constant 1 : i32
    %2 = tpu.memref_slice %arg13[%c1_i32] : memref<4x!tpu.dma_semaphore, #tpu.memory_space<semaphore_mem>> -> memref<1x!tpu.dma_semaphore, #tpu.memory_space<semaphore_mem>>
    %3 = tpu.memref_squeeze %2 : memref<1x!tpu.dma_semaphore, #tpu.memory_space<semaphore_mem>> -> memref<!tpu.dma_semaphore, #tpu.memory_space<semaphore_mem>>
    tpu.enqueue_dma source(%arg3 : memref<1024x1024xi8, #tpu.memory_space<any>>) target(%arg10 : memref<1024x1024xi8, #tpu.memory_space<vmem>>) target_semaphore(%3 : memref<!tpu.dma_semaphore, #tpu.memory_space<semaphore_mem>>)
    %c2_i32 = arith.constant 2 : i32
    %4 = tpu.memref_slice %arg13[%c2_i32] : memref<4x!tpu.dma_semaphore, #tpu.memory_space<semaphore_mem>> -> memref<1x!tpu.dma_semaphore, #tpu.memory_space<semaphore_mem>>
    %5 = tpu.memref_squeeze %4 : memref<1x!tpu.dma_semaphore, #tpu.memory_space<semaphore_mem>> -> memref<!tpu.dma_semaphore, #tpu.memory_space<semaphore_mem>>
    tpu.enqueue_dma source(%arg4 : memref<1024x1024xi8, #tpu.memory_space<any>>) target(%arg11 : memref<1024x1024xi8, #tpu.memory_space<vmem>>) target_semaphore(%5 : memref<!tpu.dma_semaphore, #tpu.memory_space<semaphore_mem>>)
    %c3_i32 = arith.constant 3 : i32
    %6 = tpu.memref_slice %arg13[%c3_i32] : memref<4x!tpu.dma_semaphore, #tpu.memory_space<semaphore_mem>> -> memref<1x!tpu.dma_semaphore, #tpu.memory_space<semaphore_mem>>
    %7 = tpu.memref_squeeze %6 : memref<1x!tpu.dma_semaphore, #tpu.memory_space<semaphore_mem>> -> memref<!tpu.dma_semaphore, #tpu.memory_space<semaphore_mem>>
    tpu.enqueue_dma source(%arg5 : memref<1024x128xi8, #tpu.memory_space<any>>) target(%arg12 : memref<1024x128xi8, #tpu.memory_space<vmem>>) target_semaphore(%7 : memref<!tpu.dma_semaphore, #tpu.memory_space<semaphore_mem>>)
    %c0_i32_0 = arith.constant 0 : i32
    %8 = tpu.memref_slice %arg13[%c0_i32_0] : memref<4x!tpu.dma_semaphore, #tpu.memory_space<semaphore_mem>> -> memref<1x!tpu.dma_semaphore, #tpu.memory_space<semaphore_mem>>
    %9 = tpu.memref_squeeze %8 : memref<1x!tpu.dma_semaphore, #tpu.memory_space<semaphore_mem>> -> memref<!tpu.dma_semaphore, #tpu.memory_space<semaphore_mem>>
    tpu.wait_dma2 semaphore(%9 : memref<!tpu.dma_semaphore, #tpu.memory_space<semaphore_mem>>) src(%arg2 : memref<32x1024xi8, #tpu.memory_space<any>>) dst(%arg9 : memref<32x1024xi8, #tpu.memory_space<vmem>>)
    %c0 = arith.constant 0 : index
    %c0_1 = arith.constant 0 : index
    %10 = vector.load %arg1[%c0, %c0_1] : memref<8x32xbf16, #tpu.memory_space<vmem>>, vector<8x32xbf16>
    %c0_2 = arith.constant 0 : index
    %c0_3 = arith.constant 0 : index
    %11 = vector.load %arg6[%c0_2, %c0_3] : memref<4x1024xf32, #tpu.memory_space<vmem>>, vector<1x1024xf32>
    %c0_4 = arith.constant 0 : index
    %c0_5 = arith.constant 0 : index
    %12 = vector.load %arg7[%c0_4, %c0_5] : memref<4x1024xf32, #tpu.memory_space<vmem>>, vector<1x1024xf32>
    %c0_6 = arith.constant 0 : index
    %c0_7 = arith.constant 0 : index
    %13 = vector.load %arg9[%c0_6, %c0_7] : memref<32x1024xi8, #tpu.memory_space<vmem>>, vector<32x1024xi8>
    %14 = arith.sitofp %13 : vector<32x1024xi8> to vector<32x1024xbf16>
    %cst = arith.constant dense<0.000000e+00> : vector<8x1024xf32>
    %15 = tpu.matmul %10, %14, %cst {dimension_numbers = #tpu.dot_dimension_numbers<[1], [0], [0], [1], [0, 0, 1, 1], [], []>} : vector<8x32xbf16>, vector<32x1024xbf16>, vector<8x1024xf32> -> vector<8x1024xf32>
    %16 = vector.broadcast %11 : vector<1x1024xf32> to vector<8x1024xf32>
    %17 = arith.mulf %15, %16 : vector<8x1024xf32>
    %18 = vector.broadcast %12 : vector<1x1024xf32> to vector<8x1024xf32>
    %19 = arith.addf %17, %18 : vector<8x1024xf32>
    %cst_8 = arith.constant 0.000000e+00 : f32
    %20 = vector.broadcast %cst_8 : f32 to vector<8x1024xf32>
    %21 = arith.maximumf %19, %20 : vector<8x1024xf32>
    %c1_i32_9 = arith.constant 1 : i32
    %22 = tpu.memref_slice %arg13[%c1_i32_9] : memref<4x!tpu.dma_semaphore, #tpu.memory_space<semaphore_mem>> -> memref<1x!tpu.dma_semaphore, #tpu.memory_space<semaphore_mem>>
    %23 = tpu.memref_squeeze %22 : memref<1x!tpu.dma_semaphore, #tpu.memory_space<semaphore_mem>> -> memref<!tpu.dma_semaphore, #tpu.memory_space<semaphore_mem>>
    tpu.wait_dma2 semaphore(%23 : memref<!tpu.dma_semaphore, #tpu.memory_space<semaphore_mem>>) src(%arg3 : memref<1024x1024xi8, #tpu.memory_space<any>>) dst(%arg10 : memref<1024x1024xi8, #tpu.memory_space<vmem>>)
    %24 = arith.truncf %21 : vector<8x1024xf32> to vector<8x1024xbf16>
    %c1 = arith.constant 1 : index
    %c0_10 = arith.constant 0 : index
    %25 = vector.load %arg6[%c1, %c0_10] : memref<4x1024xf32, #tpu.memory_space<vmem>>, vector<1x1024xf32>
    %c1_11 = arith.constant 1 : index
    %c0_12 = arith.constant 0 : index
    %26 = vector.load %arg7[%c1_11, %c0_12] : memref<4x1024xf32, #tpu.memory_space<vmem>>, vector<1x1024xf32>
    %c0_13 = arith.constant 0 : index
    %c0_14 = arith.constant 0 : index
    %27 = vector.load %arg10[%c0_13, %c0_14] : memref<1024x1024xi8, #tpu.memory_space<vmem>>, vector<1024x1024xi8>
    %28 = arith.sitofp %27 : vector<1024x1024xi8> to vector<1024x1024xbf16>
    %cst_15 = arith.constant dense<0.000000e+00> : vector<8x1024xf32>
    %29 = tpu.matmul %24, %28, %cst_15 {dimension_numbers = #tpu.dot_dimension_numbers<[1], [0], [0], [1], [0, 0, 1, 1], [], []>} : vector<8x1024xbf16>, vector<1024x1024xbf16>, vector<8x1024xf32> -> vector<8x1024xf32>
    %30 = vector.broadcast %25 : vector<1x1024xf32> to vector<8x1024xf32>
    %31 = arith.mulf %29, %30 : vector<8x1024xf32>
    %32 = vector.broadcast %26 : vector<1x1024xf32> to vector<8x1024xf32>
    %33 = arith.addf %31, %32 : vector<8x1024xf32>
    %cst_16 = arith.constant 0.000000e+00 : f32
    %34 = vector.broadcast %cst_16 : f32 to vector<8x1024xf32>
    %35 = arith.maximumf %33, %34 : vector<8x1024xf32>
    %c2_i32_17 = arith.constant 2 : i32
    %36 = tpu.memref_slice %arg13[%c2_i32_17] : memref<4x!tpu.dma_semaphore, #tpu.memory_space<semaphore_mem>> -> memref<1x!tpu.dma_semaphore, #tpu.memory_space<semaphore_mem>>
    %37 = tpu.memref_squeeze %36 : memref<1x!tpu.dma_semaphore, #tpu.memory_space<semaphore_mem>> -> memref<!tpu.dma_semaphore, #tpu.memory_space<semaphore_mem>>
    tpu.wait_dma2 semaphore(%37 : memref<!tpu.dma_semaphore, #tpu.memory_space<semaphore_mem>>) src(%arg4 : memref<1024x1024xi8, #tpu.memory_space<any>>) dst(%arg11 : memref<1024x1024xi8, #tpu.memory_space<vmem>>)
    %38 = arith.truncf %35 : vector<8x1024xf32> to vector<8x1024xbf16>
    %c2 = arith.constant 2 : index
    %c0_18 = arith.constant 0 : index
    %39 = vector.load %arg6[%c2, %c0_18] : memref<4x1024xf32, #tpu.memory_space<vmem>>, vector<1x1024xf32>
    %c2_19 = arith.constant 2 : index
    %c0_20 = arith.constant 0 : index
    %40 = vector.load %arg7[%c2_19, %c0_20] : memref<4x1024xf32, #tpu.memory_space<vmem>>, vector<1x1024xf32>
    %c0_21 = arith.constant 0 : index
    %c0_22 = arith.constant 0 : index
    %41 = vector.load %arg11[%c0_21, %c0_22] : memref<1024x1024xi8, #tpu.memory_space<vmem>>, vector<1024x1024xi8>
    %42 = arith.sitofp %41 : vector<1024x1024xi8> to vector<1024x1024xbf16>
    %cst_23 = arith.constant dense<0.000000e+00> : vector<8x1024xf32>
    %43 = tpu.matmul %38, %42, %cst_23 {dimension_numbers = #tpu.dot_dimension_numbers<[1], [0], [0], [1], [0, 0, 1, 1], [], []>} : vector<8x1024xbf16>, vector<1024x1024xbf16>, vector<8x1024xf32> -> vector<8x1024xf32>
    %44 = vector.broadcast %39 : vector<1x1024xf32> to vector<8x1024xf32>
    %45 = arith.mulf %43, %44 : vector<8x1024xf32>
    %46 = vector.broadcast %40 : vector<1x1024xf32> to vector<8x1024xf32>
    %47 = arith.addf %45, %46 : vector<8x1024xf32>
    %cst_24 = arith.constant 0.000000e+00 : f32
    %48 = vector.broadcast %cst_24 : f32 to vector<8x1024xf32>
    %49 = arith.maximumf %47, %48 : vector<8x1024xf32>
    %c3_i32_25 = arith.constant 3 : i32
    %50 = tpu.memref_slice %arg13[%c3_i32_25] : memref<4x!tpu.dma_semaphore, #tpu.memory_space<semaphore_mem>> -> memref<1x!tpu.dma_semaphore, #tpu.memory_space<semaphore_mem>>
    %51 = tpu.memref_squeeze %50 : memref<1x!tpu.dma_semaphore, #tpu.memory_space<semaphore_mem>> -> memref<!tpu.dma_semaphore, #tpu.memory_space<semaphore_mem>>
    tpu.wait_dma2 semaphore(%51 : memref<!tpu.dma_semaphore, #tpu.memory_space<semaphore_mem>>) src(%arg5 : memref<1024x128xi8, #tpu.memory_space<any>>) dst(%arg12 : memref<1024x128xi8, #tpu.memory_space<vmem>>)
    %52 = arith.truncf %49 : vector<8x1024xf32> to vector<8x1024xbf16>
    %c3 = arith.constant 3 : index
    %c0_26 = arith.constant 0 : index
    %53 = vector.load %arg6[%c3, %c0_26] : memref<4x1024xf32, #tpu.memory_space<vmem>>, vector<1x128xf32>
    %c3_27 = arith.constant 3 : index
    %c0_28 = arith.constant 0 : index
    %54 = vector.load %arg7[%c3_27, %c0_28] : memref<4x1024xf32, #tpu.memory_space<vmem>>, vector<1x128xf32>
    %c0_29 = arith.constant 0 : index
    %c0_30 = arith.constant 0 : index
    %55 = vector.load %arg12[%c0_29, %c0_30] : memref<1024x128xi8, #tpu.memory_space<vmem>>, vector<1024x128xi8>
    %56 = arith.sitofp %55 : vector<1024x128xi8> to vector<1024x128xbf16>
    %cst_31 = arith.constant dense<0.000000e+00> : vector<8x128xf32>
    %57 = tpu.matmul %52, %56, %cst_31 {dimension_numbers = #tpu.dot_dimension_numbers<[1], [0], [0], [1], [0, 0, 1, 1], [], []>} : vector<8x1024xbf16>, vector<1024x128xbf16>, vector<8x128xf32> -> vector<8x128xf32>
    %58 = vector.broadcast %53 : vector<1x128xf32> to vector<8x128xf32>
    %59 = arith.mulf %57, %58 : vector<8x128xf32>
    %60 = vector.broadcast %54 : vector<1x128xf32> to vector<8x128xf32>
    %61 = arith.addf %59, %60 : vector<8x128xf32>
    %cst_32 = arith.constant 0.000000e+00 : f32
    %62 = vector.broadcast %cst_32 : f32 to vector<8x128xf32>
    %63 = arith.maximumf %61, %62 : vector<8x128xf32>
    %c0_33 = arith.constant 0 : index
    %c0_34 = arith.constant 0 : index
    %64 = vector.load %arg8[%c0_33, %c0_34] : memref<8x128xf32, #tpu.memory_space<vmem>>, vector<8x128xf32>
    tpu.vector_store %arg8[%c0_33, %c0_34], %63 {strides = array<i32>} : memref<8x128xf32, #tpu.memory_space<vmem>>, vector<8x128xf32>,
    return
  }
  func.func @transform_0(%arg0: i32) -> (i32, i32) {
    %c0_i32 = arith.constant 0 : i32
    %c0_i32_0 = arith.constant 0 : i32
    %c0_i32_1 = arith.constant 0 : i32
    return %c0_i32, %c0_i32_0 : i32, i32
  }
  func.func @transform_5(%arg0: i32) -> (i32, i32) {
    %c0_i32 = arith.constant 0 : i32
    %c0_i32_0 = arith.constant 0 : i32
    %c0_i32_1 = arith.constant 0 : i32
    return %c0_i32, %c0_i32_0 : i32, i32
  }
  func.func @transform_6(%arg0: i32) -> (i32, i32) {
    %c0_i32 = arith.constant 0 : i32
    %c0_i32_0 = arith.constant 0 : i32
    %c0_i32_1 = arith.constant 0 : i32
    return %c0_i32, %c0_i32_0 : i32, i32
  }
  func.func @transform_7(%arg0: i32) -> (i32, i32) {
    %c0_i32 = arith.constant 0 : i32
    %c0_i32_0 = arith.constant 0 : i32
    %c0_i32_1 = arith.constant 0 : i32
    return %c0_i32, %c0_i32_0 : i32, i32
  }
}

</mosaic_0001>

<bundles_post_ra>
// kernel: encoder_forward.1
= control target key start
LH: loop header
LB: loop body
LE: loop exit
PB: predicated region body
PF: predicated region fallthrough
CT: control target
= control target key end

     0   :  { %12 = vsyncpa [#allocation8], 0  ;;  %s4620_s0 = inlined_call_operand.vmem [shape: bf16[8,32], index: 0, kind: input, shape index: {}]   ;;  %s4621_s1 = inlined_call_operand.hbm [shape: s8[32,1024], index: 1, kind: input, shape index: {}]   ;;  %s4622_s2 = inlined_call_operand.hbm [shape: s8[1024,1024], index: 2, kind: input, shape index: {}]   ;;  %s4623_s3 = inlined_call_operand.hbm [shape: s8[1024,1024], index: 3, kind: input, shape index: {}]   ;;  %s4624_s4 = inlined_call_operand.hbm [shape: s8[1024,128], index: 4, kind: input, shape index: {}]   ;;  %s4625_s5 = inlined_call_operand.hbm [shape: f32[4,1024], index: 5, kind: input, shape index: {}]   ;;  %s4626_s6 = inlined_call_operand.vmem [shape: f32[4,1024], index: 6, kind: input, shape index: {}]   ;;  %s4627_s7 = inlined_call_operand.hbm [shape: f32[8,128], index: 7, kind: output, shape index: {}]  }
   0x1   :  { %13 = vsyncpa [#allocation9], 0  ;;  %s4144_s24 = smov [#allocation7]   ;;  %s4000_s28 = scalar_lea.hbm %s4625_s5, 512 }
   0x2   :  { %s22_s25 = sshll.u32 %s4144_s24, 4  ;;  %p4001_p0 = scmp.ne.s32.totalorder %s4625_s5, %s4000_s28  ;;  %s23_s25 = int_to_ptr.vmem [resolvable:$true] %s22_s25 }
   0x3   :  { %p4004_p1 = scmp.lt.u32.totalorder %s4000_s28, %s4625_s5 }
   0x5   :  { %p4006_p2 = pnand %p4004_p1, %p4001_p0 }
   0x7   :  { %4009 = shalt.err (!%p4006_p2)
}
   0x8   :  { %s4010_s10 = scalar_lea.vmem %s23_s25, 512  ;;  %p4015_p4 = scmp.lt.s32.totalorder %s23_s25, %s23_s25 }
   0x9   :  { %p4011_p3 = scmp.ne.s32.totalorder %s23_s25, %s4010_s10  ;;  %p4016_p5 = scmp.lt.s32.totalorder %s4010_s10, %s4010_s10 }
   0xb   :  { %p4017_p6 = por %p4016_p5, %p4015_p4 }
   0xd   :  { %p4018_p7 = pnand %p4017_p6, %p4011_p3 }
   0xf   :  { %4021 = shalt.err (!%p4018_p7)
}
  0x10   :  { %25 = dma.hbm_to_vmem [thread:$0]  %s4625_s5, 512, %s23_s25, [#allocation8]  }
  0x11   :  { %4132 = dma.done.wait [#allocation8], 512  }
  0x12   :  { %4133 = vsyncadd [#allocation8], 4294966784  ;;  %s4145_s13 = smov [#allocation2]   ;;  %s4146_s15 = smov [#allocation3]  }
  0x13   :  { %s39_s14 = sshll.u32 %s4145_s13, 4  ;;  %s51_s16 = sshll.u32 %s4146_s15, 4  ;;  %s40_s14 = int_to_ptr.vmem [resolvable:$true] %s39_s14  ;;  %s52_s16 = int_to_ptr.vmem [resolvable:$true] %s51_s16 }
  0x14   :  { %s4022_s19 = scalar_lea.hbm %s4621_s1, 1024 }
  0x15   :  { %p4023_p8 = scmp.ne.s32.totalorder %s4621_s1, %s4022_s19  ;;  %p4026_p9 = scmp.lt.u32.totalorder %s4022_s19, %s4621_s1 }
  0x17   :  { %p4028_p10 = pnand %p4026_p9, %p4023_p8 }
  0x19   :  { %4031 = shalt.err (!%p4028_p10)  }
  0x1a   :  { %s4032_s5 = scalar_lea.vmem %s40_s14, 1024  ;;  %p4037_p12 = scmp.lt.s32.totalorder %s40_s14, %s40_s14 }
  0x1b   :  { %p4033_p11 = scmp.ne.s32.totalorder %s40_s14, %s4032_s5  ;;  %p4038_p13 = scmp.lt.s32.totalorder %s4032_s5, %s4032_s5 }
  0x1d   :  { %p4039_p0 = por %p4038_p13, %p4037_p12 }
  0x1f   :  { %p4040_p1 = pnand %p4039_p0, %p4033_p11 }
  0x21   :  { %4043 = shalt.err (!%p4040_p1)  }
  0x22   :  { %42 = dma.hbm_to_vmem [thread:$0]  %s4621_s1, 1024, %s40_s14, [#allocation6] }
  0x23   :  { %s4044_s28 = scalar_lea.hbm %s4622_s2, 32768 }
  0x24   :  { %p4045_p2 = scmp.ne.s32.totalorder %s4622_s2, %s4044_s28  ;;  %p4048_p3 = scmp.lt.u32.totalorder %s4044_s28, %s4622_s2 }
  0x26   :  { %p4050_p4 = pnand %p4048_p3, %p4045_p2 }
  0x28   :  { %4053 = shalt.err (!%p4050_p4)  }
  0x29   :  { %s4054_s10 = scalar_lea.vmem %s52_s16, 32768  ;;  %p4059_p6 = scmp.lt.s32.totalorder %s52_s16, %s52_s16 }
  0x2a   :  { %p4055_p5 = scmp.ne.s32.totalorder %s52_s16, %s4054_s10  ;;  %p4060_p7 = scmp.lt.s32.totalorder %s4054_s10, %s4054_s10 }
  0x2c   :  { %p4061_p8 = por %p4060_p7, %p4059_p6 }
  0x2e   :  { %p4062_p9 = pnand %p4061_p8, %p4055_p5 }
  0x30   :  { %4065 = shalt.err (!%p4062_p9)  }
  0x31   :  { %54 = dma.hbm_to_vmem [thread:$0]  %s4622_s2, 32768, %s52_s16, [#allocation6 + $0x1] }
  0x32   :  { %s4147_s12 = smov [#allocation4]   ;;  %s4148_s14 = smov [#allocation5]  }
  0x33   :  { %s63_s13 = sshll.u32 %s4147_s12, 4  ;;  %s75_s15 = sshll.u32 %s4148_s14, 4  ;;  %s64_s13 = int_to_ptr.vmem [resolvable:$true] %s63_s13  ;;  %s76_s15 = int_to_ptr.vmem [resolvable:$true] %s75_s15 }
  0x34   :  { %s4066_s19 = scalar_lea.hbm %s4623_s3, 32768 }
  0x35   :  { %p4067_p10 = scmp.ne.s32.totalorder %s4623_s3, %s4066_s19  ;;  %p4070_p11 = scmp.lt.u32.totalorder %s4066_s19, %s4623_s3 }
  0x37   :  { %p4072_p12 = pnand %p4070_p11, %p4067_p10 }
  0x39   :  { %4075 = shalt.err (!%p4072_p12)  }
  0x3a   :  { %s4076_s2 = scalar_lea.vmem %s64_s13, 32768  ;;  %p4081_p0 = scmp.lt.s32.totalorder %s64_s13, %s64_s13 }
  0x3b   :  { %p4077_p13 = scmp.ne.s32.totalorder %s64_s13, %s4076_s2  ;;  %p4082_p1 = scmp.lt.s32.totalorder %s4076_s2, %s4076_s2 }
  0x3d   :  { %p4083_p2 = por %p4082_p1, %p4081_p0 }
  0x3f   :  { %p4084_p3 = pnand %p4083_p2, %p4077_p13 }
  0x41   :  { %4087 = shalt.err (!%p4084_p3)  }
  0x42   :  { %66 = dma.hbm_to_vmem [thread:$0]  %s4623_s3, 32768, %s64_s13, [#allocation6 + $0x2] }
  0x43   :  { %s4088_s26 = scalar_lea.hbm %s4624_s4, 4096 }
  0x44   :  { %p4089_p4 = scmp.ne.s32.totalorder %s4624_s4, %s4088_s26  ;;  %p4092_p5 = scmp.lt.u32.totalorder %s4088_s26, %s4624_s4 }
  0x46   :  { %p4094_p6 = pnand %p4092_p5, %p4089_p4 }
  0x48   :  { %4097 = shalt.err (!%p4094_p6)  }
  0x49   :  { %s4098_s8 = scalar_lea.vmem %s76_s15, 4096  ;;  %p4103_p8 = scmp.lt.s32.totalorder %s76_s15, %s76_s15 }
  0x4a   :  { %p4099_p7 = scmp.ne.s32.totalorder %s76_s15, %s4098_s8  ;;  %p4104_p9 = scmp.lt.s32.totalorder %s4098_s8, %s4098_s8 }
  0x4c   :  { %p4105_p10 = por %p4104_p9, %p4103_p8 }
  0x4e   :  { %p4106_p11 = pnand %p4105_p10, %p4099_p7 }
  0x50   :  { %4109 = shalt.err (!%p4106_p11)  }
  0x51   :  { %78 = dma.hbm_to_vmem [thread:$0]  %s4624_s4, 4096, %s76_s15, [#allocation6 + $0x3] }
  0x52   :  { %4134 = dma.done.wait [#allocation6], 1024 }
  0x53   :  { %4135 = vsyncadd [#allocation6], 4294966272  ;;  %v4149_v0 = vmov 0   ;;  %v87_v1 = vld [vmem:[#allocation2 + $0x8] sm:$0xff]  ;;  %v89_v2 = vld [vmem:[#allocation2 + $0x18] sm:$0xff]  ;;  %vm110_vm0 = vcmask 261120   ;;  %v279_v26 = vlaneseq }
  0x54   :  { %146 = vmatprep.mubr.bf16.mxu0 %v4149_v0  ;;  %187 = vmatprep.mubr.bf16.mxu1 %v4149_v0  ;;  %v86_v3 = vld [vmem:[#allocation2] sm:$0xff]  ;;  %v95_v4 = vunpack.c.l.s8.bf16 %v87_v1  ;;  %v103_v5 = vunpack.c.h.s8.bf16 %v87_v1  ;;  %v97_v6 = vunpack.c.l.s8.bf16 %v89_v2  ;;  %v105_v7 = vunpack.c.h.s8.bf16 %v89_v2  ;;  %v88_v8 = vld [vmem:[#allocation2 + $0x10] sm:$0xff]  ;;  %v91_v11 = vld [vmem:[#allocation2 + $0x28] sm:$0xff] }
  0x55   :  { %v94_v9 = vunpack.c.l.s8.bf16 %v86_v3  ;;  %v96_v10 = vunpack.c.l.s8.bf16 %v88_v8  ;;  %v93_v12 = vld [vmem:[#allocation2 + $0x38] sm:$0xff]  ;;  %v102_v13 = vunpack.c.h.s8.bf16 %v86_v3  ;;  %v104_v14 = vunpack.c.h.s8.bf16 %v88_v8  ;;  %v90_v17 = vld [vmem:[#allocation2 + $0x20] sm:$0xff]  ;;  %v92_v18 = vld [vmem:[#allocation2 + $0x30] sm:$0xff] }
  0x56   :  { %114 = vmatprep.subr.bf16.mxu0 %v95_v4  ;;  %155 = vmatprep.subr.bf16.mxu1 %v97_v6  ;;  %v99_v15 = vunpack.c.l.s8.bf16 %v91_v11  ;;  %v101_v16 = vunpack.c.l.s8.bf16 %v93_v12  ;;  %v83_v19 = vld [vmem:[%s4620_s0] sm:$0xf]  ;;  %v98_v20 = vunpack.c.l.s8.bf16 %v90_v17  ;;  %v100_v21 = vunpack.c.l.s8.bf16 %v92_v18 }
  0x57   :  { %115 = vmatpush1.bf16.msra.mxu0 %v94_v9  ;;  %156 = vmatpush1.bf16.msra.mxu1 %v96_v10  ;;  %v107_v22 = vunpack.c.h.s8.bf16 %v91_v11  ;;  %v109_v23 = vunpack.c.h.s8.bf16 %v93_v12  ;;  %v106_v24 = vunpack.c.h.s8.bf16 %v90_v17  ;;  %v108_v25 = vunpack.c.h.s8.bf16 %v92_v18  ;;  %v84_v30 = vld [vmem:[#allocation7] ss:$4 sm:$0xff] }
  0x58   :  { %116 = vmatprep.subr.bf16.mxu0 %v103_v5  ;;  %157 = vmatprep.subr.bf16.mxu1 %v105_v7  ;;  %v280_v27 = vshrl.u32 %v279_v26, 7  ;;  %v85_v33 = vld [vmem:[%s4626_s6] ss:$4 sm:$0xff] }
  0x5a   :  { %v4258_v28 = vsub.s32 0, %v280_v27  ;;  %v4260_v29 = vsub.s32 2, %v280_v27  ;;  %v4262_v31 = vsub.s32 1, %v280_v27  ;;  %v4264_v32 = vsub.s32 3, %v280_v27 }
  0x5b   :  { %117 = vmatpush1.bf16.msra.mxu0 %v102_v13  ;;  %158 = vmatpush1.bf16.msra.mxu1 %v104_v14  ;;  %v4277_v48 = vsub.s32 4, %v280_v27  ;;  %v4279_v49 = vsub.s32 6, %v280_v27  ;;  %v4281_v54 = vsub.s32 5, %v280_v27  ;;  %v4283_v55 = vsub.s32 7, %v280_v27 }
  0x5c   :  { %196 = vmatprep.subr.bf16.mxu0 %v99_v15  ;;  %237 = vmatprep.subr.bf16.mxu1 %v101_v16  ;;  %v282_v34 = vrot.slane %v84_v30, %v4258_v28  ;;  %v290_v35 = vrot.slane %v84_v30, %v4260_v29  ;;  %v286_v36 = vrot.slane %v84_v30, %v4262_v31 }
  0x5d   :  { %v294_v37 = vrot.slane %v84_v30, %v4264_v32  ;;  %v331_v38 = vrot.slane %v85_v33, %v4258_v28  ;;  %v339_v39 = vrot.slane %v85_v33, %v4260_v29  ;;  %v335_v42 = vrot.slane %v85_v33, %v4262_v31 }
  0x5e   :  { %3797 = vmatmul.mubr.msk.bf16.vlgmr.msra.gmra.mrb[0].mxu0 %vm110_vm0, %v83_v19  ;;  %3798 = vmatmul.mubr.msk.bf16.vlgmr.msra.gmra.mrb[0].mxu1 %vm110_vm0, %v83_v19  ;;  %v343_v43 = vrot.slane %v85_v33, %v4264_v32  ;;  %v306_v1 = vrot.slane %v84_v30, %v4279_v49  ;;  %v302_v4 = vrot.slane %v84_v30, %v4281_v54 }
  0x5f   :  { %197 = vmatpush1.bf16.msra.mxu0 %v98_v20  ;;  %238 = vmatpush1.bf16.msra.mxu1 %v100_v21  ;;  %v310_v5 = vrot.slane %v84_v30, %v4283_v55  ;;  %v347_v6 = vrot.slane %v85_v33, %v4277_v48  ;;  %v355_v7 = vrot.slane %v85_v33, %v4279_v49 }
  0x60   :  { %198 = vmatprep.subr.bf16.mxu0 %v107_v22  ;;  %239 = vmatprep.subr.bf16.mxu1 %v109_v23  ;;  %v351_v10 = vrot.slane %v85_v33, %v4281_v54  ;;  %v359_v11 = vrot.slane %v85_v33, %v4283_v55 }
  0x61   :  { %228 = vmatprep.mubr.bf16.mxu0 %v4149_v0  ;;  %269 = vmatprep.mubr.bf16.mxu1 %v4149_v0  ;;  %v298_v0 = vrot.slane %v84_v30, %v4277_v48 }
  0x63   :  { %199 = vmatpush1.bf16.msra.mxu0 %v106_v24  ;;  %240 = vmatpush1.bf16.msra.mxu1 %v108_v25 }
  0x66   :  { %3799 = vmatmul.mubr.msk.bf16.vlgmr.msra.gmra.mrb[4].mxu0 %vm110_vm0, %v83_v19  ;;  %3800 = vmatmul.mubr.msk.bf16.vlgmr.msra.gmra.mrb[4].mxu1 %vm110_vm0, %v83_v19 }
 0x131   :  { %v148_v40 = vpop.f32.mrb[0].mxu0  ;;  %v189_v41 = vpop.f32.mrb[0].mxu1 }
 0x132   :  { %v319_v44 = vmul.f32 %v282_v34, %v148_v40  ;;  %v321_v45 = vmul.f32 %v290_v35, %v189_v41  ;;  %v150_v46 = vpop.f32.mrb[1].mxu0  ;;  %v191_v47 = vpop.f32.mrb[1].mxu1 }
 0x133   :  { %v320_v50 = vmul.f32 %v286_v36, %v150_v46  ;;  %v322_v51 = vmul.f32 %v294_v37, %v191_v47  ;;  %v152_v52 = vpop.f32.mrb[2].mxu0  ;;  %v193_v53 = vpop.f32.mrb[2].mxu1 }
 0x134   :  { %v4285_v56 = vadd.f32 %v331_v38, %v319_v44  ;;  %v4287_v57 = vadd.f32 %v339_v39, %v321_v45  ;;  %v153_v58 = vpop.f32.mrb[3].mxu0  ;;  %v194_v59 = vpop.f32.mrb[3].mxu1 }
 0x135   :  { %v369_v60 = vadd.f32 %v335_v42, %v320_v50  ;;  %v4289_v61 = vadd.f32 %v343_v43, %v322_v51 }
 0x136   :  { %v376_v62 = vmax.f32 %v4285_v56, 0.0  ;;  %v378_v63 = vmax.f32 %v4287_v57, 0.0 }
 0x137   :  { %v377_v2 = vmax.f32 %v369_v60, 0.0  ;;  %v379_v3 = vmax.f32 %v4289_v61, 0.0 }
 0x139   :  { %v230_v8 = vpop.f32.mrb[4].mxu0  ;;  %v271_v9 = vpop.f32.mrb[4].mxu1 }
 0x13a   :  { %v323_v12 = vmul.f32 %v298_v0, %v230_v8  ;;  %v325_v13 = vmul.f32 %v306_v1, %v271_v9  ;;  %v232_v14 = vpop.f32.mrb[5].mxu0  ;;  %v273_v15 = vpop.f32.mrb[5].mxu1 }
 0x13b   :  { %v324_v16 = vmul.f32 %v302_v4, %v232_v14  ;;  %v326_v17 = vmul.f32 %v310_v5, %v273_v15  ;;  %v234_v18 = vpop.f32.mrb[6].mxu0  ;;  %v275_v19 = vpop.f32.mrb[6].mxu1 }
 0x13c   :  { %v4302_v20 = vadd.f32 %v347_v6, %v323_v12  ;;  %v4304_v21 = vadd.f32 %v355_v7, %v325_v13  ;;  %v235_v22 = vpop.f32.mrb[7].mxu0  ;;  %v276_v23 = vpop.f32.mrb[7].mxu1 }
 0x13d   :  { %v4306_v24 = vadd.f32 %v351_v10, %v324_v16  ;;  %v4308_v25 = vadd.f32 %v359_v11, %v326_v17 }
 0x13e   :  { %v380_v26 = vmax.f32 %v4302_v20, 0.0  ;;  %v382_v27 = vmax.f32 %v4304_v21, 0.0 }
 0x13f   :  { %v381_v30 = vmax.f32 %v4306_v24, 0.0  ;;  %v383_v33 = vmax.f32 %v4308_v25, 0.0 }
 0x140   :  { %4136 = dma.done.wait [#allocation6 + $0x1], 32768 }
 0x141   :  { %4137 = vsyncadd [#allocation6 + $0x1], 4294934528  ;;  %v4314_v34 = vpack.c.bf16 %v377_v2, %v377_v2  ;;  %v401_v35 = vld [vmem:[#allocation3 + $0x8] sm:$0xff]  ;;  %v403_v36 = vld [vmem:[#allocation3 + $0x18] sm:$0xff] }
 0x142   :  { %v400_v37 = vld [vmem:[#allocation3] sm:$0xff]  ;;  %v657_v38 = vunpack.c.l.s8.bf16 %v401_v35  ;;  %v665_v39 = vunpack.c.h.s8.bf16 %v401_v35  ;;  %v659_v40 = vunpack.c.l.s8.bf16 %v403_v36  ;;  %v667_v41 = vunpack.c.h.s8.bf16 %v403_v36  ;;  %v402_v42 = vld [vmem:[#allocation3 + $0x10] sm:$0xff]  ;;  %v409_v45 = vld [vmem:[#allocation3 + $0x48] sm:$0xff] }
 0x143   :  { %1200 = vmatprep.mubr.bf16.mxu0 %v4314_v34  ;;  %1364 = vmatprep.mubr.bf16.mxu1 %v4314_v34  ;;  %v656_v43 = vunpack.c.l.s8.bf16 %v400_v37  ;;  %v658_v44 = vunpack.c.l.s8.bf16 %v402_v42  ;;  %v411_v46 = vld [vmem:[#allocation3 + $0x58] sm:$0xff]  ;;  %v664_v47 = vunpack.c.h.s8.bf16 %v400_v37  ;;  %v666_v50 = vunpack.c.h.s8.bf16 %v402_v42  ;;  %v408_v53 = vld [vmem:[#allocation3 + $0x40] sm:$0xff]  ;;  %v410_v58 = vld [vmem:[#allocation3 + $0x50] sm:$0xff] }
 0x144   :  { %1168 = vmatprep.subr.bf16.mxu0 %v657_v38  ;;  %1332 = vmatprep.subr.bf16.mxu1 %v659_v40  ;;  %v673_v51 = vunpack.c.l.s8.bf16 %v409_v45  ;;  %v675_v52 = vunpack.c.l.s8.bf16 %v411_v46  ;;  %v672_v59 = vunpack.c.l.s8.bf16 %v408_v53  ;;  %v674_v60 = vunpack.c.l.s8.bf16 %v410_v58  ;;  %v417_v2 = vld [vmem:[#allocation3 + $0x88] sm:$0xff]  ;;  %v419_v4 = vld [vmem:[#allocation3 + $0x98] sm:$0xff]  ;;  %v416_v9 = vld [vmem:[#allocation3 + $0x80] sm:$0xff] }
 0x145   :  { %1169 = vmatpush1.bf16.msra.mxu0 %v656_v43  ;;  %1333 = vmatpush1.bf16.msra.mxu1 %v658_v44  ;;  %v681_v0 = vunpack.c.h.s8.bf16 %v409_v45  ;;  %v683_v1 = vunpack.c.h.s8.bf16 %v411_v46  ;;  %v680_v5 = vunpack.c.h.s8.bf16 %v408_v53  ;;  %v682_v6 = vunpack.c.h.s8.bf16 %v410_v58  ;;  %v418_v10 = vld [vmem:[#allocation3 + $0x90] sm:$0xff]  ;;  %v425_v15 = vld [vmem:[#allocation3 + $0xc8] sm:$0xff]  ;;  %v427_v16 = vld [vmem:[#allocation3 + $0xd8] sm:$0xff] }
 0x146   :  { %1170 = vmatprep.subr.bf16.mxu0 %v665_v39  ;;  %1334 = vmatprep.subr.bf16.mxu1 %v667_v41  ;;  %v689_v7 = vunpack.c.l.s8.bf16 %v417_v2  ;;  %v691_v8 = vunpack.c.l.s8.bf16 %v419_v4  ;;  %v688_v11 = vunpack.c.l.s8.bf16 %v416_v9  ;;  %v690_v12 = vunpack.c.l.s8.bf16 %v418_v10  ;;  %v424_v23 = vld [vmem:[#allocation3 + $0xc0] sm:$0xff]  ;;  %v426_v35 = vld [vmem:[#allocation3 + $0xd0] sm:$0xff]  ;;  %v433_v40 = vld [vmem:[#allocation3 + $0x108] sm:$0xff] }
 0x147   :  { %v697_v13 = vunpack.c.h.s8.bf16 %v417_v2  ;;  %v699_v14 = vunpack.c.h.s8.bf16 %v419_v4  ;;  %v696_v17 = vunpack.c.h.s8.bf16 %v416_v9  ;;  %v698_v18 = vunpack.c.h.s8.bf16 %v418_v10  ;;  %v435_v41 = vld [vmem:[#allocation3 + $0x118] sm:$0xff]  ;;  %v432_v46 = vld [vmem:[#allocation3 + $0x100] sm:$0xff]  ;;  %v441_v58 = vld [vmem:[#allocation3 + $0x148] sm:$0xff] }
 0x148   :  { %v705_v19 = vunpack.c.l.s8.bf16 %v425_v15  ;;  %v707_v22 = vunpack.c.l.s8.bf16 %v427_v16  ;;  %v704_v36 = vunpack.c.l.s8.bf16 %v424_v23  ;;  %v706_v37 = vunpack.c.l.s8.bf16 %v426_v35  ;;  %v440_v4 = vld [vmem:[#allocation3 + $0x140] sm:$0xff]  ;;  %v449_v10 = vld [vmem:[#allocation3 + $0x188] sm:$0xff] }
 0x149   :  { %1171 = vmatpush1.bf16.msra.mxu0 %v664_v47  ;;  %1335 = vmatpush1.bf16.msra.mxu1 %v666_v50  ;;  %v713_v38 = vunpack.c.h.s8.bf16 %v425_v15  ;;  %v715_v39 = vunpack.c.h.s8.bf16 %v427_v16  ;;  %v712_v42 = vunpack.c.h.s8.bf16 %v424_v23  ;;  %v714_v43 = vunpack.c.h.s8.bf16 %v426_v35  ;;  %v434_v47 = vld [vmem:[#allocation3 + $0x110] sm:$0xff]  ;;  %v448_v16 = vld [vmem:[#allocation3 + $0x180] sm:$0xff]  ;;  %v457_v35 = vld [vmem:[#allocation3 + $0x1c8] sm:$0xff] }
 0x14a   :  { %1172 = vmatprep.subr.bf16.mxu0 %v673_v51  ;;  %1336 = vmatprep.subr.bf16.mxu1 %v675_v52  ;;  %v721_v44 = vunpack.c.l.s8.bf16 %v433_v40  ;;  %v723_v45 = vunpack.c.l.s8.bf16 %v435_v41  ;;  %v720_v50 = vunpack.c.l.s8.bf16 %v432_v46  ;;  %v722_v51 = vunpack.c.l.s8.bf16 %v434_v47 }
 0x14b   :  { %v729_v52 = vunpack.c.h.s8.bf16 %v433_v40  ;;  %v731_v53 = vunpack.c.h.s8.bf16 %v435_v41  ;;  %v456_v41 = vld [vmem:[#allocation3 + $0x1c0] sm:$0xff] }
 0x14d   :  { %1173 = vmatpush1.bf16.msra.mxu0 %v672_v59  ;;  %1337 = vmatpush1.bf16.msra.mxu1 %v674_v60  ;;  %v443_v59 = vld [vmem:[#allocation3 + $0x158] sm:$0xff]  ;;  %v728_v60 = vunpack.c.h.s8.bf16 %v432_v46 }
 0x14e   :  { %1174 = vmatprep.subr.bf16.mxu0 %v681_v0  ;;  %1338 = vmatprep.subr.bf16.mxu1 %v683_v1  ;;  %v730_v0 = vunpack.c.h.s8.bf16 %v434_v47  ;;  %v737_v1 = vunpack.c.l.s8.bf16 %v441_v58  ;;  %v739_v2 = vunpack.c.l.s8.bf16 %v443_v59  ;;  %v747_v9 = vunpack.c.h.s8.bf16 %v443_v59  ;;  %v465_v47 = vld [vmem:[#allocation3 + $0x208] sm:$0xff]  ;;  %v464_v59 = vld [vmem:[#allocation3 + $0x200] sm:$0xff] }
 0x14f   :  { %v792_v56 = vunpack.c.h.s8.bf16 %v464_v59 }
 0x151   :  { %1175 = vmatpush1.bf16.msra.mxu0 %v680_v5  ;;  %1339 = vmatpush1.bf16.msra.mxu1 %v682_v6  ;;  %v442_v5 = vld [vmem:[#allocation3 + $0x150] sm:$0xff]  ;;  %v736_v6 = vunpack.c.l.s8.bf16 %v440_v4 }
 0x152   :  { %1176 = vmatprep.subr.bf16.mxu0 %v689_v7  ;;  %1340 = vmatprep.subr.bf16.mxu1 %v691_v8  ;;  %v738_v7 = vunpack.c.l.s8.bf16 %v442_v5  ;;  %v745_v8 = vunpack.c.h.s8.bf16 %v441_v58 }
 0x155   :  { %1177 = vmatpush1.bf16.msra.mxu0 %v688_v11  ;;  %1341 = vmatpush1.bf16.msra.mxu1 %v690_v12  ;;  %v451_v11 = vld [vmem:[#allocation3 + $0x198] sm:$0xff]  ;;  %v744_v12 = vunpack.c.h.s8.bf16 %v440_v4  ;;  %v793_v4 = vunpack.c.h.s8.bf16 %v465_v47 }
 0x156   :  { %1178 = vmatprep.subr.bf16.mxu0 %v697_v13  ;;  %1342 = vmatprep.subr.bf16.mxu1 %v699_v14  ;;  %v746_v13 = vunpack.c.h.s8.bf16 %v442_v5  ;;  %v753_v14 = vunpack.c.l.s8.bf16 %v449_v10  ;;  %v755_v15 = vunpack.c.l.s8.bf16 %v451_v11  ;;  %v763_v23 = vunpack.c.h.s8.bf16 %v451_v11  ;;  %v472_v11 = vld [vmem:[#allocation3 + $0x240] sm:$0xff] }
 0x157   :  { %v800_v61 = vunpack.c.l.s8.bf16 %v472_v11 }
 0x159   :  { %1179 = vmatpush1.bf16.msra.mxu0 %v696_v17  ;;  %1343 = vmatpush1.bf16.msra.mxu1 %v698_v18  ;;  %v450_v17 = vld [vmem:[#allocation3 + $0x190] sm:$0xff]  ;;  %v752_v18 = vunpack.c.l.s8.bf16 %v448_v16 }
 0x15a   :  { %1180 = vmatprep.subr.bf16.mxu0 %v705_v19  ;;  %1344 = vmatprep.subr.bf16.mxu1 %v707_v22  ;;  %v754_v19 = vunpack.c.l.s8.bf16 %v450_v17  ;;  %v761_v22 = vunpack.c.h.s8.bf16 %v449_v10 }
 0x15d   :  { %1181 = vmatpush1.bf16.msra.mxu0 %v704_v36  ;;  %1345 = vmatpush1.bf16.msra.mxu1 %v706_v37  ;;  %v459_v36 = vld [vmem:[#allocation3 + $0x1d8] sm:$0xff]  ;;  %v760_v37 = vunpack.c.h.s8.bf16 %v448_v16 }
 0x15e   :  { %1182 = vmatprep.subr.bf16.mxu0 %v713_v38  ;;  %1346 = vmatprep.subr.bf16.mxu1 %v715_v39  ;;  %v762_v38 = vunpack.c.h.s8.bf16 %v450_v17  ;;  %v769_v39 = vunpack.c.l.s8.bf16 %v457_v35  ;;  %v771_v40 = vunpack.c.l.s8.bf16 %v459_v36  ;;  %v779_v46 = vunpack.c.h.s8.bf16 %v459_v36  ;;  %v483_v16 = vld [vmem:[#allocation3 + $0x298] sm:$0xff] }
 0x15f   :  { %v808_v17 = vunpack.c.h.s8.bf16 %v472_v11  ;;  %v507_v11 = vld [vmem:[#allocation3 + $0x358] sm:$0xff] }
 0x161   :  { %1183 = vmatpush1.bf16.msra.mxu0 %v712_v42  ;;  %1347 = vmatpush1.bf16.msra.mxu1 %v714_v43  ;;  %v458_v42 = vld [vmem:[#allocation3 + $0x1d0] sm:$0xff]  ;;  %v768_v43 = vunpack.c.l.s8.bf16 %v456_v41 }
 0x162   :  { %1184 = vmatprep.subr.bf16.mxu0 %v721_v44  ;;  %1348 = vmatprep.subr.bf16.mxu1 %v723_v45  ;;  %v770_v44 = vunpack.c.l.s8.bf16 %v458_v42  ;;  %v777_v45 = vunpack.c.h.s8.bf16 %v457_v35  ;;  %v482_v35 = vld [vmem:[#allocation3 + $0x290] sm:$0xff] }
 0x165   :  { %1185 = vmatpush1.bf16.msra.mxu0 %v720_v50  ;;  %1349 = vmatpush1.bf16.msra.mxu1 %v722_v51  ;;  %v467_v50 = vld [vmem:[#allocation3 + $0x218] sm:$0xff]  ;;  %v776_v51 = vunpack.c.h.s8.bf16 %v456_v41 }
 0x166   :  { %1186 = vmatprep.subr.bf16.mxu0 %v729_v52  ;;  %1350 = vmatprep.subr.bf16.mxu1 %v731_v53  ;;  %v778_v52 = vunpack.c.h.s8.bf16 %v458_v42  ;;  %v785_v53 = vunpack.c.l.s8.bf16 %v465_v47  ;;  %v787_v58 = vunpack.c.l.s8.bf16 %v467_v50  ;;  %v795_v5 = vunpack.c.h.s8.bf16 %v467_v50  ;;  %v491_v41 = vld [vmem:[#allocation3 + $0x2d8] sm:$0xff]  ;;  %v490_v47 = vld [vmem:[#allocation3 + $0x2d0] sm:$0xff] }
 0x169   :  { %1187 = vmatpush1.bf16.msra.mxu0 %v728_v60  ;;  %1351 = vmatpush1.bf16.msra.mxu1 %v730_v0  ;;  %v466_v60 = vld [vmem:[#allocation3 + $0x210] sm:$0xff]  ;;  %v4321_v0 = vpack.c.bf16 %v376_v62, %v376_v62 }
 0x16a   :  { %1188 = vmatprep.subr.bf16.mxu0 %v737_v1  ;;  %1352 = vmatprep.subr.bf16.mxu1 %v739_v2  ;;  %v784_v1 = vunpack.c.l.s8.bf16 %v464_v59  ;;  %v786_v2 = vunpack.c.l.s8.bf16 %v466_v60  ;;  %v794_v62 = vunpack.c.h.s8.bf16 %v466_v60  ;;  %v499_v59 = vld [vmem:[#allocation3 + $0x318] sm:$0xff] }
 0x16d   :  { %1189 = vmatpush1.bf16.msra.mxu0 %v736_v6  ;;  %1353 = vmatpush1.bf16.msra.mxu1 %v738_v7  ;;  %v473_v6 = vld [vmem:[#allocation3 + $0x248] sm:$0xff]  ;;  %v475_v7 = vld [vmem:[#allocation3 + $0x258] sm:$0xff] }
 0x16e   :  { %1190 = vmatprep.subr.bf16.mxu0 %v745_v8  ;;  %1354 = vmatprep.subr.bf16.mxu1 %v747_v9  ;;  %v4326_v8 = vpack.c.bf16 %v379_v3, %v379_v3  ;;  %v801_v9 = vunpack.c.l.s8.bf16 %v473_v6  ;;  %v803_v10 = vunpack.c.l.s8.bf16 %v475_v7 }
 0x171   :  { %1191 = vmatpush1.bf16.msra.mxu0 %v744_v12  ;;  %1355 = vmatpush1.bf16.msra.mxu1 %v746_v13  ;;  %v474_v12 = vld [vmem:[#allocation3 + $0x250] sm:$0xff]  ;;  %v809_v13 = vunpack.c.h.s8.bf16 %v473_v6 }
 0x172   :  { %1192 = vmatprep.subr.bf16.mxu0 %v753_v14  ;;  %1356 = vmatprep.subr.bf16.mxu1 %v755_v15  ;;  %v802_v3 = vunpack.c.l.s8.bf16 %v474_v12  ;;  %v811_v14 = vunpack.c.h.s8.bf16 %v475_v7  ;;  %v481_v15 = vld [vmem:[#allocation3 + $0x288] sm:$0xff]  ;;  %v498_v6 = vld [vmem:[#allocation3 + $0x310] sm:$0xff] }
 0x175   :  { %1193 = vmatpush1.bf16.msra.mxu0 %v752_v18  ;;  %1357 = vmatpush1.bf16.msra.mxu1 %v754_v19  ;;  %v810_v18 = vunpack.c.h.s8.bf16 %v474_v12  ;;  %v817_v19 = vunpack.c.l.s8.bf16 %v481_v15 }
 0x176   :  { %1194 = vmatprep.subr.bf16.mxu0 %v761_v22  ;;  %1358 = vmatprep.subr.bf16.mxu1 %v763_v23  ;;  %v819_v22 = vunpack.c.l.s8.bf16 %v483_v16  ;;  %v480_v23 = vld [vmem:[#allocation3 + $0x280] sm:$0xff] }
 0x177   :  { %v816_v36 = vunpack.c.l.s8.bf16 %v480_v23  ;;  %v824_v42 = vunpack.c.h.s8.bf16 %v480_v23  ;;  %v515_v23 = vld [vmem:[#allocation3 + $0x398] sm:$0xff] }
 0x179   :  { %1195 = vmatpush1.bf16.msra.mxu0 %v760_v37  ;;  %1359 = vmatpush1.bf16.msra.mxu1 %v762_v38  ;;  %v818_v37 = vunpack.c.l.s8.bf16 %v482_v35  ;;  %v825_v38 = vunpack.c.h.s8.bf16 %v481_v15  ;;  %v506_v15 = vld [vmem:[#allocation3 + $0x350] sm:$0xff] }
 0x17a   :  { %1196 = vmatprep.subr.bf16.mxu0 %v769_v39  ;;  %1360 = vmatprep.subr.bf16.mxu1 %v771_v40  ;;  %v827_v39 = vunpack.c.h.s8.bf16 %v483_v16  ;;  %v489_v40 = vld [vmem:[#allocation3 + $0x2c8] sm:$0xff] }
 0x17d   :  { %1197 = vmatpush1.bf16.msra.mxu0 %v768_v43  ;;  %1361 = vmatpush1.bf16.msra.mxu1 %v770_v44  ;;  %v826_v43 = vunpack.c.h.s8.bf16 %v482_v35  ;;  %v833_v44 = vunpack.c.l.s8.bf16 %v489_v40 }
 0x17e   :  { %1198 = vmatprep.subr.bf16.mxu0 %v777_v45  ;;  %1362 = vmatprep.subr.bf16.mxu1 %v779_v46  ;;  %v835_v45 = vunpack.c.l.s8.bf16 %v491_v41  ;;  %v488_v46 = vld [vmem:[#allocation3 + $0x2c0] sm:$0xff] }
 0x17f   :  { %v832_v50 = vunpack.c.l.s8.bf16 %v488_v46  ;;  %v840_v60 = vunpack.c.h.s8.bf16 %v488_v46  ;;  %v523_v46 = vld [vmem:[#allocation3 + $0x3d8] sm:$0xff] }
 0x181   :  { %1199 = vmatpush1.bf16.msra.mxu0 %v776_v51  ;;  %1363 = vmatpush1.bf16.msra.mxu1 %v778_v52  ;;  %v834_v51 = vunpack.c.l.s8.bf16 %v490_v47  ;;  %v841_v52 = vunpack.c.h.s8.bf16 %v489_v40  ;;  %v514_v40 = vld [vmem:[#allocation3 + $0x390] sm:$0xff] }
 0x182   :  { %1209 = vmatprep.subr.bf16.mxu0 %v785_v53  ;;  %1373 = vmatprep.subr.bf16.mxu1 %v787_v58  ;;  %v843_v53 = vunpack.c.h.s8.bf16 %v491_v41  ;;  %v497_v58 = vld [vmem:[#allocation3 + $0x308] sm:$0xff] }
 0x184   :  { %1201 = vmatmul.mubr.bf16.vlgmr.msra.gmra.mrb[8].mxu0 %v4321_v0  ;;  %1365 = vmatmul.mubr.bf16.vlgmr.msra.gmra.mrb[8].mxu1 %v4321_v0 }
 0x185   :  { %1210 = vmatpush1.bf16.msra.mxu0 %v784_v1  ;;  %1374 = vmatpush1.bf16.msra.mxu1 %v786_v2  ;;  %v842_v1 = vunpack.c.h.s8.bf16 %v490_v47  ;;  %v849_v2 = vunpack.c.l.s8.bf16 %v497_v58 }
 0x186   :  { %1211 = vmatprep.subr.bf16.mxu0 %v793_v4  ;;  %1375 = vmatprep.subr.bf16.mxu1 %v795_v5  ;;  %v851_v4 = vunpack.c.l.s8.bf16 %v499_v59  ;;  %v496_v5 = vld [vmem:[#allocation3 + $0x300] sm:$0xff] }
 0x187   :  { %1241 = vmatprep.mubr.bf16.mxu0 %v4326_v8  ;;  %1405 = vmatprep.mubr.bf16.mxu1 %v4326_v8  ;;  %v848_v7 = vunpack.c.l.s8.bf16 %v496_v5  ;;  %v856_v12 = vunpack.c.h.s8.bf16 %v496_v5  ;;  %v531_v5 = vld [vmem:[#allocation3 + $0x418] sm:$0xff] }
 0x189   :  { %1212 = vmatpush1.bf16.msra.mxu0 %v792_v56  ;;  %1376 = vmatpush1.bf16.msra.mxu1 %v794_v62  ;;  %v850_v56 = vunpack.c.l.s8.bf16 %v498_v6  ;;  %v857_v62 = vunpack.c.h.s8.bf16 %v497_v58  ;;  %v522_v58 = vld [vmem:[#allocation3 + $0x3d0] sm:$0xff] }
 0x18a   :  { %1213 = vmatprep.subr.bf16.mxu0 %v801_v9  ;;  %1377 = vmatprep.subr.bf16.mxu1 %v803_v10  ;;  %v859_v9 = vunpack.c.h.s8.bf16 %v499_v59  ;;  %v505_v10 = vld [vmem:[#allocation3 + $0x348] sm:$0xff] }
 0x18d   :  { %1214 = vmatpush1.bf16.msra.mxu0 %v800_v61  ;;  %1378 = vmatpush1.bf16.msra.mxu1 %v802_v3  ;;  %v858_v61 = vunpack.c.h.s8.bf16 %v498_v6  ;;  %v865_v3 = vunpack.c.l.s8.bf16 %v505_v10 }
 0x18e   :  { %1215 = vmatprep.subr.bf16.mxu0 %v809_v13  ;;  %1379 = vmatprep.subr.bf16.mxu1 %v811_v14  ;;  %v867_v13 = vunpack.c.l.s8.bf16 %v507_v11  ;;  %v504_v14 = vld [vmem:[#allocation3 + $0x340] sm:$0xff] }
 0x18f   :  { %v864_v16 = vunpack.c.l.s8.bf16 %v504_v14  ;;  %v872_v35 = vunpack.c.h.s8.bf16 %v504_v14  ;;  %v537_v14 = vld [vmem:[#allocation3 + $0x448] sm:$0xff] }
 0x191   :  { %1216 = vmatpush1.bf16.msra.mxu0 %v808_v17  ;;  %1380 = vmatpush1.bf16.msra.mxu1 %v810_v18  ;;  %v866_v17 = vunpack.c.l.s8.bf16 %v506_v15  ;;  %v873_v18 = vunpack.c.h.s8.bf16 %v505_v10  ;;  %v530_v10 = vld [vmem:[#allocation3 + $0x410] sm:$0xff] }
 0x192   :  { %1217 = vmatprep.subr.bf16.mxu0 %v817_v19  ;;  %1381 = vmatprep.subr.bf16.mxu1 %v819_v22  ;;  %v875_v19 = vunpack.c.h.s8.bf16 %v507_v11  ;;  %v513_v22 = vld [vmem:[#allocation3 + $0x388] sm:$0xff]  ;;  %v4335_v11 = vpack.c.bf16 %v378_v63, %v378_v63  ;;  %v922_v63 = vunpack.c.h.s8.bf16 %v530_v10 }
 0x195   :  { %1218 = vmatpush1.bf16.msra.mxu0 %v816_v36  ;;  %1382 = vmatpush1.bf16.msra.mxu1 %v818_v37  ;;  %v874_v36 = vunpack.c.h.s8.bf16 %v506_v15  ;;  %v881_v37 = vunpack.c.l.s8.bf16 %v513_v22  ;;  %v539_v15 = vld [vmem:[#allocation3 + $0x458] sm:$0xff] }
 0x196   :  { %1219 = vmatprep.subr.bf16.mxu0 %v825_v38  ;;  %1383 = vmatprep.subr.bf16.mxu1 %v827_v39  ;;  %v883_v38 = vunpack.c.l.s8.bf16 %v515_v23  ;;  %v512_v39 = vld [vmem:[#allocation3 + $0x380] sm:$0xff] }
 0x197   :  { %v880_v41 = vunpack.c.l.s8.bf16 %v512_v39  ;;  %v888_v47 = vunpack.c.h.s8.bf16 %v512_v39 }
 0x199   :  { %1220 = vmatpush1.bf16.msra.mxu0 %v824_v42  ;;  %1384 = vmatpush1.bf16.msra.mxu1 %v826_v43  ;;  %v882_v42 = vunpack.c.l.s8.bf16 %v514_v40  ;;  %v889_v43 = vunpack.c.h.s8.bf16 %v513_v22  ;;  %v538_v22 = vld [vmem:[#allocation3 + $0x450] sm:$0xff] }
 0x19a   :  { %1221 = vmatprep.subr.bf16.mxu0 %v833_v44  ;;  %1385 = vmatprep.subr.bf16.mxu1 %v835_v45  ;;  %v891_v44 = vunpack.c.h.s8.bf16 %v515_v23  ;;  %v521_v45 = vld [vmem:[#allocation3 + $0x3c8] sm:$0xff]  ;;  %v937_v23 = vunpack.c.h.s8.bf16 %v537_v14  ;;  %v938_v39 = vunpack.c.h.s8.bf16 %v538_v22 }
 0x19d   :  { %1222 = vmatpush1.bf16.msra.mxu0 %v832_v50  ;;  %1386 = vmatpush1.bf16.msra.mxu1 %v834_v51  ;;  %v890_v50 = vunpack.c.h.s8.bf16 %v514_v40  ;;  %v897_v51 = vunpack.c.l.s8.bf16 %v521_v45 }
 0x19e   :  { %1223 = vmatprep.subr.bf16.mxu0 %v841_v52  ;;  %1387 = vmatprep.subr.bf16.mxu1 %v843_v53  ;;  %v899_v52 = vunpack.c.l.s8.bf16 %v523_v46  ;;  %v520_v53 = vld [vmem:[#allocation3 + $0x3c0] sm:$0xff] }
 0x19f   :  { %v896_v59 = vunpack.c.l.s8.bf16 %v520_v53  ;;  %v904_v6 = vunpack.c.h.s8.bf16 %v520_v53 }
 0x1a1   :  { %1224 = vmatpush1.bf16.msra.mxu0 %v840_v60  ;;  %1388 = vmatpush1.bf16.msra.mxu1 %v842_v1  ;;  %v898_v60 = vunpack.c.l.s8.bf16 %v522_v58  ;;  %v905_v1 = vunpack.c.h.s8.bf16 %v521_v45 }
 0x1a2   :  { %1225 = vmatprep.subr.bf16.mxu0 %v849_v2  ;;  %1389 = vmatprep.subr.bf16.mxu1 %v851_v4  ;;  %v907_v2 = vunpack.c.h.s8.bf16 %v523_v46  ;;  %v529_v4 = vld [vmem:[#allocation3 + $0x408] sm:$0xff] }
 0x1a5   :  { %1226 = vmatpush1.bf16.msra.mxu0 %v848_v7  ;;  %1390 = vmatpush1.bf16.msra.mxu1 %v850_v56  ;;  %v906_v7 = vunpack.c.h.s8.bf16 %v522_v58  ;;  %v913_v56 = vunpack.c.l.s8.bf16 %v529_v4 }
 0x1a6   :  { %1227 = vmatprep.subr.bf16.mxu0 %v857_v62  ;;  %1391 = vmatprep.subr.bf16.mxu1 %v859_v9  ;;  %v915_v62 = vunpack.c.l.s8.bf16 %v531_v5  ;;  %v528_v9 = vld [vmem:[#allocation3 + $0x400] sm:$0xff] }
 0x1a7   :  { %v920_v57 = vunpack.c.h.s8.bf16 %v528_v9 }
 0x1a9   :  { %1228 = vmatpush1.bf16.msra.mxu0 %v856_v12  ;;  %1392 = vmatpush1.bf16.msra.mxu1 %v858_v61  ;;  %v912_v12 = vunpack.c.l.s8.bf16 %v528_v9  ;;  %v914_v61 = vunpack.c.l.s8.bf16 %v530_v10 }
 0x1aa   :  { %1229 = vmatprep.subr.bf16.mxu0 %v865_v3  ;;  %1393 = vmatprep.subr.bf16.mxu1 %v867_v13  ;;  %v921_v3 = vunpack.c.h.s8.bf16 %v529_v4  ;;  %v923_v13 = vunpack.c.h.s8.bf16 %v531_v5 }
 0x1ad   :  { %1230 = vmatpush1.bf16.msra.mxu0 %v864_v16  ;;  %1394 = vmatpush1.bf16.msra.mxu1 %v866_v17  ;;  %v4340_v16 = vpack.c.bf16 %v381_v30, %v381_v30  ;;  %v929_v17 = vunpack.c.l.s8.bf16 %v537_v14  ;;  %v930_v30 = vunpack.c.l.s8.bf16 %v538_v22 }
 0x1ae   :  { %1231 = vmatprep.subr.bf16.mxu0 %v873_v18  ;;  %1395 = vmatprep.subr.bf16.mxu1 %v875_v19  ;;  %v931_v18 = vunpack.c.l.s8.bf16 %v539_v15  ;;  %v536_v19 = vld [vmem:[#allocation3 + $0x440] sm:$0xff] }
 0x1af   :  { %v928_v24 = vunpack.c.l.s8.bf16 %v536_v19 }
 0x1b1   :  { %1232 = vmatpush1.bf16.msra.mxu0 %v872_v35  ;;  %1396 = vmatpush1.bf16.msra.mxu1 %v874_v36  ;;  %v939_v35 = vunpack.c.h.s8.bf16 %v539_v15  ;;  %v545_v36 = vld [vmem:[#allocation3 + $0x488] sm:$0xff] }
 0x1b2   :  { %1233 = vmatprep.subr.bf16.mxu0 %v881_v37  ;;  %1397 = vmatprep.subr.bf16.mxu1 %v883_v38  ;;  %v547_v37 = vld [vmem:[#allocation3 + $0x498] sm:$0xff]  ;;  %v936_v38 = vunpack.c.h.s8.bf16 %v536_v19  ;;  %v945_v40 = vunpack.c.l.s8.bf16 %v545_v36  ;;  %v953_v46 = vunpack.c.h.s8.bf16 %v545_v36 }
 0x1b5   :  { %1234 = vmatpush1.bf16.msra.mxu0 %v880_v41  ;;  %1398 = vmatpush1.bf16.msra.mxu1 %v882_v42  ;;  %v947_v41 = vunpack.c.l.s8.bf16 %v547_v37  ;;  %v544_v42 = vld [vmem:[#allocation3 + $0x480] sm:$0xff] }
 0x1b6   :  { %1235 = vmatprep.subr.bf16.mxu0 %v889_v43  ;;  %1399 = vmatprep.subr.bf16.mxu1 %v891_v44  ;;  %v546_v43 = vld [vmem:[#allocation3 + $0x490] sm:$0xff]  ;;  %v944_v44 = vunpack.c.l.s8.bf16 %v544_v42 }
 0x1b7   :  { %v946_v45 = vunpack.c.l.s8.bf16 %v546_v43  ;;  %v954_v53 = vunpack.c.h.s8.bf16 %v546_v43 }
 0x1b9   :  { %1236 = vmatpush1.bf16.msra.mxu0 %v888_v47  ;;  %1400 = vmatpush1.bf16.msra.mxu1 %v890_v50  ;;  %v955_v47 = vunpack.c.h.s8.bf16 %v547_v37  ;;  %v553_v50 = vld [vmem:[#allocation3 + $0x4c8] sm:$0xff] }
 0x1ba   :  { %1237 = vmatprep.subr.bf16.mxu0 %v897_v51  ;;  %1401 = vmatprep.subr.bf16.mxu1 %v899_v52  ;;  %v555_v51 = vld [vmem:[#allocation3 + $0x4d8] sm:$0xff]  ;;  %v952_v52 = vunpack.c.h.s8.bf16 %v544_v42  ;;  %v961_v58 = vunpack.c.l.s8.bf16 %v553_v50  ;;  %v969_v5 = vunpack.c.h.s8.bf16 %v553_v50 }
 0x1bd   :  { %1238 = vmatpush1.bf16.msra.mxu0 %v896_v59  ;;  %1402 = vmatpush1.bf16.msra.mxu1 %v898_v60  ;;  %v963_v59 = vunpack.c.l.s8.bf16 %v555_v51  ;;  %v552_v60 = vld [vmem:[#allocation3 + $0x4c0] sm:$0xff] }
 0x1be   :  { %1239 = vmatprep.subr.bf16.mxu0 %v905_v1  ;;  %1403 = vmatprep.subr.bf16.mxu1 %v907_v2  ;;  %v554_v1 = vld [vmem:[#allocation3 + $0x4d0] sm:$0xff]  ;;  %v960_v2 = vunpack.c.l.s8.bf16 %v552_v60 }
 0x1bf   :  { %v962_v4 = vunpack.c.l.s8.bf16 %v554_v1  ;;  %v970_v9 = vunpack.c.h.s8.bf16 %v554_v1 }
 0x1c1   :  { %1240 = vmatpush1.bf16.msra.mxu0 %v904_v6  ;;  %1404 = vmatpush1.bf16.msra.mxu1 %v906_v7  ;;  %v971_v6 = vunpack.c.h.s8.bf16 %v555_v51  ;;  %v561_v7 = vld [vmem:[#allocation3 + $0x508] sm:$0xff] }
 0x1c2   :  { %1250 = vmatprep.subr.bf16.mxu0 %v913_v56  ;;  %1414 = vmatprep.subr.bf16.mxu1 %v915_v62  ;;  %v563_v56 = vld [vmem:[#allocation3 + $0x518] sm:$0xff]  ;;  %v968_v62 = vunpack.c.h.s8.bf16 %v552_v60  ;;  %v977_v10 = vunpack.c.l.s8.bf16 %v561_v7  ;;  %v985_v15 = vunpack.c.h.s8.bf16 %v561_v7 }
 0x1c4   :  { %1242 = vmatmul.mubr.bf16.vlgmr.msra.gmra.mrb[8].mxu0 %v4335_v11  ;;  %1406 = vmatmul.mubr.bf16.vlgmr.msra.gmra.mrb[8].mxu1 %v4335_v11 }
 0x1c5   :  { %1251 = vmatpush1.bf16.msra.mxu0 %v912_v12  ;;  %1415 = vmatpush1.bf16.msra.mxu1 %v914_v61  ;;  %v979_v12 = vunpack.c.l.s8.bf16 %v563_v56  ;;  %v560_v61 = vld [vmem:[#allocation3 + $0x500] sm:$0xff] }
 0x1c6   :  { %1252 = vmatprep.subr.bf16.mxu0 %v921_v3  ;;  %1416 = vmatprep.subr.bf16.mxu1 %v923_v13  ;;  %v562_v3 = vld [vmem:[#allocation3 + $0x510] sm:$0xff]  ;;  %v976_v13 = vunpack.c.l.s8.bf16 %v560_v61 }
 0x1c7   :  { %1282 = vmatprep.mubr.bf16.mxu0 %v4340_v16  ;;  %1446 = vmatprep.mubr.bf16.mxu1 %v4340_v16  ;;  %v978_v14 = vunpack.c.l.s8.bf16 %v562_v3  ;;  %v986_v19 = vunpack.c.h.s8.bf16 %v562_v3 }
 0x1c9   :  { %1253 = vmatpush1.bf16.msra.mxu0 %v920_v57  ;;  %1417 = vmatpush1.bf16.msra.mxu1 %v922_v63  ;;  %v987_v57 = vunpack.c.h.s8.bf16 %v563_v56  ;;  %v569_v63 = vld [vmem:[#allocation3 + $0x548] sm:$0xff] }
 0x1ca   :  { %1254 = vmatprep.subr.bf16.mxu0 %v929_v17  ;;  %1418 = vmatprep.subr.bf16.mxu1 %v931_v18  ;;  %v571_v17 = vld [vmem:[#allocation3 + $0x558] sm:$0xff]  ;;  %v984_v18 = vunpack.c.h.s8.bf16 %v560_v61  ;;  %v993_v22 = vunpack.c.l.s8.bf16 %v569_v63  ;;  %v1001_v37 = vunpack.c.h.s8.bf16 %v569_v63 }
 0x1cd   :  { %1255 = vmatpush1.bf16.msra.mxu0 %v928_v24  ;;  %1419 = vmatpush1.bf16.msra.mxu1 %v930_v30  ;;  %v995_v24 = vunpack.c.l.s8.bf16 %v571_v17  ;;  %v568_v30 = vld [vmem:[#allocation3 + $0x540] sm:$0xff] }
 0x1ce   :  { %1256 = vmatprep.subr.bf16.mxu0 %v937_v23  ;;  %1420 = vmatprep.subr.bf16.mxu1 %v939_v35  ;;  %v570_v23 = vld [vmem:[#allocation3 + $0x550] sm:$0xff]  ;;  %v992_v35 = vunpack.c.l.s8.bf16 %v568_v30 }
 0x1cf   :  { %v994_v36 = vunpack.c.l.s8.bf16 %v570_v23  ;;  %v1002_v42 = vunpack.c.h.s8.bf16 %v570_v23 }
 0x1d1   :  { %1257 = vmatpush1.bf16.msra.mxu0 %v936_v38  ;;  %1421 = vmatpush1.bf16.msra.mxu1 %v938_v39  ;;  %v1003_v38 = vunpack.c.h.s8.bf16 %v571_v17  ;;  %v577_v39 = vld [vmem:[#allocation3 + $0x588] sm:$0xff] }
 0x1d2   :  { %1258 = vmatprep.subr.bf16.mxu0 %v945_v40  ;;  %1422 = vmatprep.subr.bf16.mxu1 %v947_v41  ;;  %v579_v40 = vld [vmem:[#allocation3 + $0x598] sm:$0xff]  ;;  %v1000_v41 = vunpack.c.h.s8.bf16 %v568_v30  ;;  %v1009_v43 = vunpack.c.l.s8.bf16 %v577_v39  ;;  %v1017_v51 = vunpack.c.h.s8.bf16 %v577_v39  ;;  %v4354_v30 = vpack.c.bf16 %v383_v33, %v383_v33 }
 0x1d5   :  { %1259 = vmatpush1.bf16.msra.mxu0 %v944_v44  ;;  %1423 = vmatpush1.bf16.msra.mxu1 %v946_v45  ;;  %v1011_v44 = vunpack.c.l.s8.bf16 %v579_v40  ;;  %v576_v45 = vld [vmem:[#allocation3 + $0x580] sm:$0xff] }
 0x1d6   :  { %1260 = vmatprep.subr.bf16.mxu0 %v953_v46  ;;  %1424 = vmatprep.subr.bf16.mxu1 %v955_v47  ;;  %v578_v46 = vld [vmem:[#allocation3 + $0x590] sm:$0xff]  ;;  %v1008_v47 = vunpack.c.l.s8.bf16 %v576_v45 }
 0x1d7   :  { %v1010_v50 = vunpack.c.l.s8.bf16 %v578_v46  ;;  %v1018_v60 = vunpack.c.h.s8.bf16 %v578_v46  ;;  %v608_v46 = vld [vmem:[#allocation3 + $0x680] sm:$0xff] }
 0x1d9   :  { %1261 = vmatpush1.bf16.msra.mxu0 %v952_v52  ;;  %1425 = vmatpush1.bf16.msra.mxu1 %v954_v53  ;;  %v1019_v52 = vunpack.c.h.s8.bf16 %v579_v40  ;;  %v585_v53 = vld [vmem:[#allocation3 + $0x5c8] sm:$0xff] }
 0x1da   :  { %1262 = vmatprep.subr.bf16.mxu0 %v961_v58  ;;  %1426 = vmatprep.subr.bf16.mxu1 %v963_v59  ;;  %v587_v58 = vld [vmem:[#allocation3 + $0x5d8] sm:$0xff]  ;;  %v1016_v59 = vunpack.c.h.s8.bf16 %v576_v45  ;;  %v1025_v1 = vunpack.c.l.s8.bf16 %v585_v53  ;;  %v1033_v56 = vunpack.c.h.s8.bf16 %v585_v53  ;;  %v609_v40 = vld [vmem:[#allocation3 + $0x688] sm:$0xff] }
 0x1dd   :  { %1263 = vmatpush1.bf16.msra.mxu0 %v960_v2  ;;  %1427 = vmatpush1.bf16.msra.mxu1 %v962_v4  ;;  %v1027_v2 = vunpack.c.l.s8.bf16 %v587_v58  ;;  %v584_v4 = vld [vmem:[#allocation3 + $0x5c0] sm:$0xff] }
 0x1de   :  { %1264 = vmatprep.subr.bf16.mxu0 %v969_v5  ;;  %1428 = vmatprep.subr.bf16.mxu1 %v971_v6  ;;  %v586_v5 = vld [vmem:[#allocation3 + $0x5d0] sm:$0xff]  ;;  %v1024_v6 = vunpack.c.l.s8.bf16 %v584_v4 }
 0x1df   :  { %v1026_v7 = vunpack.c.l.s8.bf16 %v586_v5  ;;  %v1034_v61 = vunpack.c.h.s8.bf16 %v586_v5  ;;  %v616_v5 = vld [vmem:[#allocation3 + $0x6c0] sm:$0xff] }
 0x1e1   :  { %1265 = vmatpush1.bf16.msra.mxu0 %v968_v62  ;;  %1429 = vmatpush1.bf16.msra.mxu1 %v970_v9  ;;  %v1035_v62 = vunpack.c.h.s8.bf16 %v587_v58  ;;  %v593_v9 = vld [vmem:[#allocation3 + $0x608] sm:$0xff] }
 0x1e2   :  { %1266 = vmatprep.subr.bf16.mxu0 %v977_v10  ;;  %1430 = vmatprep.subr.bf16.mxu1 %v979_v12  ;;  %v595_v10 = vld [vmem:[#allocation3 + $0x618] sm:$0xff]  ;;  %v1032_v12 = vunpack.c.h.s8.bf16 %v584_v4  ;;  %v1041_v3 = vunpack.c.l.s8.bf16 %v593_v9  ;;  %v617_v58 = vld [vmem:[#allocation3 + $0x6c8] sm:$0xff] }
 0x1e5   :  { %1267 = vmatpush1.bf16.msra.mxu0 %v976_v13  ;;  %1431 = vmatpush1.bf16.msra.mxu1 %v978_v14  ;;  %v1043_v13 = vunpack.c.l.s8.bf16 %v595_v10  ;;  %v592_v14 = vld [vmem:[#allocation3 + $0x600] sm:$0xff] }
 0x1e6   :  { %1268 = vmatprep.subr.bf16.mxu0 %v985_v15  ;;  %1432 = vmatprep.subr.bf16.mxu1 %v987_v57  ;;  %v594_v15 = vld [vmem:[#allocation3 + $0x610] sm:$0xff]  ;;  %v4349_v57 = vpack.c.bf16 %v380_v26, %v380_v26  ;;  %v1040_v63 = vunpack.c.l.s8.bf16 %v592_v14  ;;  %v1048_v20 = vunpack.c.h.s8.bf16 %v592_v14 }
 0x1e7   :  { %v1042_v17 = vunpack.c.l.s8.bf16 %v594_v15  ;;  %v1050_v26 = vunpack.c.h.s8.bf16 %v594_v15  ;;  %v624_v15 = vld [vmem:[#allocation3 + $0x700] sm:$0xff] }
 0x1e9   :  { %1269 = vmatpush1.bf16.msra.mxu0 %v984_v18  ;;  %1433 = vmatpush1.bf16.msra.mxu1 %v986_v19  ;;  %v1049_v18 = vunpack.c.h.s8.bf16 %v593_v9  ;;  %v1051_v19 = vunpack.c.h.s8.bf16 %v595_v10  ;;  %v625_v10 = vld [vmem:[#allocation3 + $0x708] sm:$0xff] }
 0x1ea   :  { %1270 = vmatprep.subr.bf16.mxu0 %v993_v22  ;;  %1434 = vmatprep.subr.bf16.mxu1 %v995_v24  ;;  %v601_v22 = vld [vmem:[#allocation3 + $0x648] sm:$0xff]  ;;  %v603_v24 = vld [vmem:[#allocation3 + $0x658] sm:$0xff] }
 0x1eb   :  { %v1057_v23 = vunpack.c.l.s8.bf16 %v601_v22  ;;  %v1067_v39 = vunpack.c.h.s8.bf16 %v603_v24 }
 0x1ed   :  { %1271 = vmatpush1.bf16.msra.mxu0 %v992_v35  ;;  %1435 = vmatpush1.bf16.msra.mxu1 %v994_v36  ;;  %v1059_v35 = vunpack.c.l.s8.bf16 %v603_v24  ;;  %v600_v36 = vld [vmem:[#allocation3 + $0x640] sm:$0xff]  ;;  %v633_v24 = vld [vmem:[#allocation3 + $0x748] sm:$0xff] }
 0x1ee   :  { %1272 = vmatprep.subr.bf16.mxu0 %v1001_v37  ;;  %1436 = vmatprep.subr.bf16.mxu1 %v1003_v38  ;;  %v602_v37 = vld [vmem:[#allocation3 + $0x650] sm:$0xff]  ;;  %v1056_v25 = vunpack.c.l.s8.bf16 %v600_v36  ;;  %v1065_v38 = vunpack.c.h.s8.bf16 %v601_v22 }
 0x1ef   :  { %v1058_v33 = vunpack.c.l.s8.bf16 %v602_v37 }
 0x1f1   :  { %1273 = vmatpush1.bf16.msra.mxu0 %v1000_v41  ;;  %1437 = vmatpush1.bf16.msra.mxu1 %v1002_v42  ;;  %v611_v41 = vld [vmem:[#allocation3 + $0x698] sm:$0xff]  ;;  %v1064_v42 = vunpack.c.h.s8.bf16 %v600_v36 }
 0x1f2   :  { %1274 = vmatprep.subr.bf16.mxu0 %v1009_v43  ;;  %1438 = vmatprep.subr.bf16.mxu1 %v1011_v44  ;;  %v1066_v43 = vunpack.c.h.s8.bf16 %v602_v37  ;;  %v1073_v44 = vunpack.c.l.s8.bf16 %v609_v40  ;;  %v1075_v45 = vunpack.c.l.s8.bf16 %v611_v41  ;;  %v1083_v53 = vunpack.c.h.s8.bf16 %v611_v41  ;;  %v632_v37 = vld [vmem:[#allocation3 + $0x740] sm:$0xff]  ;;  %v641_v41 = vld [vmem:[#allocation3 + $0x788] sm:$0xff] }
 0x1f5   :  { %1275 = vmatpush1.bf16.msra.mxu0 %v1008_v47  ;;  %1439 = vmatpush1.bf16.msra.mxu1 %v1010_v50  ;;  %v610_v47 = vld [vmem:[#allocation3 + $0x690] sm:$0xff]  ;;  %v1072_v50 = vunpack.c.l.s8.bf16 %v608_v46 }
 0x1f6   :  { %1276 = vmatprep.subr.bf16.mxu0 %v1017_v51  ;;  %1440 = vmatprep.subr.bf16.mxu1 %v1019_v52  ;;  %v1074_v51 = vunpack.c.l.s8.bf16 %v610_v47  ;;  %v1081_v52 = vunpack.c.h.s8.bf16 %v609_v40 }
 0x1f9   :  { %1277 = vmatpush1.bf16.msra.mxu0 %v1016_v59  ;;  %1441 = vmatpush1.bf16.msra.mxu1 %v1018_v60  ;;  %v619_v59 = vld [vmem:[#allocation3 + $0x6d8] sm:$0xff]  ;;  %v1080_v60 = vunpack.c.h.s8.bf16 %v608_v46 }
 0x1fa   :  { %1278 = vmatprep.subr.bf16.mxu0 %v1025_v1  ;;  %1442 = vmatprep.subr.bf16.mxu1 %v1027_v2  ;;  %v1082_v1 = vunpack.c.h.s8.bf16 %v610_v47  ;;  %v1089_v2 = vunpack.c.l.s8.bf16 %v617_v58  ;;  %v1091_v4 = vunpack.c.l.s8.bf16 %v619_v59  ;;  %v1099_v9 = vunpack.c.h.s8.bf16 %v619_v59  ;;  %v640_v47 = vld [vmem:[#allocation3 + $0x780] sm:$0xff]  ;;  %v649_v59 = vld [vmem:[#allocation3 + $0x7c8] sm:$0xff] }
 0x1fd   :  { %1279 = vmatpush1.bf16.msra.mxu0 %v1024_v6  ;;  %1443 = vmatpush1.bf16.msra.mxu1 %v1026_v7  ;;  %v618_v6 = vld [vmem:[#allocation3 + $0x6d0] sm:$0xff]  ;;  %v1088_v7 = vunpack.c.l.s8.bf16 %v616_v5 }
 0x1fe   :  { %1280 = vmatprep.subr.bf16.mxu0 %v1033_v56  ;;  %1444 = vmatprep.subr.bf16.mxu1 %v1035_v62  ;;  %v1090_v56 = vunpack.c.l.s8.bf16 %v618_v6  ;;  %v1097_v62 = vunpack.c.h.s8.bf16 %v617_v58 }
 0x201   :  { %1281 = vmatpush1.bf16.msra.mxu0 %v1032_v12  ;;  %1445 = vmatpush1.bf16.msra.mxu1 %v1034_v61  ;;  %v627_v12 = vld [vmem:[#allocation3 + $0x718] sm:$0xff]  ;;  %v1096_v61 = vunpack.c.h.s8.bf16 %v616_v5 }
 0x202   :  { %1291 = vmatprep.subr.bf16.mxu0 %v1041_v3  ;;  %1455 = vmatprep.subr.bf16.mxu1 %v1043_v13  ;;  %v1098_v3 = vunpack.c.h.s8.bf16 %v618_v6  ;;  %v1105_v13 = vunpack.c.l.s8.bf16 %v625_v10  ;;  %v1107_v14 = vunpack.c.l.s8.bf16 %v627_v12  ;;  %v1115_v22 = vunpack.c.h.s8.bf16 %v627_v12  ;;  %v648_v6 = vld [vmem:[#allocation3 + $0x7c0] sm:$0xff]  ;;  %v405_v12 = vld [vmem:[#allocation3 + $0x28] sm:$0xff] }
 0x204   :  { %1283 = vmatmul.mubr.bf16.vlgmr.msra.gmra.mrb[8].mxu0 %v4349_v57  ;;  %1447 = vmatmul.mubr.bf16.vlgmr.msra.gmra.mrb[8].mxu1 %v4349_v57 }
 0x205   :  { %1292 = vmatpush1.bf16.msra.mxu0 %v1040_v63  ;;  %1456 = vmatpush1.bf16.msra.mxu1 %v1042_v17  ;;  %v626_v63 = vld [vmem:[#allocation3 + $0x710] sm:$0xff]  ;;  %v1104_v17 = vunpack.c.l.s8.bf16 %v624_v15 }
 0x206   :  { %1293 = vmatprep.subr.bf16.mxu0 %v1049_v18  ;;  %1457 = vmatprep.subr.bf16.mxu1 %v1051_v19  ;;  %v1106_v18 = vunpack.c.l.s8.bf16 %v626_v63  ;;  %v1113_v19 = vunpack.c.h.s8.bf16 %v625_v10 }
 0x207   :  { %1323 = vmatprep.mubr.bf16.mxu0 %v4354_v30  ;;  %1487 = vmatprep.mubr.bf16.mxu1 %v4354_v30 }
 0x209   :  { %1294 = vmatpush1.bf16.msra.mxu0 %v1048_v20  ;;  %1458 = vmatpush1.bf16.msra.mxu1 %v1050_v26  ;;  %v635_v20 = vld [vmem:[#allocation3 + $0x758] sm:$0xff]  ;;  %v1112_v26 = vunpack.c.h.s8.bf16 %v624_v15 }
 0x20a   :  { %1295 = vmatprep.subr.bf16.mxu0 %v1057_v23  ;;  %1459 = vmatprep.subr.bf16.mxu1 %v1059_v35  ;;  %v1114_v23 = vunpack.c.h.s8.bf16 %v626_v63  ;;  %v1121_v35 = vunpack.c.l.s8.bf16 %v633_v24  ;;  %v1123_v36 = vunpack.c.l.s8.bf16 %v635_v20  ;;  %v1131_v40 = vunpack.c.h.s8.bf16 %v635_v20  ;;  %v404_v63 = vld [vmem:[#allocation3 + $0x20] sm:$0xff] }
 0x20b   :  { %v668_v21 = vunpack.c.h.s8.bf16 %v404_v63 }
 0x20d   :  { %1296 = vmatpush1.bf16.msra.mxu0 %v1056_v25  ;;  %1460 = vmatpush1.bf16.msra.mxu1 %v1058_v33  ;;  %v634_v25 = vld [vmem:[#allocation3 + $0x750] sm:$0xff]  ;;  %v1120_v33 = vunpack.c.l.s8.bf16 %v632_v37 }
 0x20e   :  { %1297 = vmatprep.subr.bf16.mxu0 %v1065_v38  ;;  %1461 = vmatprep.subr.bf16.mxu1 %v1067_v39  ;;  %v1122_v38 = vunpack.c.l.s8.bf16 %v634_v25  ;;  %v1129_v39 = vunpack.c.h.s8.bf16 %v633_v24  ;;  %v669_v24 = vunpack.c.h.s8.bf16 %v405_v12 }
 0x211   :  { %1298 = vmatpush1.bf16.msra.mxu0 %v1064_v42  ;;  %1462 = vmatpush1.bf16.msra.mxu1 %v1066_v43  ;;  %v643_v42 = vld [vmem:[#allocation3 + $0x798] sm:$0xff]  ;;  %v1128_v43 = vunpack.c.h.s8.bf16 %v632_v37  ;;  %v412_v37 = vld [vmem:[#allocation3 + $0x60] sm:$0xff] }
 0x212   :  { %1299 = vmatprep.subr.bf16.mxu0 %v1073_v44  ;;  %1463 = vmatprep.subr.bf16.mxu1 %v1075_v45  ;;  %v1130_v44 = vunpack.c.h.s8.bf16 %v634_v25  ;;  %v1137_v45 = vunpack.c.l.s8.bf16 %v641_v41  ;;  %v1139_v46 = vunpack.c.l.s8.bf16 %v643_v42  ;;  %v1147_v58 = vunpack.c.h.s8.bf16 %v643_v42  ;;  %v414_v25 = vld [vmem:[#allocation3 + $0x70] sm:$0xff]  ;;  %v423_v42 = vld [vmem:[#allocation3 + $0xb8] sm:$0xff] }
 0x215   :  { %1300 = vmatpush1.bf16.msra.mxu0 %v1072_v50  ;;  %1464 = vmatpush1.bf16.msra.mxu1 %v1074_v51  ;;  %v642_v50 = vld [vmem:[#allocation3 + $0x790] sm:$0xff]  ;;  %v1136_v51 = vunpack.c.l.s8.bf16 %v640_v47 }
 0x216   :  { %1301 = vmatprep.subr.bf16.mxu0 %v1081_v52  ;;  %1465 = vmatprep.subr.bf16.mxu1 %v1083_v53  ;;  %v1138_v52 = vunpack.c.l.s8.bf16 %v642_v50  ;;  %v1145_v53 = vunpack.c.h.s8.bf16 %v641_v41  ;;  %v421_v41 = vld [vmem:[#allocation3 + $0xa8] sm:$0xff] }
 0x219   :  { %1302 = vmatpush1.bf16.msra.mxu0 %v1080_v60  ;;  %1466 = vmatpush1.bf16.msra.mxu1 %v1082_v1  ;;  %v651_v60 = vld [vmem:[#allocation3 + $0x7d8] sm:$0xff]  ;;  %v1144_v1 = vunpack.c.h.s8.bf16 %v640_v47  ;;  %v420_v47 = vld [vmem:[#allocation3 + $0xa0] sm:$0xff] }
 0x21a   :  { %1303 = vmatprep.subr.bf16.mxu0 %v1089_v2  ;;  %1467 = vmatprep.subr.bf16.mxu1 %v1091_v4  ;;  %v1146_v2 = vunpack.c.h.s8.bf16 %v642_v50  ;;  %v1153_v4 = vunpack.c.l.s8.bf16 %v649_v59  ;;  %v1155_v5 = vunpack.c.l.s8.bf16 %v651_v60  ;;  %v1163_v10 = vunpack.c.h.s8.bf16 %v651_v60 }
 0x21b   :  { %v692_v50 = vunpack.c.l.s8.bf16 %v420_v47  ;;  %v700_v60 = vunpack.c.h.s8.bf16 %v420_v47  ;;  %v454_v47 = vld [vmem:[#allocation3 + $0x1b0] sm:$0xff] }
 0x21d   :  { %1304 = vmatpush1.bf16.msra.mxu0 %v1088_v7  ;;  %1468 = vmatpush1.bf16.msra.mxu1 %v1090_v56  ;;  %v650_v7 = vld [vmem:[#allocation3 + $0x7d0] sm:$0xff]  ;;  %v1152_v56 = vunpack.c.l.s8.bf16 %v648_v6 }
 0x21e   :  { %1305 = vmatprep.subr.bf16.mxu0 %v1097_v62  ;;  %1469 = vmatprep.subr.bf16.mxu1 %v1099_v9  ;;  %v1154_v62 = vunpack.c.l.s8.bf16 %v650_v7  ;;  %v1161_v9 = vunpack.c.h.s8.bf16 %v649_v59  ;;  %v431_v59 = vld [vmem:[#allocation3 + $0xf8] sm:$0xff] }
 0x221   :  { %1306 = vmatpush1.bf16.msra.mxu0 %v1096_v61  ;;  %1470 = vmatpush1.bf16.msra.mxu1 %v1098_v3  ;;  %v407_v61 = vld [vmem:[#allocation3 + $0x38] sm:$0xff]  ;;  %v1160_v3 = vunpack.c.h.s8.bf16 %v648_v6  ;;  %v430_v6 = vld [vmem:[#allocation3 + $0xf0] sm:$0xff] }
 0x222   :  { %1307 = vmatprep.subr.bf16.mxu0 %v1105_v13  ;;  %1471 = vmatprep.subr.bf16.mxu1 %v1107_v14  ;;  %v1162_v13 = vunpack.c.h.s8.bf16 %v650_v7  ;;  %v661_v14 = vunpack.c.l.s8.bf16 %v405_v12  ;;  %v663_v15 = vunpack.c.l.s8.bf16 %v407_v61  ;;  %v671_v20 = vunpack.c.h.s8.bf16 %v407_v61  ;;  %v439_v12 = vld [vmem:[#allocation3 + $0x138] sm:$0xff] }
 0x225   :  { %1308 = vmatpush1.bf16.msra.mxu0 %v1104_v17  ;;  %1472 = vmatpush1.bf16.msra.mxu1 %v1106_v18  ;;  %v406_v17 = vld [vmem:[#allocation3 + $0x30] sm:$0xff]  ;;  %v4363_v18 = vpack.c.bf16 %v382_v27, %v382_v27 }
 0x226   :  { %1309 = vmatprep.subr.bf16.mxu0 %v1113_v19  ;;  %1473 = vmatprep.subr.bf16.mxu1 %v1115_v22  ;;  %v660_v19 = vunpack.c.l.s8.bf16 %v404_v63  ;;  %v662_v22 = vunpack.c.l.s8.bf16 %v406_v17  ;;  %v438_v63 = vld [vmem:[#allocation3 + $0x130] sm:$0xff] }
 0x229   :  { %1310 = vmatpush1.bf16.msra.mxu0 %v1112_v26  ;;  %1474 = vmatpush1.bf16.msra.mxu1 %v1114_v23  ;;  %v413_v26 = vld [vmem:[#allocation3 + $0x68] sm:$0xff]  ;;  %v415_v23 = vld [vmem:[#allocation3 + $0x78] sm:$0xff] }
 0x22a   :  { %1311 = vmatprep.subr.bf16.mxu0 %v1121_v35  ;;  %1475 = vmatprep.subr.bf16.mxu1 %v1123_v36  ;;  %v670_v35 = vunpack.c.h.s8.bf16 %v406_v17  ;;  %v677_v27 = vunpack.c.l.s8.bf16 %v413_v26  ;;  %v679_v36 = vunpack.c.l.s8.bf16 %v415_v23 }
 0x22d   :  { %1312 = vmatpush1.bf16.msra.mxu0 %v1120_v33  ;;  %1476 = vmatpush1.bf16.msra.mxu1 %v1122_v38  ;;  %v676_v33 = vunpack.c.l.s8.bf16 %v412_v37  ;;  %v678_v38 = vunpack.c.l.s8.bf16 %v414_v25 }
 0x22e   :  { %1313 = vmatprep.subr.bf16.mxu0 %v1129_v39  ;;  %1477 = vmatprep.subr.bf16.mxu1 %v1131_v40  ;;  %v685_v39 = vunpack.c.h.s8.bf16 %v413_v26  ;;  %v687_v40 = vunpack.c.h.s8.bf16 %v415_v23  ;;  %v447_v26 = vld [vmem:[#allocation3 + $0x178] sm:$0xff] }
 0x231   :  { %1314 = vmatpush1.bf16.msra.mxu0 %v1128_v43  ;;  %1478 = vmatpush1.bf16.msra.mxu1 %v1130_v44  ;;  %v684_v43 = vunpack.c.h.s8.bf16 %v412_v37  ;;  %v686_v44 = vunpack.c.h.s8.bf16 %v414_v25  ;;  %v446_v37 = vld [vmem:[#allocation3 + $0x170] sm:$0xff] }
 0x232   :  { %1315 = vmatprep.subr.bf16.mxu0 %v1137_v45  ;;  %1479 = vmatprep.subr.bf16.mxu1 %v1139_v46  ;;  %v693_v45 = vunpack.c.l.s8.bf16 %v421_v41  ;;  %v695_v46 = vunpack.c.l.s8.bf16 %v423_v42 }
 0x235   :  { %1316 = vmatpush1.bf16.msra.mxu0 %v1136_v51  ;;  %1480 = vmatpush1.bf16.msra.mxu1 %v1138_v52  ;;  %v701_v52 = vunpack.c.h.s8.bf16 %v421_v41  ;;  %v455_v41 = vld [vmem:[#allocation3 + $0x1b8] sm:$0xff] }
 0x236   :  { %1317 = vmatprep.subr.bf16.mxu0 %v1145_v53  ;;  %1481 = vmatprep.subr.bf16.mxu1 %v1147_v58  ;;  %v703_v53 = vunpack.c.h.s8.bf16 %v423_v42  ;;  %v429_v58 = vld [vmem:[#allocation3 + $0xe8] sm:$0xff] }
 0x239   :  { %1318 = vmatpush1.bf16.msra.mxu0 %v1144_v1  ;;  %1482 = vmatpush1.bf16.msra.mxu1 %v1146_v2  ;;  %v709_v2 = vunpack.c.l.s8.bf16 %v429_v58 }
 0x23a   :  { %1319 = vmatprep.subr.bf16.mxu0 %v1153_v4  ;;  %1483 = vmatprep.subr.bf16.mxu1 %v1155_v5  ;;  %v711_v4 = vunpack.c.l.s8.bf16 %v431_v59  ;;  %v428_v5 = vld [vmem:[#allocation3 + $0xe0] sm:$0xff] }
 0x23b   :  { %v708_v7 = vunpack.c.l.s8.bf16 %v428_v5  ;;  %v716_v61 = vunpack.c.h.s8.bf16 %v428_v5  ;;  %v462_v5 = vld [vmem:[#allocation3 + $0x1f0] sm:$0xff] }
 0x23d   :  { %1320 = vmatpush1.bf16.msra.mxu0 %v1152_v56  ;;  %1484 = vmatpush1.bf16.msra.mxu1 %v1154_v62  ;;  %v710_v56 = vunpack.c.l.s8.bf16 %v430_v6  ;;  %v717_v62 = vunpack.c.h.s8.bf16 %v429_v58  ;;  %v463_v58 = vld [vmem:[#allocation3 + $0x1f8] sm:$0xff] }
 0x23e   :  { %1321 = vmatprep.subr.bf16.mxu0 %v1161_v9  ;;  %1485 = vmatprep.subr.bf16.mxu1 %v1163_v10  ;;  %v719_v9 = vunpack.c.h.s8.bf16 %v431_v59  ;;  %v437_v10 = vld [vmem:[#allocation3 + $0x128] sm:$0xff] }
 0x241   :  { %1322 = vmatpush1.bf16.msra.mxu0 %v1160_v3  ;;  %1486 = vmatpush1.bf16.msra.mxu1 %v1162_v13  ;;  %v718_v3 = vunpack.c.h.s8.bf16 %v430_v6  ;;  %v725_v13 = vunpack.c.l.s8.bf16 %v437_v10 }
 0x242   :  { %1496 = vmatprep.subr.bf16.mxu0 %v661_v14  ;;  %1660 = vmatprep.subr.bf16.mxu1 %v663_v15  ;;  %v727_v14 = vunpack.c.l.s8.bf16 %v439_v12  ;;  %v436_v15 = vld [vmem:[#allocation3 + $0x120] sm:$0xff] }
 0x243   :  { %v724_v17 = vunpack.c.l.s8.bf16 %v436_v15  ;;  %v732_v23 = vunpack.c.h.s8.bf16 %v436_v15  ;;  %v470_v15 = vld [vmem:[#allocation3 + $0x230] sm:$0xff] }
 0x244   :  { %1324 = vmatmul.mubr.bf16.vlgmr.msra.gmra.mrb[8].mxu0 %v4363_v18  ;;  %1488 = vmatmul.mubr.bf16.vlgmr.msra.gmra.mrb[8].mxu1 %v4363_v18 }
 0x245   :  { %1497 = vmatpush1.bf16.msra.mxu0 %v660_v19  ;;  %1661 = vmatpush1.bf16.msra.mxu1 %v662_v22  ;;  %v726_v19 = vunpack.c.l.s8.bf16 %v438_v63  ;;  %v733_v22 = vunpack.c.h.s8.bf16 %v437_v10  ;;  %v471_v10 = vld [vmem:[#allocation3 + $0x238] sm:$0xff] }
 0x246   :  { %1498 = vmatprep.subr.bf16.mxu0 %v669_v24  ;;  %1662 = vmatprep.subr.bf16.mxu1 %v671_v20  ;;  %v735_v24 = vunpack.c.h.s8.bf16 %v439_v12  ;;  %v445_v20 = vld [vmem:[#allocation3 + $0x168] sm:$0xff] }
 0x247   :  { %1528 = vmatprep.mubr.bf16.mxu0 %v4314_v34  ;;  %1692 = vmatprep.mubr.bf16.mxu1 %v4314_v34  ;;  %v422_v34 = vld [vmem:[#allocation3 + $0xb0] sm:$0xff] }
 0x248   :  { %v694_v51 = vunpack.c.l.s8.bf16 %v422_v34  ;;  %v702_v1 = vunpack.c.h.s8.bf16 %v422_v34 }
 0x249   :  { %1499 = vmatpush1.bf16.msra.mxu0 %v668_v21  ;;  %1663 = vmatpush1.bf16.msra.mxu1 %v670_v35  ;;  %v734_v21 = vunpack.c.h.s8.bf16 %v438_v63  ;;  %v741_v35 = vunpack.c.l.s8.bf16 %v445_v20 }
 0x24a   :  { %1500 = vmatprep.subr.bf16.mxu0 %v677_v27  ;;  %1664 = vmatprep.subr.bf16.mxu1 %v679_v36  ;;  %v743_v27 = vunpack.c.l.s8.bf16 %v447_v26  ;;  %v444_v36 = vld [vmem:[#allocation3 + $0x160] sm:$0xff] }
 0x24b   :  { %v740_v25 = vunpack.c.l.s8.bf16 %v444_v36  ;;  %v748_v42 = vunpack.c.h.s8.bf16 %v444_v36  ;;  %v478_v36 = vld [vmem:[#allocation3 + $0x270] sm:$0xff] }
 0x24d   :  { %1501 = vmatpush1.bf16.msra.mxu0 %v676_v33  ;;  %1665 = vmatpush1.bf16.msra.mxu1 %v678_v38  ;;  %v742_v33 = vunpack.c.l.s8.bf16 %v446_v37  ;;  %v749_v38 = vunpack.c.h.s8.bf16 %v445_v20  ;;  %v479_v20 = vld [vmem:[#allocation3 + $0x278] sm:$0xff] }
 0x24e   :  { %1502 = vmatprep.subr.bf16.mxu0 %v685_v39  ;;  %1666 = vmatprep.subr.bf16.mxu1 %v687_v40  ;;  %v751_v39 = vunpack.c.h.s8.bf16 %v447_v26  ;;  %v453_v40 = vld [vmem:[#allocation3 + $0x1a8] sm:$0xff] }
 0x251   :  { %1503 = vmatpush1.bf16.msra.mxu0 %v684_v43  ;;  %1667 = vmatpush1.bf16.msra.mxu1 %v686_v44  ;;  %v750_v43 = vunpack.c.h.s8.bf16 %v446_v37  ;;  %v757_v44 = vunpack.c.l.s8.bf16 %v453_v40 }
 0x252   :  { %1504 = vmatprep.subr.bf16.mxu0 %v693_v45  ;;  %1668 = vmatprep.subr.bf16.mxu1 %v695_v46  ;;  %v759_v45 = vunpack.c.l.s8.bf16 %v455_v41  ;;  %v452_v46 = vld [vmem:[#allocation3 + $0x1a0] sm:$0xff] }
 0x253   :  { %v756_v34 = vunpack.c.l.s8.bf16 %v452_v46  ;;  %v764_v59 = vunpack.c.h.s8.bf16 %v452_v46 }
 0x255   :  { %1505 = vmatpush1.bf16.msra.mxu0 %v692_v50  ;;  %1669 = vmatpush1.bf16.msra.mxu1 %v694_v51  ;;  %v758_v50 = vunpack.c.l.s8.bf16 %v454_v47  ;;  %v765_v51 = vunpack.c.h.s8.bf16 %v453_v40 }
 0x256   :  { %1506 = vmatprep.subr.bf16.mxu0 %v701_v52  ;;  %1670 = vmatprep.subr.bf16.mxu1 %v703_v53  ;;  %v767_v52 = vunpack.c.h.s8.bf16 %v455_v41  ;;  %v461_v53 = vld [vmem:[#allocation3 + $0x1e8] sm:$0xff]  ;;  %v814_v41 = vunpack.c.h.s8.bf16 %v478_v36 }
 0x259   :  { %1507 = vmatpush1.bf16.msra.mxu0 %v700_v60  ;;  %1671 = vmatpush1.bf16.msra.mxu1 %v702_v1  ;;  %v766_v60 = vunpack.c.h.s8.bf16 %v454_v47  ;;  %v773_v1 = vunpack.c.l.s8.bf16 %v461_v53 }
 0x25a   :  { %1508 = vmatprep.subr.bf16.mxu0 %v709_v2  ;;  %1672 = vmatprep.subr.bf16.mxu1 %v711_v4  ;;  %v775_v2 = vunpack.c.l.s8.bf16 %v463_v58  ;;  %v460_v4 = vld [vmem:[#allocation3 + $0x1e0] sm:$0xff] }
 0x25b   :  { %v772_v6 = vunpack.c.l.s8.bf16 %v460_v4  ;;  %v780_v12 = vunpack.c.h.s8.bf16 %v460_v4 }
 0x25d   :  { %1509 = vmatpush1.bf16.msra.mxu0 %v708_v7  ;;  %1673 = vmatpush1.bf16.msra.mxu1 %v710_v56  ;;  %v774_v7 = vunpack.c.l.s8.bf16 %v462_v5  ;;  %v781_v56 = vunpack.c.h.s8.bf16 %v461_v53 }
 0x25e   :  { %1510 = vmatprep.subr.bf16.mxu0 %v717_v62  ;;  %1674 = vmatprep.subr.bf16.mxu1 %v719_v9  ;;  %v783_v62 = vunpack.c.h.s8.bf16 %v463_v58  ;;  %v469_v9 = vld [vmem:[#allocation3 + $0x228] sm:$0xff] }
 0x261   :  { %1511 = vmatpush1.bf16.msra.mxu0 %v716_v61  ;;  %1675 = vmatpush1.bf16.msra.mxu1 %v718_v3  ;;  %v782_v61 = vunpack.c.h.s8.bf16 %v462_v5  ;;  %v789_v3 = vunpack.c.l.s8.bf16 %v469_v9 }
 0x262   :  { %1512 = vmatprep.subr.bf16.mxu0 %v725_v13  ;;  %1676 = vmatprep.subr.bf16.mxu1 %v727_v14  ;;  %v791_v13 = vunpack.c.l.s8.bf16 %v471_v10  ;;  %v468_v14 = vld [vmem:[#allocation3 + $0x220] sm:$0xff] }
 0x263   :  { %v788_v63 = vunpack.c.l.s8.bf16 %v468_v14  ;;  %v796_v26 = vunpack.c.h.s8.bf16 %v468_v14 }
 0x265   :  { %1513 = vmatpush1.bf16.msra.mxu0 %v724_v17  ;;  %1677 = vmatpush1.bf16.msra.mxu1 %v726_v19  ;;  %v790_v17 = vunpack.c.l.s8.bf16 %v470_v15  ;;  %v797_v19 = vunpack.c.h.s8.bf16 %v469_v9 }
 0x266   :  { %1514 = vmatprep.subr.bf16.mxu0 %v733_v22  ;;  %1678 = vmatprep.subr.bf16.mxu1 %v735_v24  ;;  %v799_v22 = vunpack.c.h.s8.bf16 %v471_v10  ;;  %v477_v24 = vld [vmem:[#allocation3 + $0x268] sm:$0xff] }
 0x269   :  { %1515 = vmatpush1.bf16.msra.mxu0 %v732_v23  ;;  %1679 = vmatpush1.bf16.msra.mxu1 %v734_v21  ;;  %v798_v23 = vunpack.c.h.s8.bf16 %v470_v15  ;;  %v805_v21 = vunpack.c.l.s8.bf16 %v477_v24 }
 0x26a   :  { %1516 = vmatprep.subr.bf16.mxu0 %v741_v35  ;;  %1680 = vmatprep.subr.bf16.mxu1 %v743_v27  ;;  %v807_v35 = vunpack.c.l.s8.bf16 %v479_v20  ;;  %v476_v27 = vld [vmem:[#allocation3 + $0x260] sm:$0xff] }
 0x26b   :  { %v804_v37 = vunpack.c.l.s8.bf16 %v476_v27  ;;  %v812_v40 = vunpack.c.h.s8.bf16 %v476_v27 }
 0x26d   :  { %1517 = vmatpush1.bf16.msra.mxu0 %v740_v25  ;;  %1681 = vmatpush1.bf16.msra.mxu1 %v742_v33  ;;  %v806_v25 = vunpack.c.l.s8.bf16 %v478_v36  ;;  %v815_v33 = vunpack.c.h.s8.bf16 %v479_v20 }
 0x26e   :  { %1518 = vmatprep.subr.bf16.mxu0 %v749_v38  ;;  %1682 = vmatprep.subr.bf16.mxu1 %v751_v39  ;;  %v485_v38 = vld [vmem:[#allocation3 + $0x2a8] sm:$0xff]  ;;  %v487_v39 = vld [vmem:[#allocation3 + $0x2b8] sm:$0xff] }
 0x26f   :  { %v829_v47 = vunpack.c.h.s8.bf16 %v485_v38 }
 0x271   :  { %1519 = vmatpush1.bf16.msra.mxu0 %v748_v42  ;;  %1683 = vmatpush1.bf16.msra.mxu1 %v750_v43  ;;  %v821_v42 = vunpack.c.l.s8.bf16 %v485_v38  ;;  %v823_v43 = vunpack.c.l.s8.bf16 %v487_v39 }
 0x272   :  { %1520 = vmatprep.subr.bf16.mxu0 %v757_v44  ;;  %1684 = vmatprep.subr.bf16.mxu1 %v759_v45  ;;  %v484_v44 = vld [vmem:[#allocation3 + $0x2a0] sm:$0xff] }
 0x273   :  { %v820_v45 = vunpack.c.l.s8.bf16 %v484_v44 }
 0x275   :  { %1521 = vmatpush1.bf16.msra.mxu0 %v756_v34  ;;  %1685 = vmatpush1.bf16.msra.mxu1 %v758_v50  ;;  %v831_v34 = vunpack.c.h.s8.bf16 %v487_v39  ;;  %v493_v50 = vld [vmem:[#allocation3 + $0x2e8] sm:$0xff] }
 0x276   :  { %1522 = vmatprep.subr.bf16.mxu0 %v765_v51  ;;  %1686 = vmatprep.subr.bf16.mxu1 %v767_v52  ;;  %v495_v51 = vld [vmem:[#allocation3 + $0x2f8] sm:$0xff]  ;;  %v828_v52 = vunpack.c.h.s8.bf16 %v484_v44  ;;  %v837_v58 = vunpack.c.l.s8.bf16 %v493_v50  ;;  %v845_v5 = vunpack.c.h.s8.bf16 %v493_v50 }
 0x279   :  { %1523 = vmatpush1.bf16.msra.mxu0 %v764_v59  ;;  %1687 = vmatpush1.bf16.msra.mxu1 %v766_v60  ;;  %v839_v59 = vunpack.c.l.s8.bf16 %v495_v51  ;;  %v492_v60 = vld [vmem:[#allocation3 + $0x2e0] sm:$0xff] }
 0x27a   :  { %1524 = vmatprep.subr.bf16.mxu0 %v773_v1  ;;  %1688 = vmatprep.subr.bf16.mxu1 %v775_v2  ;;  %v494_v1 = vld [vmem:[#allocation3 + $0x2f0] sm:$0xff]  ;;  %v836_v2 = vunpack.c.l.s8.bf16 %v492_v60 }
 0x27b   :  { %v838_v4 = vunpack.c.l.s8.bf16 %v494_v1  ;;  %v846_v9 = vunpack.c.h.s8.bf16 %v494_v1 }
 0x27d   :  { %1525 = vmatpush1.bf16.msra.mxu0 %v772_v6  ;;  %1689 = vmatpush1.bf16.msra.mxu1 %v774_v7  ;;  %v847_v6 = vunpack.c.h.s8.bf16 %v495_v51  ;;  %v501_v7 = vld [vmem:[#allocation3 + $0x328] sm:$0xff] }
 0x27e   :  { %1526 = vmatprep.subr.bf16.mxu0 %v781_v56  ;;  %1690 = vmatprep.subr.bf16.mxu1 %v783_v62  ;;  %v503_v56 = vld [vmem:[#allocation3 + $0x338] sm:$0xff]  ;;  %v844_v62 = vunpack.c.h.s8.bf16 %v492_v60  ;;  %v853_v10 = vunpack.c.l.s8.bf16 %v501_v7  ;;  %v861_v15 = vunpack.c.h.s8.bf16 %v501_v7 }
 0x281   :  { %1527 = vmatpush1.bf16.msra.mxu0 %v780_v12  ;;  %1691 = vmatpush1.bf16.msra.mxu1 %v782_v61  ;;  %v855_v12 = vunpack.c.l.s8.bf16 %v503_v56  ;;  %v500_v61 = vld [vmem:[#allocation3 + $0x320] sm:$0xff] }
 0x282   :  { %1537 = vmatprep.subr.bf16.mxu0 %v789_v3  ;;  %1701 = vmatprep.subr.bf16.mxu1 %v791_v13  ;;  %v502_v3 = vld [vmem:[#allocation3 + $0x330] sm:$0xff]  ;;  %v852_v13 = vunpack.c.l.s8.bf16 %v500_v61 }
 0x283   :  { %v854_v14 = vunpack.c.l.s8.bf16 %v502_v3 }
 0x284   :  { %1529 = vmatmul.mubr.bf16.vlgmr.msra.gmra.mrb[12].mxu0 %v4321_v0  ;;  %1693 = vmatmul.mubr.bf16.vlgmr.msra.gmra.mrb[12].mxu1 %v4321_v0  ;;  %v813_v0 = vunpack.c.h.s8.bf16 %v477_v24  ;;  %v862_v24 = vunpack.c.h.s8.bf16 %v502_v3 }
 0x285   :  { %1538 = vmatpush1.bf16.msra.mxu0 %v788_v63  ;;  %1702 = vmatpush1.bf16.msra.mxu1 %v790_v17  ;;  %v863_v63 = vunpack.c.h.s8.bf16 %v503_v56  ;;  %v509_v17 = vld [vmem:[#allocation3 + $0x368] sm:$0xff] }
 0x286   :  { %1539 = vmatprep.subr.bf16.mxu0 %v797_v19  ;;  %1703 = vmatprep.subr.bf16.mxu1 %v799_v22  ;;  %v511_v19 = vld [vmem:[#allocation3 + $0x378] sm:$0xff]  ;;  %v860_v22 = vunpack.c.h.s8.bf16 %v500_v61  ;;  %v869_v20 = vunpack.c.l.s8.bf16 %v509_v17  ;;  %v877_v36 = vunpack.c.h.s8.bf16 %v509_v17 }
 0x287   :  { %1569 = vmatprep.mubr.bf16.mxu0 %v4326_v8  ;;  %1733 = vmatprep.mubr.bf16.mxu1 %v4326_v8  ;;  %v486_v8 = vld [vmem:[#allocation3 + $0x2b0] sm:$0xff] }
 0x288   :  { %v822_v46 = vunpack.c.l.s8.bf16 %v486_v8  ;;  %v830_v53 = vunpack.c.h.s8.bf16 %v486_v8 }
 0x289   :  { %1540 = vmatpush1.bf16.msra.mxu0 %v796_v26  ;;  %1704 = vmatpush1.bf16.msra.mxu1 %v798_v23  ;;  %v871_v26 = vunpack.c.l.s8.bf16 %v511_v19  ;;  %v508_v23 = vld [vmem:[#allocation3 + $0x360] sm:$0xff] }
 0x28a   :  { %1541 = vmatprep.subr.bf16.mxu0 %v805_v21  ;;  %1705 = vmatprep.subr.bf16.mxu1 %v807_v35  ;;  %v510_v21 = vld [vmem:[#allocation3 + $0x370] sm:$0xff]  ;;  %v868_v35 = vunpack.c.l.s8.bf16 %v508_v23 }
 0x28b   :  { %v870_v27 = vunpack.c.l.s8.bf16 %v510_v21  ;;  %v878_v38 = vunpack.c.h.s8.bf16 %v510_v21 }
 0x28d   :  { %1542 = vmatpush1.bf16.msra.mxu0 %v804_v37  ;;  %1706 = vmatpush1.bf16.msra.mxu1 %v806_v25  ;;  %v879_v37 = vunpack.c.h.s8.bf16 %v511_v19  ;;  %v517_v25 = vld [vmem:[#allocation3 + $0x3a8] sm:$0xff] }
 0x28e   :  { %1543 = vmatprep.subr.bf16.mxu0 %v813_v0  ;;  %1707 = vmatprep.subr.bf16.mxu1 %v815_v33  ;;  %v519_v0 = vld [vmem:[#allocation3 + $0x3b8] sm:$0xff]  ;;  %v876_v33 = vunpack.c.h.s8.bf16 %v508_v23  ;;  %v885_v39 = vunpack.c.l.s8.bf16 %v517_v25  ;;  %v893_v8 = vunpack.c.h.s8.bf16 %v517_v25 }
 0x291   :  { %1544 = vmatpush1.bf16.msra.mxu0 %v812_v40  ;;  %1708 = vmatpush1.bf16.msra.mxu1 %v814_v41  ;;  %v887_v40 = vunpack.c.l.s8.bf16 %v519_v0  ;;  %v516_v41 = vld [vmem:[#allocation3 + $0x3a0] sm:$0xff] }
 0x292   :  { %1545 = vmatprep.subr.bf16.mxu0 %v821_v42  ;;  %1709 = vmatprep.subr.bf16.mxu1 %v823_v43  ;;  %v518_v42 = vld [vmem:[#allocation3 + $0x3b0] sm:$0xff]  ;;  %v884_v43 = vunpack.c.l.s8.bf16 %v516_v41 }
 0x293   :  { %v886_v44 = vunpack.c.l.s8.bf16 %v518_v42  ;;  %v894_v50 = vunpack.c.h.s8.bf16 %v518_v42  ;;  %v557_v42 = vld [vmem:[#allocation3 + $0x4e8] sm:$0xff] }
 0x295   :  { %1546 = vmatpush1.bf16.msra.mxu0 %v820_v45  ;;  %1710 = vmatpush1.bf16.msra.mxu1 %v822_v46  ;;  %v895_v45 = vunpack.c.h.s8.bf16 %v519_v0  ;;  %v525_v46 = vld [vmem:[#allocation3 + $0x3e8] sm:$0xff] }
 0x296   :  { %1547 = vmatprep.subr.bf16.mxu0 %v829_v47  ;;  %1711 = vmatprep.subr.bf16.mxu1 %v831_v34  ;;  %v527_v47 = vld [vmem:[#allocation3 + $0x3f8] sm:$0xff]  ;;  %v892_v34 = vunpack.c.h.s8.bf16 %v516_v41  ;;  %v901_v51 = vunpack.c.l.s8.bf16 %v525_v46  ;;  %v909_v1 = vunpack.c.h.s8.bf16 %v525_v46 }
 0x299   :  { %1548 = vmatpush1.bf16.msra.mxu0 %v828_v52  ;;  %1712 = vmatpush1.bf16.msra.mxu1 %v830_v53  ;;  %v903_v52 = vunpack.c.l.s8.bf16 %v527_v47  ;;  %v524_v53 = vld [vmem:[#allocation3 + $0x3e0] sm:$0xff] }
 0x29a   :  { %1549 = vmatprep.subr.bf16.mxu0 %v837_v58  ;;  %1713 = vmatprep.subr.bf16.mxu1 %v839_v59  ;;  %v526_v58 = vld [vmem:[#allocation3 + $0x3f0] sm:$0xff]  ;;  %v900_v59 = vunpack.c.l.s8.bf16 %v524_v53 }
 0x29b   :  { %v902_v60 = vunpack.c.l.s8.bf16 %v526_v58  ;;  %v910_v7 = vunpack.c.h.s8.bf16 %v526_v58  ;;  %v565_v58 = vld [vmem:[#allocation3 + $0x528] sm:$0xff] }
 0x29d   :  { %1550 = vmatpush1.bf16.msra.mxu0 %v836_v2  ;;  %1714 = vmatpush1.bf16.msra.mxu1 %v838_v4  ;;  %v911_v2 = vunpack.c.h.s8.bf16 %v527_v47  ;;  %v533_v4 = vld [vmem:[#allocation3 + $0x428] sm:$0xff]  ;;  %v556_v47 = vld [vmem:[#allocation3 + $0x4e0] sm:$0xff] }
 0x29e   :  { %1551 = vmatprep.subr.bf16.mxu0 %v845_v5  ;;  %1715 = vmatprep.subr.bf16.mxu1 %v847_v6  ;;  %v535_v5 = vld [vmem:[#allocation3 + $0x438] sm:$0xff]  ;;  %v908_v6 = vunpack.c.h.s8.bf16 %v524_v53  ;;  %v917_v56 = vunpack.c.l.s8.bf16 %v533_v4  ;;  %v925_v3 = vunpack.c.h.s8.bf16 %v533_v4 }
 0x2a1   :  { %1552 = vmatpush1.bf16.msra.mxu0 %v844_v62  ;;  %1716 = vmatpush1.bf16.msra.mxu1 %v846_v9  ;;  %v919_v62 = vunpack.c.l.s8.bf16 %v535_v5  ;;  %v532_v9 = vld [vmem:[#allocation3 + $0x420] sm:$0xff] }
 0x2a2   :  { %1553 = vmatprep.subr.bf16.mxu0 %v853_v10  ;;  %1717 = vmatprep.subr.bf16.mxu1 %v855_v12  ;;  %v534_v10 = vld [vmem:[#allocation3 + $0x430] sm:$0xff]  ;;  %v916_v12 = vunpack.c.l.s8.bf16 %v532_v9 }
 0x2a3   :  { %v918_v61 = vunpack.c.l.s8.bf16 %v534_v10  ;;  %v926_v17 = vunpack.c.h.s8.bf16 %v534_v10  ;;  %v573_v10 = vld [vmem:[#allocation3 + $0x568] sm:$0xff] }
 0x2a5   :  { %1554 = vmatpush1.bf16.msra.mxu0 %v852_v13  ;;  %1718 = vmatpush1.bf16.msra.mxu1 %v854_v14  ;;  %v927_v13 = vunpack.c.h.s8.bf16 %v535_v5  ;;  %v541_v14 = vld [vmem:[#allocation3 + $0x468] sm:$0xff]  ;;  %v564_v5 = vld [vmem:[#allocation3 + $0x520] sm:$0xff] }
 0x2a6   :  { %1555 = vmatprep.subr.bf16.mxu0 %v861_v15  ;;  %1719 = vmatprep.subr.bf16.mxu1 %v863_v63  ;;  %v543_v15 = vld [vmem:[#allocation3 + $0x478] sm:$0xff]  ;;  %v924_v63 = vunpack.c.h.s8.bf16 %v532_v9  ;;  %v933_v19 = vunpack.c.l.s8.bf16 %v541_v14 }
 0x2a7   :  { %v943_v21 = vunpack.c.h.s8.bf16 %v543_v15 }
 0x2a9   :  { %1556 = vmatpush1.bf16.msra.mxu0 %v860_v22  ;;  %1720 = vmatpush1.bf16.msra.mxu1 %v862_v24  ;;  %v935_v22 = vunpack.c.l.s8.bf16 %v543_v15  ;;  %v540_v24 = vld [vmem:[#allocation3 + $0x460] sm:$0xff] }
 0x2aa   :  { %1557 = vmatprep.subr.bf16.mxu0 %v869_v20  ;;  %1721 = vmatprep.subr.bf16.mxu1 %v871_v26  ;;  %v542_v20 = vld [vmem:[#allocation3 + $0x470] sm:$0xff]  ;;  %v932_v26 = vunpack.c.l.s8.bf16 %v540_v24  ;;  %v572_v15 = vld [vmem:[#allocation3 + $0x560] sm:$0xff] }
 0x2ab   :  { %v934_v23 = vunpack.c.l.s8.bf16 %v542_v20 }
 0x2ad   :  { %1558 = vmatpush1.bf16.msra.mxu0 %v868_v35  ;;  %1722 = vmatpush1.bf16.msra.mxu1 %v870_v27  ;;  %v549_v35 = vld [vmem:[#allocation3 + $0x4a8] sm:$0xff]  ;;  %v551_v27 = vld [vmem:[#allocation3 + $0x4b8] sm:$0xff] }
 0x2ae   :  { %1559 = vmatprep.subr.bf16.mxu0 %v877_v36  ;;  %1723 = vmatprep.subr.bf16.mxu1 %v879_v37  ;;  %v940_v36 = vunpack.c.h.s8.bf16 %v540_v24  ;;  %v942_v37 = vunpack.c.h.s8.bf16 %v542_v20  ;;  %v949_v25 = vunpack.c.l.s8.bf16 %v549_v35  ;;  %v951_v0 = vunpack.c.l.s8.bf16 %v551_v27  ;;  %v581_v20 = vld [vmem:[#allocation3 + $0x5a8] sm:$0xff] }
 0x2af   :  { %v959_v41 = vunpack.c.h.s8.bf16 %v551_v27  ;;  %v580_v27 = vld [vmem:[#allocation3 + $0x5a0] sm:$0xff] }
 0x2b1   :  { %1560 = vmatpush1.bf16.msra.mxu0 %v876_v33  ;;  %1724 = vmatpush1.bf16.msra.mxu1 %v878_v38  ;;  %v548_v33 = vld [vmem:[#allocation3 + $0x4a0] sm:$0xff] }
 0x2b2   :  { %1561 = vmatprep.subr.bf16.mxu0 %v885_v39  ;;  %1725 = vmatprep.subr.bf16.mxu1 %v887_v40  ;;  %v948_v38 = vunpack.c.l.s8.bf16 %v548_v33  ;;  %v957_v40 = vunpack.c.h.s8.bf16 %v549_v35 }
 0x2b5   :  { %1562 = vmatpush1.bf16.msra.mxu0 %v884_v43  ;;  %1726 = vmatpush1.bf16.msra.mxu1 %v886_v44  ;;  %v559_v43 = vld [vmem:[#allocation3 + $0x4f8] sm:$0xff]  ;;  %v956_v44 = vunpack.c.h.s8.bf16 %v548_v33 }
 0x2b6   :  { %1563 = vmatprep.subr.bf16.mxu0 %v893_v8  ;;  %1727 = vmatprep.subr.bf16.mxu1 %v895_v45  ;;  %v965_v45 = vunpack.c.l.s8.bf16 %v557_v42  ;;  %v967_v46 = vunpack.c.l.s8.bf16 %v559_v43  ;;  %v975_v53 = vunpack.c.h.s8.bf16 %v559_v43  ;;  %v588_v43 = vld [vmem:[#allocation3 + $0x5e0] sm:$0xff] }
 0x2b9   :  { %1564 = vmatpush1.bf16.msra.mxu0 %v892_v34  ;;  %1728 = vmatpush1.bf16.msra.mxu1 %v894_v50  ;;  %v558_v34 = vld [vmem:[#allocation3 + $0x4f0] sm:$0xff]  ;;  %v964_v50 = vunpack.c.l.s8.bf16 %v556_v47 }
 0x2ba   :  { %1565 = vmatprep.subr.bf16.mxu0 %v901_v51  ;;  %1729 = vmatprep.subr.bf16.mxu1 %v903_v52  ;;  %v966_v51 = vunpack.c.l.s8.bf16 %v558_v34  ;;  %v973_v52 = vunpack.c.h.s8.bf16 %v557_v42 }
 0x2bd   :  { %1566 = vmatpush1.bf16.msra.mxu0 %v900_v59  ;;  %1730 = vmatpush1.bf16.msra.mxu1 %v902_v60  ;;  %v567_v59 = vld [vmem:[#allocation3 + $0x538] sm:$0xff]  ;;  %v972_v60 = vunpack.c.h.s8.bf16 %v556_v47 }
 0x2be   :  { %1567 = vmatprep.subr.bf16.mxu0 %v909_v1  ;;  %1731 = vmatprep.subr.bf16.mxu1 %v911_v2  ;;  %v974_v1 = vunpack.c.h.s8.bf16 %v558_v34  ;;  %v981_v2 = vunpack.c.l.s8.bf16 %v565_v58  ;;  %v983_v4 = vunpack.c.l.s8.bf16 %v567_v59  ;;  %v991_v9 = vunpack.c.h.s8.bf16 %v567_v59  ;;  %v597_v34 = vld [vmem:[#allocation3 + $0x628] sm:$0xff]  ;;  %v596_v59 = vld [vmem:[#allocation3 + $0x620] sm:$0xff] }
 0x2c1   :  { %1568 = vmatpush1.bf16.msra.mxu0 %v908_v6  ;;  %1732 = vmatpush1.bf16.msra.mxu1 %v910_v7  ;;  %v566_v6 = vld [vmem:[#allocation3 + $0x530] sm:$0xff]  ;;  %v980_v7 = vunpack.c.l.s8.bf16 %v564_v5 }
 0x2c2   :  { %1578 = vmatprep.subr.bf16.mxu0 %v917_v56  ;;  %1742 = vmatprep.subr.bf16.mxu1 %v919_v62  ;;  %v982_v56 = vunpack.c.l.s8.bf16 %v566_v6  ;;  %v989_v62 = vunpack.c.h.s8.bf16 %v565_v58 }
 0x2c4   :  { %1570 = vmatmul.mubr.bf16.vlgmr.msra.gmra.mrb[12].mxu0 %v4335_v11  ;;  %1734 = vmatmul.mubr.bf16.vlgmr.msra.gmra.mrb[12].mxu1 %v4335_v11  ;;  %v941_v11 = vunpack.c.h.s8.bf16 %v541_v14 }
 0x2c5   :  { %1579 = vmatpush1.bf16.msra.mxu0 %v916_v12  ;;  %1743 = vmatpush1.bf16.msra.mxu1 %v918_v61  ;;  %v575_v12 = vld [vmem:[#allocation3 + $0x578] sm:$0xff]  ;;  %v988_v61 = vunpack.c.h.s8.bf16 %v564_v5 }
 0x2c6   :  { %1580 = vmatprep.subr.bf16.mxu0 %v925_v3  ;;  %1744 = vmatprep.subr.bf16.mxu1 %v927_v13  ;;  %v990_v3 = vunpack.c.h.s8.bf16 %v566_v6  ;;  %v997_v13 = vunpack.c.l.s8.bf16 %v573_v10  ;;  %v999_v14 = vunpack.c.l.s8.bf16 %v575_v12  ;;  %v1007_v24 = vunpack.c.h.s8.bf16 %v575_v12  ;;  %v605_v6 = vld [vmem:[#allocation3 + $0x668] sm:$0xff]  ;;  %v604_v12 = vld [vmem:[#allocation3 + $0x660] sm:$0xff] }
 0x2c7   :  { %1610 = vmatprep.mubr.bf16.mxu0 %v4340_v16  ;;  %1774 = vmatprep.mubr.bf16.mxu1 %v4340_v16  ;;  %v550_v16 = vld [vmem:[#allocation3 + $0x4b0] sm:$0xff] }
 0x2c8   :  { %v950_v39 = vunpack.c.l.s8.bf16 %v550_v16  ;;  %v958_v8 = vunpack.c.h.s8.bf16 %v550_v16  ;;  %v589_v16 = vld [vmem:[#allocation3 + $0x5e8] sm:$0xff] }
 0x2c9   :  { %1581 = vmatpush1.bf16.msra.mxu0 %v924_v63  ;;  %1745 = vmatpush1.bf16.msra.mxu1 %v926_v17  ;;  %v574_v63 = vld [vmem:[#allocation3 + $0x570] sm:$0xff]  ;;  %v996_v17 = vunpack.c.l.s8.bf16 %v572_v15 }
 0x2ca   :  { %1582 = vmatprep.subr.bf16.mxu0 %v933_v19  ;;  %1746 = vmatprep.subr.bf16.mxu1 %v935_v22  ;;  %v998_v19 = vunpack.c.l.s8.bf16 %v574_v63  ;;  %v1005_v22 = vunpack.c.h.s8.bf16 %v573_v10 }
 0x2cd   :  { %1583 = vmatpush1.bf16.msra.mxu0 %v932_v26  ;;  %1747 = vmatpush1.bf16.msra.mxu1 %v934_v23  ;;  %v583_v26 = vld [vmem:[#allocation3 + $0x5b8] sm:$0xff]  ;;  %v1004_v23 = vunpack.c.h.s8.bf16 %v572_v15  ;;  %v613_v15 = vld [vmem:[#allocation3 + $0x6a8] sm:$0xff] }
 0x2ce   :  { %1584 = vmatprep.subr.bf16.mxu0 %v941_v11  ;;  %1748 = vmatprep.subr.bf16.mxu1 %v943_v21  ;;  %v1006_v11 = vunpack.c.h.s8.bf16 %v574_v63  ;;  %v1013_v21 = vunpack.c.l.s8.bf16 %v581_v20  ;;  %v1015_v35 = vunpack.c.l.s8.bf16 %v583_v26  ;;  %v1023_v33 = vunpack.c.h.s8.bf16 %v583_v26  ;;  %v615_v63 = vld [vmem:[#allocation3 + $0x6b8] sm:$0xff] }
 0x2d1   :  { %1585 = vmatpush1.bf16.msra.mxu0 %v940_v36  ;;  %1749 = vmatpush1.bf16.msra.mxu1 %v942_v37  ;;  %v582_v36 = vld [vmem:[#allocation3 + $0x5b0] sm:$0xff]  ;;  %v1012_v37 = vunpack.c.l.s8.bf16 %v580_v27 }
 0x2d2   :  { %1586 = vmatprep.subr.bf16.mxu0 %v949_v25  ;;  %1750 = vmatprep.subr.bf16.mxu1 %v951_v0  ;;  %v1014_v25 = vunpack.c.l.s8.bf16 %v582_v36  ;;  %v1021_v0 = vunpack.c.h.s8.bf16 %v581_v20  ;;  %v612_v20 = vld [vmem:[#allocation3 + $0x6a0] sm:$0xff] }
 0x2d3   :  { %v1076_v26 = vunpack.c.l.s8.bf16 %v612_v20 }
 0x2d5   :  { %1587 = vmatpush1.bf16.msra.mxu0 %v948_v38  ;;  %1751 = vmatpush1.bf16.msra.mxu1 %v950_v39  ;;  %v591_v38 = vld [vmem:[#allocation3 + $0x5f8] sm:$0xff]  ;;  %v1020_v39 = vunpack.c.h.s8.bf16 %v580_v27 }
 0x2d6   :  { %1588 = vmatprep.subr.bf16.mxu0 %v957_v40  ;;  %1752 = vmatprep.subr.bf16.mxu1 %v959_v41  ;;  %v1022_v40 = vunpack.c.h.s8.bf16 %v582_v36  ;;  %v1029_v41 = vunpack.c.l.s8.bf16 %v589_v16  ;;  %v1031_v42 = vunpack.c.l.s8.bf16 %v591_v38  ;;  %v1039_v47 = vunpack.c.h.s8.bf16 %v591_v38  ;;  %v4386_v27 = vld [vmem:[%s4626_s6 + $0x1] ss:$4 sm:$0xff] }
 0x2d7   :  { %v621_v36 = vld [vmem:[#allocation3 + $0x6e8] sm:$0xff]  ;;  %v1084_v38 = vunpack.c.h.s8.bf16 %v612_v20  ;;  %v630_v20 = vld [vmem:[#allocation3 + $0x730] sm:$0xff] }
 0x2d9   :  { %1589 = vmatpush1.bf16.msra.mxu0 %v956_v44  ;;  %1753 = vmatpush1.bf16.msra.mxu1 %v958_v8  ;;  %v590_v44 = vld [vmem:[#allocation3 + $0x5f0] sm:$0xff]  ;;  %v1028_v8 = vunpack.c.l.s8.bf16 %v588_v43 }
 0x2da   :  { %1590 = vmatprep.subr.bf16.mxu0 %v965_v45  ;;  %1754 = vmatprep.subr.bf16.mxu1 %v967_v46  ;;  %v1030_v45 = vunpack.c.l.s8.bf16 %v590_v44  ;;  %v1037_v46 = vunpack.c.h.s8.bf16 %v589_v16 }
 0x2dd   :  { %1591 = vmatpush1.bf16.msra.mxu0 %v964_v50  ;;  %1755 = vmatpush1.bf16.msra.mxu1 %v966_v51  ;;  %v599_v50 = vld [vmem:[#allocation3 + $0x638] sm:$0xff]  ;;  %v1036_v51 = vunpack.c.h.s8.bf16 %v588_v43 }
 0x2de   :  { %1592 = vmatprep.subr.bf16.mxu0 %v973_v52  ;;  %1756 = vmatprep.subr.bf16.mxu1 %v975_v53  ;;  %v1038_v52 = vunpack.c.h.s8.bf16 %v590_v44  ;;  %v1045_v53 = vunpack.c.l.s8.bf16 %v597_v34  ;;  %v1047_v58 = vunpack.c.l.s8.bf16 %v599_v50  ;;  %v1055_v5 = vunpack.c.h.s8.bf16 %v599_v50  ;;  %v620_v44 = vld [vmem:[#allocation3 + $0x6e0] sm:$0xff] }
 0x2e1   :  { %1593 = vmatpush1.bf16.msra.mxu0 %v972_v60  ;;  %1757 = vmatpush1.bf16.msra.mxu1 %v974_v1  ;;  %v598_v60 = vld [vmem:[#allocation3 + $0x630] sm:$0xff]  ;;  %v1044_v1 = vunpack.c.l.s8.bf16 %v596_v59 }
 0x2e2   :  { %1594 = vmatprep.subr.bf16.mxu0 %v981_v2  ;;  %1758 = vmatprep.subr.bf16.mxu1 %v983_v4  ;;  %v1046_v2 = vunpack.c.l.s8.bf16 %v598_v60  ;;  %v1053_v4 = vunpack.c.h.s8.bf16 %v597_v34  ;;  %v1889_v34 = vrot.slane %v4386_v27, %v4264_v32 }
 0x2e5   :  { %1595 = vmatpush1.bf16.msra.mxu0 %v980_v7  ;;  %1759 = vmatpush1.bf16.msra.mxu1 %v982_v56  ;;  %v607_v7 = vld [vmem:[#allocation3 + $0x678] sm:$0xff]  ;;  %v1052_v56 = vunpack.c.h.s8.bf16 %v596_v59 }
 0x2e6   :  { %1596 = vmatprep.subr.bf16.mxu0 %v989_v62  ;;  %1760 = vmatprep.subr.bf16.mxu1 %v991_v9  ;;  %v1054_v62 = vunpack.c.h.s8.bf16 %v598_v60  ;;  %v1061_v9 = vunpack.c.l.s8.bf16 %v605_v6  ;;  %v1063_v10 = vunpack.c.l.s8.bf16 %v607_v7 }
 0x2e9   :  { %1597 = vmatpush1.bf16.msra.mxu0 %v988_v61  ;;  %1761 = vmatpush1.bf16.msra.mxu1 %v990_v3  ;;  %v606_v61 = vld [vmem:[#allocation3 + $0x670] sm:$0xff]  ;;  %v1060_v3 = vunpack.c.l.s8.bf16 %v604_v12 }
 0x2ea   :  { %1598 = vmatprep.subr.bf16.mxu0 %v997_v13  ;;  %1762 = vmatprep.subr.bf16.mxu1 %v999_v14  ;;  %v1062_v13 = vunpack.c.l.s8.bf16 %v606_v61  ;;  %v1071_v14 = vunpack.c.h.s8.bf16 %v607_v7 }
 0x2ed   :  { %1599 = vmatpush1.bf16.msra.mxu0 %v996_v17  ;;  %1763 = vmatpush1.bf16.msra.mxu1 %v998_v19  ;;  %v1068_v17 = vunpack.c.h.s8.bf16 %v604_v12  ;;  %v1070_v19 = vunpack.c.h.s8.bf16 %v606_v61  ;;  %v629_v61 = vld [vmem:[#allocation3 + $0x728] sm:$0xff] }
 0x2ee   :  { %1600 = vmatprep.subr.bf16.mxu0 %v1005_v22  ;;  %1764 = vmatprep.subr.bf16.mxu1 %v1007_v24  ;;  %v1077_v22 = vunpack.c.l.s8.bf16 %v613_v15  ;;  %v1079_v24 = vunpack.c.l.s8.bf16 %v615_v63 }
 0x2f1   :  { %1601 = vmatpush1.bf16.msra.mxu0 %v1004_v23  ;;  %1765 = vmatpush1.bf16.msra.mxu1 %v1006_v11  ;;  %v4381_v11 = vld [vmem:[#allocation7 + $0x1] ss:$4 sm:$0xff] }
 0x2f2   :  { %1602 = vmatprep.subr.bf16.mxu0 %v1013_v21  ;;  %1766 = vmatprep.subr.bf16.mxu1 %v1015_v35  ;;  %v1085_v21 = vunpack.c.h.s8.bf16 %v613_v15  ;;  %v1087_v35 = vunpack.c.h.s8.bf16 %v615_v63  ;;  %v1840_v16 = vrot.slane %v4381_v11, %v4264_v32  ;;  %v1100_v63 = vunpack.c.h.s8.bf16 %v620_v44 }
 0x2f5   :  { %1603 = vmatpush1.bf16.msra.mxu0 %v1012_v37  ;;  %1767 = vmatpush1.bf16.msra.mxu1 %v1014_v25  ;;  %v623_v37 = vld [vmem:[#allocation3 + $0x6f8] sm:$0xff]  ;;  %v1828_v25 = vrot.slane %v4381_v11, %v4258_v28 }
 0x2f6   :  { %1604 = vmatprep.subr.bf16.mxu0 %v1021_v0  ;;  %1768 = vmatprep.subr.bf16.mxu1 %v1023_v33  ;;  %v1836_v0 = vrot.slane %v4381_v11, %v4260_v29  ;;  %v1832_v33 = vrot.slane %v4381_v11, %v4262_v31  ;;  %v1095_v43 = vunpack.c.l.s8.bf16 %v623_v37 }
 0x2f9   :  { %1605 = vmatpush1.bf16.msra.mxu0 %v1020_v39  ;;  %1769 = vmatpush1.bf16.msra.mxu1 %v1022_v40  ;;  %v1877_v40 = vrot.slane %v4386_v27, %v4258_v28 }
 0x2fa   :  { %1606 = vmatprep.subr.bf16.mxu0 %v1029_v41  ;;  %1770 = vmatprep.subr.bf16.mxu1 %v1031_v42  ;;  %v1885_v41 = vrot.slane %v4386_v27, %v4260_v29  ;;  %v1093_v42 = vunpack.c.l.s8.bf16 %v621_v36 }
 0x2fd   :  { %1607 = vmatpush1.bf16.msra.mxu0 %v1028_v8  ;;  %1771 = vmatpush1.bf16.msra.mxu1 %v1030_v45  ;;  %v622_v8 = vld [vmem:[#allocation3 + $0x6f0] sm:$0xff] }
 0x2fe   :  { %1608 = vmatprep.subr.bf16.mxu0 %v1037_v46  ;;  %1772 = vmatprep.subr.bf16.mxu1 %v1039_v47  ;;  %v1881_v47 = vrot.slane %v4386_v27, %v4262_v31 }
 0x301   :  { %1609 = vmatpush1.bf16.msra.mxu0 %v1036_v51  ;;  %1773 = vmatpush1.bf16.msra.mxu1 %v1038_v52 }
 0x302   :  { %1619 = vmatprep.subr.bf16.mxu0 %v1045_v53  ;;  %1783 = vmatprep.subr.bf16.mxu1 %v1047_v58 }
 0x304   :  { %1611 = vmatmul.mubr.bf16.vlgmr.msra.gmra.mrb[12].mxu0 %v4349_v57  ;;  %1775 = vmatmul.mubr.bf16.vlgmr.msra.gmra.mrb[12].mxu1 %v4349_v57  ;;  %v1069_v57 = vunpack.c.h.s8.bf16 %v605_v6 }
 0x305   :  { %1620 = vmatpush1.bf16.msra.mxu0 %v1044_v1  ;;  %1784 = vmatpush1.bf16.msra.mxu1 %v1046_v2  ;;  %v1092_v2 = vunpack.c.l.s8.bf16 %v620_v44  ;;  %v647_v44 = vld [vmem:[#allocation3 + $0x7b8] sm:$0xff] }
 0x306   :  { %1621 = vmatprep.subr.bf16.mxu0 %v1053_v4  ;;  %1785 = vmatprep.subr.bf16.mxu1 %v1055_v5  ;;  %v1094_v4 = vunpack.c.l.s8.bf16 %v622_v8 }
 0x307   :  { %1651 = vmatprep.mubr.bf16.mxu0 %v4354_v30  ;;  %1815 = vmatprep.mubr.bf16.mxu1 %v4354_v30  ;;  %v614_v30 = vld [vmem:[#allocation3 + $0x6b0] sm:$0xff] }
 0x308   :  { %v1078_v23 = vunpack.c.l.s8.bf16 %v614_v30  ;;  %v1086_v39 = vunpack.c.h.s8.bf16 %v614_v30 }
 0x309   :  { %1622 = vmatpush1.bf16.msra.mxu0 %v1052_v56  ;;  %1786 = vmatpush1.bf16.msra.mxu1 %v1054_v62  ;;  %v1101_v62 = vunpack.c.h.s8.bf16 %v621_v36  ;;  %v639_v36 = vld [vmem:[#allocation3 + $0x778] sm:$0xff] }
 0x30a   :  { %1623 = vmatprep.subr.bf16.mxu0 %v1061_v9  ;;  %1787 = vmatprep.subr.bf16.mxu1 %v1063_v10  ;;  %v1103_v9 = vunpack.c.h.s8.bf16 %v623_v37 }
 0x30d   :  { %1624 = vmatpush1.bf16.msra.mxu0 %v1060_v3  ;;  %1788 = vmatpush1.bf16.msra.mxu1 %v1062_v13  ;;  %v631_v3 = vld [vmem:[#allocation3 + $0x738] sm:$0xff] }
 0x30e   :  { %1625 = vmatprep.subr.bf16.mxu0 %v1069_v57  ;;  %1789 = vmatprep.subr.bf16.mxu1 %v1071_v14 }
 0x311   :  { %1626 = vmatpush1.bf16.msra.mxu0 %v1068_v17  ;;  %1790 = vmatpush1.bf16.msra.mxu1 %v1070_v19  ;;  %v1102_v17 = vunpack.c.h.s8.bf16 %v622_v8  ;;  %v1109_v19 = vunpack.c.l.s8.bf16 %v629_v61 }
 0x312   :  { %1627 = vmatprep.subr.bf16.mxu0 %v1077_v22  ;;  %1791 = vmatprep.subr.bf16.mxu1 %v1079_v24  ;;  %v1111_v22 = vunpack.c.l.s8.bf16 %v631_v3  ;;  %v628_v24 = vld [vmem:[#allocation3 + $0x720] sm:$0xff] }
 0x313   :  { %v1108_v30 = vunpack.c.l.s8.bf16 %v628_v24  ;;  %v1116_v37 = vunpack.c.h.s8.bf16 %v628_v24  ;;  %v1852_v24 = vrot.slane %v4381_v11, %v4279_v49 }
 0x315   :  { %1628 = vmatpush1.bf16.msra.mxu0 %v1076_v26  ;;  %1792 = vmatpush1.bf16.msra.mxu1 %v1078_v23  ;;  %v1110_v26 = vunpack.c.l.s8.bf16 %v630_v20  ;;  %v1117_v23 = vunpack.c.h.s8.bf16 %v629_v61 }
 0x316   :  { %1629 = vmatprep.subr.bf16.mxu0 %v1085_v21  ;;  %1793 = vmatprep.subr.bf16.mxu1 %v1087_v35  ;;  %v1119_v21 = vunpack.c.h.s8.bf16 %v631_v3  ;;  %v637_v35 = vld [vmem:[#allocation3 + $0x768] sm:$0xff] }
 0x317   :  { %v1325_v45 = vpop.f32.mrb[8].mxu0  ;;  %v1489_v46 = vpop.f32.mrb[8].mxu1 }
 0x318   :  { %v1865_v50 = vmul.f32 %v1828_v25, %v1325_v45  ;;  %v1867_v51 = vmul.f32 %v1836_v0, %v1489_v46  ;;  %v1327_v52 = vpop.f32.mrb[9].mxu0  ;;  %v1491_v53 = vpop.f32.mrb[9].mxu1  ;;  %v1118_v25 = vunpack.c.h.s8.bf16 %v630_v20  ;;  %v1125_v0 = vunpack.c.l.s8.bf16 %v637_v35 }
 0x319   :  { %v1866_v58 = vmul.f32 %v1832_v33, %v1327_v52  ;;  %v1868_v59 = vmul.f32 %v1840_v16, %v1491_v53  ;;  %v1329_v60 = vpop.f32.mrb[10].mxu0  ;;  %v1493_v1 = vpop.f32.mrb[10].mxu1  ;;  %1630 = vmatpush1.bf16.msra.mxu0 %v1084_v38  ;;  %1794 = vmatpush1.bf16.msra.mxu1 %v1086_v39  ;;  %v1127_v33 = vunpack.c.l.s8.bf16 %v639_v36  ;;  %v636_v16 = vld [vmem:[#allocation3 + $0x760] sm:$0xff]  ;;  %v638_v38 = vld [vmem:[#allocation3 + $0x770] sm:$0xff]  ;;  %v1848_v20 = vrot.slane %v4381_v11, %v4281_v54 }
 0x31a   :  { %v4404_v5 = vadd.f32 %v1877_v40, %v1865_v50  ;;  %v4406_v6 = vadd.f32 %v1885_v41, %v1867_v51  ;;  %v1330_v7 = vpop.f32.mrb[11].mxu0  ;;  %v1494_v56 = vpop.f32.mrb[11].mxu1  ;;  %1631 = vmatprep.subr.bf16.mxu0 %v1093_v42  ;;  %1795 = vmatprep.subr.bf16.mxu1 %v1095_v43  ;;  %v1124_v39 = vunpack.c.l.s8.bf16 %v636_v16  ;;  %v1126_v40 = vunpack.c.l.s8.bf16 %v638_v38  ;;  %v645_v43 = vld [vmem:[#allocation3 + $0x7a8] sm:$0xff]  ;;  %v646_v50 = vld [vmem:[#allocation3 + $0x7b0] sm:$0xff]  ;;  %v655_v60 = vld [vmem:[#allocation3 + $0x7f8] sm:$0xff] }
 0x31b   :  { %v4408_v10 = vadd.f32 %v1881_v47, %v1866_v58  ;;  %v4410_v12 = vadd.f32 %v1889_v34, %v1868_v59  ;;  %v1133_v41 = vunpack.c.h.s8.bf16 %v637_v35  ;;  %v1135_v42 = vunpack.c.h.s8.bf16 %v639_v36  ;;  %v644_v34 = vld [vmem:[#allocation3 + $0x7a0] sm:$0xff]  ;;  %v653_v59 = vld [vmem:[#allocation3 + $0x7e8] sm:$0xff] }
 0x31c   :  { %v1922_v13 = vmax.f32 %v4404_v5, 0.0  ;;  %v1924_v57 = vmax.f32 %v4406_v6, 0.0  ;;  %v1132_v8 = vunpack.c.h.s8.bf16 %v636_v16  ;;  %v1134_v45 = vunpack.c.h.s8.bf16 %v638_v38  ;;  %v652_v56 = vld [vmem:[#allocation3 + $0x7e0] sm:$0xff] }
 0x31d   :  { %v1923_v14 = vmax.f32 %v4408_v10, 0.0  ;;  %v1925_v15 = vmax.f32 %v4410_v12, 0.0  ;;  %1632 = vmatpush1.bf16.msra.mxu0 %v1092_v2  ;;  %1796 = vmatpush1.bf16.msra.mxu1 %v1094_v4  ;;  %v1141_v46 = vunpack.c.l.s8.bf16 %v645_v43  ;;  %v1143_v47 = vunpack.c.l.s8.bf16 %v647_v44 }
 0x31e   :  { %1633 = vmatprep.subr.bf16.mxu0 %v1101_v62  ;;  %1797 = vmatprep.subr.bf16.mxu1 %v1103_v9  ;;  %v1140_v51 = vunpack.c.l.s8.bf16 %v644_v34  ;;  %v1142_v52 = vunpack.c.l.s8.bf16 %v646_v50  ;;  %v1149_v53 = vunpack.c.h.s8.bf16 %v645_v43  ;;  %v1151_v58 = vunpack.c.h.s8.bf16 %v647_v44  ;;  %v654_v62 = vld [vmem:[#allocation3 + $0x7f0] sm:$0xff] }
 0x31f   :  { %v1148_v1 = vunpack.c.h.s8.bf16 %v644_v34  ;;  %v1150_v2 = vunpack.c.h.s8.bf16 %v646_v50  ;;  %v1157_v4 = vunpack.c.l.s8.bf16 %v653_v59  ;;  %v1159_v7 = vunpack.c.l.s8.bf16 %v655_v60 }
 0x320   :  { %v1156_v9 = vunpack.c.l.s8.bf16 %v652_v56  ;;  %v1158_v61 = vunpack.c.l.s8.bf16 %v654_v62  ;;  %v1165_v3 = vunpack.c.h.s8.bf16 %v653_v59  ;;  %v1897_v35 = vrot.slane %v4386_v27, %v4281_v54 }
 0x321   :  { %1634 = vmatpush1.bf16.msra.mxu0 %v1100_v63  ;;  %1798 = vmatpush1.bf16.msra.mxu1 %v1102_v17  ;;  %v1167_v63 = vunpack.c.h.s8.bf16 %v655_v60  ;;  %v1164_v17 = vunpack.c.h.s8.bf16 %v652_v56  ;;  %v1905_v36 = vrot.slane %v4386_v27, %v4283_v55 }
 0x322   :  { %1635 = vmatprep.subr.bf16.mxu0 %v1109_v19  ;;  %1799 = vmatprep.subr.bf16.mxu1 %v1111_v22  ;;  %v1166_v19 = vunpack.c.h.s8.bf16 %v654_v62  ;;  %v1844_v22 = vrot.slane %v4381_v11, %v4277_v48 }
 0x325   :  { %1636 = vmatpush1.bf16.msra.mxu0 %v1108_v30  ;;  %1800 = vmatpush1.bf16.msra.mxu1 %v1110_v26  ;;  %v1856_v30 = vrot.slane %v4381_v11, %v4283_v55  ;;  %v1893_v26 = vrot.slane %v4386_v27, %v4277_v48 }
 0x326   :  { %1637 = vmatprep.subr.bf16.mxu0 %v1117_v23  ;;  %1801 = vmatprep.subr.bf16.mxu1 %v1119_v21  ;;  %v1901_v23 = vrot.slane %v4386_v27, %v4279_v49 }
 0x329   :  { %1638 = vmatpush1.bf16.msra.mxu0 %v1116_v37  ;;  %1802 = vmatpush1.bf16.msra.mxu1 %v1118_v25 }
 0x32a   :  { %1639 = vmatprep.subr.bf16.mxu0 %v1125_v0  ;;  %1803 = vmatprep.subr.bf16.mxu1 %v1127_v33 }
 0x32d   :  { %1640 = vmatpush1.bf16.msra.mxu0 %v1124_v39  ;;  %1804 = vmatpush1.bf16.msra.mxu1 %v1126_v40 }
 0x32e   :  { %1641 = vmatprep.subr.bf16.mxu0 %v1133_v41  ;;  %1805 = vmatprep.subr.bf16.mxu1 %v1135_v42 }
 0x331   :  { %1642 = vmatpush1.bf16.msra.mxu0 %v1132_v8  ;;  %1806 = vmatpush1.bf16.msra.mxu1 %v1134_v45 }
 0x332   :  { %1643 = vmatprep.subr.bf16.mxu0 %v1141_v46  ;;  %1807 = vmatprep.subr.bf16.mxu1 %v1143_v47 }
 0x335   :  { %1644 = vmatpush1.bf16.msra.mxu0 %v1140_v51  ;;  %1808 = vmatpush1.bf16.msra.mxu1 %v1142_v52 }
 0x336   :  { %1645 = vmatprep.subr.bf16.mxu0 %v1149_v53  ;;  %1809 = vmatprep.subr.bf16.mxu1 %v1151_v58 }
 0x339   :  { %1646 = vmatpush1.bf16.msra.mxu0 %v1148_v1  ;;  %1810 = vmatpush1.bf16.msra.mxu1 %v1150_v2 }
 0x33a   :  { %1647 = vmatprep.subr.bf16.mxu0 %v1157_v4  ;;  %1811 = vmatprep.subr.bf16.mxu1 %v1159_v7 }
 0x33d   :  { %1648 = vmatpush1.bf16.msra.mxu0 %v1156_v9  ;;  %1812 = vmatpush1.bf16.msra.mxu1 %v1158_v61 }
 0x33e   :  { %1649 = vmatprep.subr.bf16.mxu0 %v1165_v3  ;;  %1813 = vmatprep.subr.bf16.mxu1 %v1167_v63 }
 0x341   :  { %1650 = vmatpush1.bf16.msra.mxu0 %v1164_v17  ;;  %1814 = vmatpush1.bf16.msra.mxu1 %v1166_v19 }
 0x344   :  { %1652 = vmatmul.mubr.bf16.vlgmr.msra.gmra.mrb[12].mxu0 %v4363_v18  ;;  %1816 = vmatmul.mubr.bf16.vlgmr.msra.gmra.mrb[12].mxu1 %v4363_v18 }
 0x417   :  { %v1653_v21 = vpop.f32.mrb[12].mxu0  ;;  %v1817_v18 = vpop.f32.mrb[12].mxu1 }
 0x418   :  { %v1869_v37 = vmul.f32 %v1844_v22, %v1653_v21  ;;  %v1871_v25 = vmul.f32 %v1852_v24, %v1817_v18  ;;  %v1655_v0 = vpop.f32.mrb[13].mxu0  ;;  %v1819_v33 = vpop.f32.mrb[13].mxu1 }
 0x419   :  { %v1870_v16 = vmul.f32 %v1848_v20, %v1655_v0  ;;  %v1872_v11 = vmul.f32 %v1856_v30, %v1819_v33  ;;  %v1657_v38 = vpop.f32.mrb[14].mxu0  ;;  %v1821_v39 = vpop.f32.mrb[14].mxu1 }
 0x41a   :  { %v4434_v40 = vadd.f32 %v1893_v26, %v1869_v37  ;;  %v4436_v41 = vadd.f32 %v1901_v23, %v1871_v25  ;;  %v1658_v42 = vpop.f32.mrb[15].mxu0  ;;  %v1822_v43 = vpop.f32.mrb[15].mxu1 }
 0x41b   :  { %v4438_v44 = vadd.f32 %v1897_v35, %v1870_v16  ;;  %v4440_v8 = vadd.f32 %v1905_v36, %v1872_v11 }
 0x41c   :  { %v1926_v27 = vmax.f32 %v4434_v40, 0.0  ;;  %v1928_v45 = vmax.f32 %v4436_v41, 0.0 }
 0x41d   :  { %v1927_v46 = vmax.f32 %v4438_v44, 0.0  ;;  %v1929_v47 = vmax.f32 %v4440_v8, 0.0 }
 0x41e   :  { %4138 = dma.done.wait [#allocation6 + $0x2], 32768 }
 0x41f   :  { %4139 = vsyncadd [#allocation6 + $0x2], 4294934528  ;;  %v4449_v34 = vpack.c.bf16 %v1923_v14, %v1923_v14  ;;  %v1945_v50 = vld [vmem:[#allocation4 + $0x8] sm:$0xff]  ;;  %v1947_v51 = vld [vmem:[#allocation4 + $0x18] sm:$0xff] }
 0x420   :  { %v1944_v52 = vld [vmem:[#allocation4] sm:$0xff]  ;;  %v2201_v53 = vunpack.c.l.s8.bf16 %v1945_v50  ;;  %v2209_v58 = vunpack.c.h.s8.bf16 %v1945_v50  ;;  %v2203_v59 = vunpack.c.l.s8.bf16 %v1947_v51  ;;  %v2211_v60 = vunpack.c.h.s8.bf16 %v1947_v51  ;;  %v1946_v1 = vld [vmem:[#allocation4 + $0x10] sm:$0xff]  ;;  %v1953_v7 = vld [vmem:[#allocation4 + $0x48] sm:$0xff] }
 0x421   :  { %2744 = vmatprep.mubr.bf16.mxu0 %v4449_v34  ;;  %2908 = vmatprep.mubr.bf16.mxu1 %v4449_v34  ;;  %v2200_v2 = vunpack.c.l.s8.bf16 %v1944_v52  ;;  %v2202_v4 = vunpack.c.l.s8.bf16 %v1946_v1  ;;  %v1955_v56 = vld [vmem:[#allocation4 + $0x58] sm:$0xff]  ;;  %v2208_v10 = vunpack.c.h.s8.bf16 %v1944_v52  ;;  %v2210_v14 = vunpack.c.h.s8.bf16 %v1946_v1  ;;  %v1952_v61 = vld [vmem:[#allocation4 + $0x40] sm:$0xff]  ;;  %v1954_v3 = vld [vmem:[#allocation4 + $0x50] sm:$0xff] }
 0x422   :  { %2712 = vmatprep.subr.bf16.mxu0 %v2201_v53  ;;  %2876 = vmatprep.subr.bf16.mxu1 %v2203_v59  ;;  %v2217_v62 = vunpack.c.l.s8.bf16 %v1953_v7  ;;  %v2219_v9 = vunpack.c.l.s8.bf16 %v1955_v56  ;;  %v2216_v63 = vunpack.c.l.s8.bf16 %v1952_v61  ;;  %v2218_v17 = vunpack.c.l.s8.bf16 %v1954_v3  ;;  %v1961_v24 = vld [vmem:[#allocation4 + $0x88] sm:$0xff]  ;;  %v1963_v20 = vld [vmem:[#allocation4 + $0x98] sm:$0xff]  ;;  %v1960_v18 = vld [vmem:[#allocation4 + $0x80] sm:$0xff] }
 0x423   :  { %2713 = vmatpush1.bf16.msra.mxu0 %v2200_v2  ;;  %2877 = vmatpush1.bf16.msra.mxu1 %v2202_v4  ;;  %v2225_v19 = vunpack.c.h.s8.bf16 %v1953_v7  ;;  %v2227_v22 = vunpack.c.h.s8.bf16 %v1955_v56  ;;  %v2224_v30 = vunpack.c.h.s8.bf16 %v1952_v61  ;;  %v2226_v26 = vunpack.c.h.s8.bf16 %v1954_v3  ;;  %v1962_v35 = vld [vmem:[#allocation4 + $0x90] sm:$0xff]  ;;  %v1969_v33 = vld [vmem:[#allocation4 + $0xc8] sm:$0xff]  ;;  %v1971_v16 = vld [vmem:[#allocation4 + $0xd8] sm:$0xff] }
 0x424   :  { %2714 = vmatprep.subr.bf16.mxu0 %v2209_v58  ;;  %2878 = vmatprep.subr.bf16.mxu1 %v2211_v60  ;;  %v2233_v23 = vunpack.c.l.s8.bf16 %v1961_v24  ;;  %v2235_v21 = vunpack.c.l.s8.bf16 %v1963_v20  ;;  %v2232_v36 = vunpack.c.l.s8.bf16 %v1960_v18  ;;  %v2234_v37 = vunpack.c.l.s8.bf16 %v1962_v35  ;;  %v1968_v43 = vld [vmem:[#allocation4 + $0xc0] sm:$0xff]  ;;  %v1970_v50 = vld [vmem:[#allocation4 + $0xd0] sm:$0xff]  ;;  %v1977_v59 = vld [vmem:[#allocation4 + $0x108] sm:$0xff] }
 0x425   :  { %v2241_v25 = vunpack.c.h.s8.bf16 %v1961_v24  ;;  %v2243_v0 = vunpack.c.h.s8.bf16 %v1963_v20  ;;  %v2240_v11 = vunpack.c.h.s8.bf16 %v1960_v18  ;;  %v2242_v38 = vunpack.c.h.s8.bf16 %v1962_v35  ;;  %v1979_v60 = vld [vmem:[#allocation4 + $0x118] sm:$0xff]  ;;  %v1976_v56 = vld [vmem:[#allocation4 + $0x100] sm:$0xff]  ;;  %v1985_v3 = vld [vmem:[#allocation4 + $0x148] sm:$0xff] }
 0x426   :  { %v2249_v39 = vunpack.c.l.s8.bf16 %v1969_v33  ;;  %v2251_v42 = vunpack.c.l.s8.bf16 %v1971_v16  ;;  %v2248_v51 = vunpack.c.l.s8.bf16 %v1968_v43  ;;  %v2250_v52 = vunpack.c.l.s8.bf16 %v1970_v50  ;;  %v1984_v20 = vld [vmem:[#allocation4 + $0x140] sm:$0xff]  ;;  %v1993_v35 = vld [vmem:[#allocation4 + $0x188] sm:$0xff] }
 0x427   :  { %2715 = vmatpush1.bf16.msra.mxu0 %v2208_v10  ;;  %2879 = vmatpush1.bf16.msra.mxu1 %v2210_v14  ;;  %v2257_v53 = vunpack.c.h.s8.bf16 %v1969_v33  ;;  %v2259_v58 = vunpack.c.h.s8.bf16 %v1971_v16  ;;  %v2256_v1 = vunpack.c.h.s8.bf16 %v1968_v43  ;;  %v2258_v2 = vunpack.c.h.s8.bf16 %v1970_v50  ;;  %v1978_v10 = vld [vmem:[#allocation4 + $0x110] sm:$0xff]  ;;  %v1992_v16 = vld [vmem:[#allocation4 + $0x180] sm:$0xff]  ;;  %v2001_v50 = vld [vmem:[#allocation4 + $0x1c8] sm:$0xff] }
 0x428   :  { %2716 = vmatprep.subr.bf16.mxu0 %v2217_v62  ;;  %2880 = vmatprep.subr.bf16.mxu1 %v2219_v9  ;;  %v2265_v4 = vunpack.c.l.s8.bf16 %v1977_v59  ;;  %v2267_v7 = vunpack.c.l.s8.bf16 %v1979_v60  ;;  %v2264_v14 = vunpack.c.l.s8.bf16 %v1976_v56  ;;  %v2266_v62 = vunpack.c.l.s8.bf16 %v1978_v10 }
 0x429   :  { %v2273_v9 = vunpack.c.h.s8.bf16 %v1977_v59  ;;  %v2275_v61 = vunpack.c.h.s8.bf16 %v1979_v60  ;;  %v2000_v60 = vld [vmem:[#allocation4 + $0x1c0] sm:$0xff] }
 0x42b   :  { %2717 = vmatpush1.bf16.msra.mxu0 %v2216_v63  ;;  %2881 = vmatpush1.bf16.msra.mxu1 %v2218_v17  ;;  %v1987_v63 = vld [vmem:[#allocation4 + $0x158] sm:$0xff]  ;;  %v2272_v17 = vunpack.c.h.s8.bf16 %v1976_v56 }
 0x42c   :  { %2718 = vmatprep.subr.bf16.mxu0 %v2225_v19  ;;  %2882 = vmatprep.subr.bf16.mxu1 %v2227_v22  ;;  %v2274_v19 = vunpack.c.h.s8.bf16 %v1978_v10  ;;  %v2281_v22 = vunpack.c.l.s8.bf16 %v1985_v3  ;;  %v2283_v24 = vunpack.c.l.s8.bf16 %v1987_v63  ;;  %v2291_v18 = vunpack.c.h.s8.bf16 %v1987_v63  ;;  %v2009_v10 = vld [vmem:[#allocation4 + $0x208] sm:$0xff]  ;;  %v2008_v63 = vld [vmem:[#allocation4 + $0x200] sm:$0xff] }
 0x42d   :  { %v2336_v5 = vunpack.c.h.s8.bf16 %v2008_v63 }
 0x42f   :  { %2719 = vmatpush1.bf16.msra.mxu0 %v2224_v30  ;;  %2883 = vmatpush1.bf16.msra.mxu1 %v2226_v26  ;;  %v1986_v30 = vld [vmem:[#allocation4 + $0x150] sm:$0xff]  ;;  %v2280_v26 = vunpack.c.l.s8.bf16 %v1984_v20 }
 0x430   :  { %2720 = vmatprep.subr.bf16.mxu0 %v2233_v23  ;;  %2884 = vmatprep.subr.bf16.mxu1 %v2235_v21  ;;  %v2282_v23 = vunpack.c.l.s8.bf16 %v1986_v30  ;;  %v2289_v21 = vunpack.c.h.s8.bf16 %v1985_v3 }
 0x433   :  { %2721 = vmatpush1.bf16.msra.mxu0 %v2232_v36  ;;  %2885 = vmatpush1.bf16.msra.mxu1 %v2234_v37  ;;  %v1995_v36 = vld [vmem:[#allocation4 + $0x198] sm:$0xff]  ;;  %v2288_v37 = vunpack.c.h.s8.bf16 %v1984_v20  ;;  %v2337_v20 = vunpack.c.h.s8.bf16 %v2009_v10 }
 0x434   :  { %2722 = vmatprep.subr.bf16.mxu0 %v2241_v25  ;;  %2886 = vmatprep.subr.bf16.mxu1 %v2243_v0  ;;  %v2290_v25 = vunpack.c.h.s8.bf16 %v1986_v30  ;;  %v2297_v0 = vunpack.c.l.s8.bf16 %v1993_v35  ;;  %v2299_v33 = vunpack.c.l.s8.bf16 %v1995_v36  ;;  %v2307_v43 = vunpack.c.h.s8.bf16 %v1995_v36  ;;  %v2016_v36 = vld [vmem:[#allocation4 + $0x240] sm:$0xff] }
 0x435   :  { %v2344_v12 = vunpack.c.l.s8.bf16 %v2016_v36 }
 0x437   :  { %2723 = vmatpush1.bf16.msra.mxu0 %v2240_v11  ;;  %2887 = vmatpush1.bf16.msra.mxu1 %v2242_v38  ;;  %v1994_v11 = vld [vmem:[#allocation4 + $0x190] sm:$0xff]  ;;  %v2296_v38 = vunpack.c.l.s8.bf16 %v1992_v16 }
 0x438   :  { %2724 = vmatprep.subr.bf16.mxu0 %v2249_v39  ;;  %2888 = vmatprep.subr.bf16.mxu1 %v2251_v42  ;;  %v2298_v39 = vunpack.c.l.s8.bf16 %v1994_v11  ;;  %v2305_v42 = vunpack.c.h.s8.bf16 %v1993_v35 }
 0x43b   :  { %2725 = vmatpush1.bf16.msra.mxu0 %v2248_v51  ;;  %2889 = vmatpush1.bf16.msra.mxu1 %v2250_v52  ;;  %v2003_v51 = vld [vmem:[#allocation4 + $0x1d8] sm:$0xff]  ;;  %v2304_v52 = vunpack.c.h.s8.bf16 %v1992_v16 }
 0x43c   :  { %2726 = vmatprep.subr.bf16.mxu0 %v2257_v53  ;;  %2890 = vmatprep.subr.bf16.mxu1 %v2259_v58  ;;  %v2306_v53 = vunpack.c.h.s8.bf16 %v1994_v11  ;;  %v2313_v58 = vunpack.c.l.s8.bf16 %v2001_v50  ;;  %v2315_v59 = vunpack.c.l.s8.bf16 %v2003_v51  ;;  %v2323_v56 = vunpack.c.h.s8.bf16 %v2003_v51  ;;  %v2027_v16 = vld [vmem:[#allocation4 + $0x298] sm:$0xff] }
 0x43d   :  { %v2352_v11 = vunpack.c.h.s8.bf16 %v2016_v36  ;;  %v2051_v36 = vld [vmem:[#allocation4 + $0x358] sm:$0xff] }
 0x43f   :  { %2727 = vmatpush1.bf16.msra.mxu0 %v2256_v1  ;;  %2891 = vmatpush1.bf16.msra.mxu1 %v2258_v2  ;;  %v2002_v1 = vld [vmem:[#allocation4 + $0x1d0] sm:$0xff]  ;;  %v2312_v2 = vunpack.c.l.s8.bf16 %v2000_v60 }
 0x440   :  { %2728 = vmatprep.subr.bf16.mxu0 %v2265_v4  ;;  %2892 = vmatprep.subr.bf16.mxu1 %v2267_v7  ;;  %v2314_v4 = vunpack.c.l.s8.bf16 %v2002_v1  ;;  %v2321_v7 = vunpack.c.h.s8.bf16 %v2001_v50  ;;  %v2026_v50 = vld [vmem:[#allocation4 + $0x290] sm:$0xff] }
 0x443   :  { %2729 = vmatpush1.bf16.msra.mxu0 %v2264_v14  ;;  %2893 = vmatpush1.bf16.msra.mxu1 %v2266_v62  ;;  %v2011_v14 = vld [vmem:[#allocation4 + $0x218] sm:$0xff]  ;;  %v2320_v62 = vunpack.c.h.s8.bf16 %v2000_v60 }
 0x444   :  { %2730 = vmatprep.subr.bf16.mxu0 %v2273_v9  ;;  %2894 = vmatprep.subr.bf16.mxu1 %v2275_v61  ;;  %v2322_v9 = vunpack.c.h.s8.bf16 %v2002_v1  ;;  %v2329_v61 = vunpack.c.l.s8.bf16 %v2009_v10  ;;  %v2331_v3 = vunpack.c.l.s8.bf16 %v2011_v14  ;;  %v2339_v30 = vunpack.c.h.s8.bf16 %v2011_v14  ;;  %v2035_v60 = vld [vmem:[#allocation4 + $0x2d8] sm:$0xff]  ;;  %v2034_v10 = vld [vmem:[#allocation4 + $0x2d0] sm:$0xff] }
 0x447   :  { %2731 = vmatpush1.bf16.msra.mxu0 %v2272_v17  ;;  %2895 = vmatpush1.bf16.msra.mxu1 %v2274_v19  ;;  %v2010_v17 = vld [vmem:[#allocation4 + $0x210] sm:$0xff]  ;;  %v4456_v19 = vpack.c.bf16 %v1922_v13, %v1922_v13 }
 0x448   :  { %2732 = vmatprep.subr.bf16.mxu0 %v2281_v22  ;;  %2896 = vmatprep.subr.bf16.mxu1 %v2283_v24  ;;  %v2328_v22 = vunpack.c.l.s8.bf16 %v2008_v63  ;;  %v2330_v24 = vunpack.c.l.s8.bf16 %v2010_v17  ;;  %v2338_v13 = vunpack.c.h.s8.bf16 %v2010_v17  ;;  %v2043_v63 = vld [vmem:[#allocation4 + $0x318] sm:$0xff] }
 0x44b   :  { %2733 = vmatpush1.bf16.msra.mxu0 %v2280_v26  ;;  %2897 = vmatpush1.bf16.msra.mxu1 %v2282_v23  ;;  %v2017_v26 = vld [vmem:[#allocation4 + $0x248] sm:$0xff]  ;;  %v2019_v23 = vld [vmem:[#allocation4 + $0x258] sm:$0xff] }
 0x44c   :  { %2734 = vmatprep.subr.bf16.mxu0 %v2289_v21  ;;  %2898 = vmatprep.subr.bf16.mxu1 %v2291_v18  ;;  %v4461_v21 = vpack.c.bf16 %v1925_v15, %v1925_v15  ;;  %v2345_v18 = vunpack.c.l.s8.bf16 %v2017_v26  ;;  %v2347_v35 = vunpack.c.l.s8.bf16 %v2019_v23 }
 0x44f   :  { %2735 = vmatpush1.bf16.msra.mxu0 %v2288_v37  ;;  %2899 = vmatpush1.bf16.msra.mxu1 %v2290_v25  ;;  %v2018_v37 = vld [vmem:[#allocation4 + $0x250] sm:$0xff]  ;;  %v2353_v25 = vunpack.c.h.s8.bf16 %v2017_v26 }
 0x450   :  { %2736 = vmatprep.subr.bf16.mxu0 %v2297_v0  ;;  %2900 = vmatprep.subr.bf16.mxu1 %v2299_v33  ;;  %v2346_v15 = vunpack.c.l.s8.bf16 %v2018_v37  ;;  %v2355_v0 = vunpack.c.h.s8.bf16 %v2019_v23  ;;  %v2025_v33 = vld [vmem:[#allocation4 + $0x288] sm:$0xff]  ;;  %v2042_v26 = vld [vmem:[#allocation4 + $0x310] sm:$0xff] }
 0x453   :  { %2737 = vmatpush1.bf16.msra.mxu0 %v2296_v38  ;;  %2901 = vmatpush1.bf16.msra.mxu1 %v2298_v39  ;;  %v2354_v38 = vunpack.c.h.s8.bf16 %v2018_v37  ;;  %v2361_v39 = vunpack.c.l.s8.bf16 %v2025_v33 }
 0x454   :  { %2738 = vmatprep.subr.bf16.mxu0 %v2305_v42  ;;  %2902 = vmatprep.subr.bf16.mxu1 %v2307_v43  ;;  %v2363_v42 = vunpack.c.l.s8.bf16 %v2027_v16  ;;  %v2024_v43 = vld [vmem:[#allocation4 + $0x280] sm:$0xff] }
 0x455   :  { %v2360_v51 = vunpack.c.l.s8.bf16 %v2024_v43  ;;  %v2368_v1 = vunpack.c.h.s8.bf16 %v2024_v43  ;;  %v2059_v43 = vld [vmem:[#allocation4 + $0x398] sm:$0xff] }
 0x457   :  { %2739 = vmatpush1.bf16.msra.mxu0 %v2304_v52  ;;  %2903 = vmatpush1.bf16.msra.mxu1 %v2306_v53  ;;  %v2362_v52 = vunpack.c.l.s8.bf16 %v2026_v50  ;;  %v2369_v53 = vunpack.c.h.s8.bf16 %v2025_v33  ;;  %v2050_v33 = vld [vmem:[#allocation4 + $0x350] sm:$0xff] }
 0x458   :  { %2740 = vmatprep.subr.bf16.mxu0 %v2313_v58  ;;  %2904 = vmatprep.subr.bf16.mxu1 %v2315_v59  ;;  %v2371_v58 = vunpack.c.h.s8.bf16 %v2027_v16  ;;  %v2033_v59 = vld [vmem:[#allocation4 + $0x2c8] sm:$0xff] }
 0x45b   :  { %2741 = vmatpush1.bf16.msra.mxu0 %v2312_v2  ;;  %2905 = vmatpush1.bf16.msra.mxu1 %v2314_v4  ;;  %v2370_v2 = vunpack.c.h.s8.bf16 %v2026_v50  ;;  %v2377_v4 = vunpack.c.l.s8.bf16 %v2033_v59 }
 0x45c   :  { %2742 = vmatprep.subr.bf16.mxu0 %v2321_v7  ;;  %2906 = vmatprep.subr.bf16.mxu1 %v2323_v56  ;;  %v2379_v7 = vunpack.c.l.s8.bf16 %v2035_v60  ;;  %v2032_v56 = vld [vmem:[#allocation4 + $0x2c0] sm:$0xff] }
 0x45d   :  { %v2376_v14 = vunpack.c.l.s8.bf16 %v2032_v56  ;;  %v2384_v17 = vunpack.c.h.s8.bf16 %v2032_v56  ;;  %v2067_v56 = vld [vmem:[#allocation4 + $0x3d8] sm:$0xff] }
 0x45f   :  { %2743 = vmatpush1.bf16.msra.mxu0 %v2320_v62  ;;  %2907 = vmatpush1.bf16.msra.mxu1 %v2322_v9  ;;  %v2378_v62 = vunpack.c.l.s8.bf16 %v2034_v10  ;;  %v2385_v9 = vunpack.c.h.s8.bf16 %v2033_v59  ;;  %v2058_v59 = vld [vmem:[#allocation4 + $0x390] sm:$0xff] }
 0x460   :  { %2753 = vmatprep.subr.bf16.mxu0 %v2329_v61  ;;  %2917 = vmatprep.subr.bf16.mxu1 %v2331_v3  ;;  %v2387_v61 = vunpack.c.h.s8.bf16 %v2035_v60  ;;  %v2041_v3 = vld [vmem:[#allocation4 + $0x308] sm:$0xff] }
 0x462   :  { %2745 = vmatmul.mubr.bf16.vlgmr.msra.gmra.mrb[16].mxu0 %v4456_v19  ;;  %2909 = vmatmul.mubr.bf16.vlgmr.msra.gmra.mrb[16].mxu1 %v4456_v19 }
 0x463   :  { %2754 = vmatpush1.bf16.msra.mxu0 %v2328_v22  ;;  %2918 = vmatpush1.bf16.msra.mxu1 %v2330_v24  ;;  %v2386_v22 = vunpack.c.h.s8.bf16 %v2034_v10  ;;  %v2393_v24 = vunpack.c.l.s8.bf16 %v2041_v3 }
 0x464   :  { %2755 = vmatprep.subr.bf16.mxu0 %v2337_v20  ;;  %2919 = vmatprep.subr.bf16.mxu1 %v2339_v30  ;;  %v2395_v20 = vunpack.c.l.s8.bf16 %v2043_v63  ;;  %v2040_v30 = vld [vmem:[#allocation4 + $0x300] sm:$0xff] }
 0x465   :  { %2785 = vmatprep.mubr.bf16.mxu0 %v4461_v21  ;;  %2949 = vmatprep.mubr.bf16.mxu1 %v4461_v21  ;;  %v2392_v23 = vunpack.c.l.s8.bf16 %v2040_v30  ;;  %v2400_v37 = vunpack.c.h.s8.bf16 %v2040_v30  ;;  %v2075_v30 = vld [vmem:[#allocation4 + $0x418] sm:$0xff] }
 0x467   :  { %2756 = vmatpush1.bf16.msra.mxu0 %v2336_v5  ;;  %2920 = vmatpush1.bf16.msra.mxu1 %v2338_v13  ;;  %v2394_v5 = vunpack.c.l.s8.bf16 %v2042_v26  ;;  %v2401_v13 = vunpack.c.h.s8.bf16 %v2041_v3  ;;  %v2066_v3 = vld [vmem:[#allocation4 + $0x3d0] sm:$0xff] }
 0x468   :  { %2757 = vmatprep.subr.bf16.mxu0 %v2345_v18  ;;  %2921 = vmatprep.subr.bf16.mxu1 %v2347_v35  ;;  %v2403_v18 = vunpack.c.h.s8.bf16 %v2043_v63  ;;  %v2049_v35 = vld [vmem:[#allocation4 + $0x348] sm:$0xff] }
 0x46b   :  { %2758 = vmatpush1.bf16.msra.mxu0 %v2344_v12  ;;  %2922 = vmatpush1.bf16.msra.mxu1 %v2346_v15  ;;  %v2402_v12 = vunpack.c.h.s8.bf16 %v2042_v26  ;;  %v2409_v15 = vunpack.c.l.s8.bf16 %v2049_v35 }
 0x46c   :  { %2759 = vmatprep.subr.bf16.mxu0 %v2353_v25  ;;  %2923 = vmatprep.subr.bf16.mxu1 %v2355_v0  ;;  %v2411_v25 = vunpack.c.l.s8.bf16 %v2051_v36  ;;  %v2048_v0 = vld [vmem:[#allocation4 + $0x340] sm:$0xff] }
 0x46d   :  { %v2408_v16 = vunpack.c.l.s8.bf16 %v2048_v0  ;;  %v2416_v50 = vunpack.c.h.s8.bf16 %v2048_v0  ;;  %v2081_v0 = vld [vmem:[#allocation4 + $0x448] sm:$0xff] }
 0x46f   :  { %2760 = vmatpush1.bf16.msra.mxu0 %v2352_v11  ;;  %2924 = vmatpush1.bf16.msra.mxu1 %v2354_v38  ;;  %v2410_v11 = vunpack.c.l.s8.bf16 %v2050_v33  ;;  %v2417_v38 = vunpack.c.h.s8.bf16 %v2049_v35  ;;  %v2074_v35 = vld [vmem:[#allocation4 + $0x410] sm:$0xff] }
 0x470   :  { %2761 = vmatprep.subr.bf16.mxu0 %v2361_v39  ;;  %2925 = vmatprep.subr.bf16.mxu1 %v2363_v42  ;;  %v2419_v39 = vunpack.c.h.s8.bf16 %v2051_v36  ;;  %v2057_v42 = vld [vmem:[#allocation4 + $0x388] sm:$0xff]  ;;  %v4470_v36 = vpack.c.bf16 %v1924_v57, %v1924_v57  ;;  %v2466_v57 = vunpack.c.h.s8.bf16 %v2074_v35 }
 0x473   :  { %2762 = vmatpush1.bf16.msra.mxu0 %v2360_v51  ;;  %2926 = vmatpush1.bf16.msra.mxu1 %v2362_v52  ;;  %v2418_v51 = vunpack.c.h.s8.bf16 %v2050_v33  ;;  %v2425_v52 = vunpack.c.l.s8.bf16 %v2057_v42  ;;  %v2083_v33 = vld [vmem:[#allocation4 + $0x458] sm:$0xff] }
 0x474   :  { %2763 = vmatprep.subr.bf16.mxu0 %v2369_v53  ;;  %2927 = vmatprep.subr.bf16.mxu1 %v2371_v58  ;;  %v2427_v53 = vunpack.c.l.s8.bf16 %v2059_v43  ;;  %v2056_v58 = vld [vmem:[#allocation4 + $0x380] sm:$0xff] }
 0x475   :  { %v2424_v60 = vunpack.c.l.s8.bf16 %v2056_v58  ;;  %v2432_v10 = vunpack.c.h.s8.bf16 %v2056_v58 }
 0x477   :  { %2764 = vmatpush1.bf16.msra.mxu0 %v2368_v1  ;;  %2928 = vmatpush1.bf16.msra.mxu1 %v2370_v2  ;;  %v2426_v1 = vunpack.c.l.s8.bf16 %v2058_v59  ;;  %v2433_v2 = vunpack.c.h.s8.bf16 %v2057_v42  ;;  %v2082_v42 = vld [vmem:[#allocation4 + $0x450] sm:$0xff] }
 0x478   :  { %2765 = vmatprep.subr.bf16.mxu0 %v2377_v4  ;;  %2929 = vmatprep.subr.bf16.mxu1 %v2379_v7  ;;  %v2435_v4 = vunpack.c.h.s8.bf16 %v2059_v43  ;;  %v2065_v7 = vld [vmem:[#allocation4 + $0x3c8] sm:$0xff]  ;;  %v2481_v43 = vunpack.c.h.s8.bf16 %v2081_v0  ;;  %v2482_v58 = vunpack.c.h.s8.bf16 %v2082_v42 }
 0x47b   :  { %2766 = vmatpush1.bf16.msra.mxu0 %v2376_v14  ;;  %2930 = vmatpush1.bf16.msra.mxu1 %v2378_v62  ;;  %v2434_v14 = vunpack.c.h.s8.bf16 %v2058_v59  ;;  %v2441_v62 = vunpack.c.l.s8.bf16 %v2065_v7 }
 0x47c   :  { %2767 = vmatprep.subr.bf16.mxu0 %v2385_v9  ;;  %2931 = vmatprep.subr.bf16.mxu1 %v2387_v61  ;;  %v2443_v9 = vunpack.c.l.s8.bf16 %v2067_v56  ;;  %v2064_v61 = vld [vmem:[#allocation4 + $0x3c0] sm:$0xff] }
 0x47d   :  { %v2440_v63 = vunpack.c.l.s8.bf16 %v2064_v61  ;;  %v2448_v26 = vunpack.c.h.s8.bf16 %v2064_v61 }
 0x47f   :  { %2768 = vmatpush1.bf16.msra.mxu0 %v2384_v17  ;;  %2932 = vmatpush1.bf16.msra.mxu1 %v2386_v22  ;;  %v2442_v17 = vunpack.c.l.s8.bf16 %v2066_v3  ;;  %v2449_v22 = vunpack.c.h.s8.bf16 %v2065_v7 }
 0x480   :  { %2769 = vmatprep.subr.bf16.mxu0 %v2393_v24  ;;  %2933 = vmatprep.subr.bf16.mxu1 %v2395_v20  ;;  %v2451_v24 = vunpack.c.h.s8.bf16 %v2067_v56  ;;  %v2073_v20 = vld [vmem:[#allocation4 + $0x408] sm:$0xff] }
 0x483   :  { %2770 = vmatpush1.bf16.msra.mxu0 %v2392_v23  ;;  %2934 = vmatpush1.bf16.msra.mxu1 %v2394_v5  ;;  %v2450_v23 = vunpack.c.h.s8.bf16 %v2066_v3  ;;  %v2457_v5 = vunpack.c.l.s8.bf16 %v2073_v20 }
 0x484   :  { %2771 = vmatprep.subr.bf16.mxu0 %v2401_v13  ;;  %2935 = vmatprep.subr.bf16.mxu1 %v2403_v18  ;;  %v2459_v13 = vunpack.c.l.s8.bf16 %v2075_v30  ;;  %v2072_v18 = vld [vmem:[#allocation4 + $0x400] sm:$0xff] }
 0x485   :  { %v2464_v6 = vunpack.c.h.s8.bf16 %v2072_v18 }
 0x487   :  { %2772 = vmatpush1.bf16.msra.mxu0 %v2400_v37  ;;  %2936 = vmatpush1.bf16.msra.mxu1 %v2402_v12  ;;  %v2456_v37 = vunpack.c.l.s8.bf16 %v2072_v18  ;;  %v2458_v12 = vunpack.c.l.s8.bf16 %v2074_v35 }
 0x488   :  { %2773 = vmatprep.subr.bf16.mxu0 %v2409_v15  ;;  %2937 = vmatprep.subr.bf16.mxu1 %v2411_v25  ;;  %v2465_v15 = vunpack.c.h.s8.bf16 %v2073_v20  ;;  %v2467_v25 = vunpack.c.h.s8.bf16 %v2075_v30 }
 0x48b   :  { %2774 = vmatpush1.bf16.msra.mxu0 %v2408_v16  ;;  %2938 = vmatpush1.bf16.msra.mxu1 %v2410_v11  ;;  %v4475_v16 = vpack.c.bf16 %v1927_v46, %v1927_v46  ;;  %v2473_v11 = vunpack.c.l.s8.bf16 %v2081_v0  ;;  %v2474_v46 = vunpack.c.l.s8.bf16 %v2082_v42 }
 0x48c   :  { %2775 = vmatprep.subr.bf16.mxu0 %v2417_v38  ;;  %2939 = vmatprep.subr.bf16.mxu1 %v2419_v39  ;;  %v2475_v38 = vunpack.c.l.s8.bf16 %v2083_v33  ;;  %v2080_v39 = vld [vmem:[#allocation4 + $0x440] sm:$0xff] }
 0x48d   :  { %v2472_v44 = vunpack.c.l.s8.bf16 %v2080_v39 }
 0x48f   :  { %2776 = vmatpush1.bf16.msra.mxu0 %v2416_v50  ;;  %2940 = vmatpush1.bf16.msra.mxu1 %v2418_v51  ;;  %v2483_v50 = vunpack.c.h.s8.bf16 %v2083_v33  ;;  %v2089_v51 = vld [vmem:[#allocation4 + $0x488] sm:$0xff] }
 0x490   :  { %2777 = vmatprep.subr.bf16.mxu0 %v2425_v52  ;;  %2941 = vmatprep.subr.bf16.mxu1 %v2427_v53  ;;  %v2091_v52 = vld [vmem:[#allocation4 + $0x498] sm:$0xff]  ;;  %v2480_v53 = vunpack.c.h.s8.bf16 %v2080_v39  ;;  %v2489_v59 = vunpack.c.l.s8.bf16 %v2089_v51  ;;  %v2497_v56 = vunpack.c.h.s8.bf16 %v2089_v51 }
 0x493   :  { %2778 = vmatpush1.bf16.msra.mxu0 %v2424_v60  ;;  %2942 = vmatpush1.bf16.msra.mxu1 %v2426_v1  ;;  %v2491_v60 = vunpack.c.l.s8.bf16 %v2091_v52  ;;  %v2088_v1 = vld [vmem:[#allocation4 + $0x480] sm:$0xff] }
 0x494   :  { %2779 = vmatprep.subr.bf16.mxu0 %v2433_v2  ;;  %2943 = vmatprep.subr.bf16.mxu1 %v2435_v4  ;;  %v2090_v2 = vld [vmem:[#allocation4 + $0x490] sm:$0xff]  ;;  %v2488_v4 = vunpack.c.l.s8.bf16 %v2088_v1 }
 0x495   :  { %v2490_v7 = vunpack.c.l.s8.bf16 %v2090_v2  ;;  %v2498_v61 = vunpack.c.h.s8.bf16 %v2090_v2 }
 0x497   :  { %2780 = vmatpush1.bf16.msra.mxu0 %v2432_v10  ;;  %2944 = vmatpush1.bf16.msra.mxu1 %v2434_v14  ;;  %v2499_v10 = vunpack.c.h.s8.bf16 %v2091_v52  ;;  %v2097_v14 = vld [vmem:[#allocation4 + $0x4c8] sm:$0xff] }
 0x498   :  { %2781 = vmatprep.subr.bf16.mxu0 %v2441_v62  ;;  %2945 = vmatprep.subr.bf16.mxu1 %v2443_v9  ;;  %v2099_v62 = vld [vmem:[#allocation4 + $0x4d8] sm:$0xff]  ;;  %v2496_v9 = vunpack.c.h.s8.bf16 %v2088_v1  ;;  %v2505_v3 = vunpack.c.l.s8.bf16 %v2097_v14  ;;  %v2513_v30 = vunpack.c.h.s8.bf16 %v2097_v14 }
 0x49b   :  { %2782 = vmatpush1.bf16.msra.mxu0 %v2440_v63  ;;  %2946 = vmatpush1.bf16.msra.mxu1 %v2442_v17  ;;  %v2507_v63 = vunpack.c.l.s8.bf16 %v2099_v62  ;;  %v2096_v17 = vld [vmem:[#allocation4 + $0x4c0] sm:$0xff] }
 0x49c   :  { %2783 = vmatprep.subr.bf16.mxu0 %v2449_v22  ;;  %2947 = vmatprep.subr.bf16.mxu1 %v2451_v24  ;;  %v2098_v22 = vld [vmem:[#allocation4 + $0x4d0] sm:$0xff]  ;;  %v2504_v24 = vunpack.c.l.s8.bf16 %v2096_v17 }
 0x49d   :  { %v2506_v20 = vunpack.c.l.s8.bf16 %v2098_v22  ;;  %v2514_v18 = vunpack.c.h.s8.bf16 %v2098_v22 }
 0x49f   :  { %2784 = vmatpush1.bf16.msra.mxu0 %v2448_v26  ;;  %2948 = vmatpush1.bf16.msra.mxu1 %v2450_v23  ;;  %v2515_v26 = vunpack.c.h.s8.bf16 %v2099_v62  ;;  %v2105_v23 = vld [vmem:[#allocation4 + $0x508] sm:$0xff] }
 0x4a0   :  { %2794 = vmatprep.subr.bf16.mxu0 %v2457_v5  ;;  %2958 = vmatprep.subr.bf16.mxu1 %v2459_v13  ;;  %v2107_v5 = vld [vmem:[#allocation4 + $0x518] sm:$0xff]  ;;  %v2512_v13 = vunpack.c.h.s8.bf16 %v2096_v17  ;;  %v2521_v35 = vunpack.c.l.s8.bf16 %v2105_v23  ;;  %v2529_v33 = vunpack.c.h.s8.bf16 %v2105_v23 }
 0x4a2   :  { %2786 = vmatmul.mubr.bf16.vlgmr.msra.gmra.mrb[16].mxu0 %v4470_v36  ;;  %2950 = vmatmul.mubr.bf16.vlgmr.msra.gmra.mrb[16].mxu1 %v4470_v36 }
 0x4a3   :  { %2795 = vmatpush1.bf16.msra.mxu0 %v2456_v37  ;;  %2959 = vmatpush1.bf16.msra.mxu1 %v2458_v12  ;;  %v2523_v37 = vunpack.c.l.s8.bf16 %v2107_v5  ;;  %v2104_v12 = vld [vmem:[#allocation4 + $0x500] sm:$0xff] }
 0x4a4   :  { %2796 = vmatprep.subr.bf16.mxu0 %v2465_v15  ;;  %2960 = vmatprep.subr.bf16.mxu1 %v2467_v25  ;;  %v2106_v15 = vld [vmem:[#allocation4 + $0x510] sm:$0xff]  ;;  %v2520_v25 = vunpack.c.l.s8.bf16 %v2104_v12 }
 0x4a5   :  { %2826 = vmatprep.mubr.bf16.mxu0 %v4475_v16  ;;  %2990 = vmatprep.mubr.bf16.mxu1 %v4475_v16  ;;  %v2522_v0 = vunpack.c.l.s8.bf16 %v2106_v15  ;;  %v2530_v39 = vunpack.c.h.s8.bf16 %v2106_v15 }
 0x4a7   :  { %2797 = vmatpush1.bf16.msra.mxu0 %v2464_v6  ;;  %2961 = vmatpush1.bf16.msra.mxu1 %v2466_v57  ;;  %v2531_v6 = vunpack.c.h.s8.bf16 %v2107_v5  ;;  %v2113_v57 = vld [vmem:[#allocation4 + $0x548] sm:$0xff] }
 0x4a8   :  { %2798 = vmatprep.subr.bf16.mxu0 %v2473_v11  ;;  %2962 = vmatprep.subr.bf16.mxu1 %v2475_v38  ;;  %v2115_v11 = vld [vmem:[#allocation4 + $0x558] sm:$0xff]  ;;  %v2528_v38 = vunpack.c.h.s8.bf16 %v2104_v12  ;;  %v2537_v42 = vunpack.c.l.s8.bf16 %v2113_v57  ;;  %v2545_v52 = vunpack.c.h.s8.bf16 %v2113_v57 }
 0x4ab   :  { %2799 = vmatpush1.bf16.msra.mxu0 %v2472_v44  ;;  %2963 = vmatpush1.bf16.msra.mxu1 %v2474_v46  ;;  %v2539_v44 = vunpack.c.l.s8.bf16 %v2115_v11  ;;  %v2112_v46 = vld [vmem:[#allocation4 + $0x540] sm:$0xff] }
 0x4ac   :  { %2800 = vmatprep.subr.bf16.mxu0 %v2481_v43  ;;  %2964 = vmatprep.subr.bf16.mxu1 %v2483_v50  ;;  %v2114_v43 = vld [vmem:[#allocation4 + $0x550] sm:$0xff]  ;;  %v2536_v50 = vunpack.c.l.s8.bf16 %v2112_v46 }
 0x4ad   :  { %v2538_v51 = vunpack.c.l.s8.bf16 %v2114_v43  ;;  %v2546_v1 = vunpack.c.h.s8.bf16 %v2114_v43 }
 0x4af   :  { %2801 = vmatpush1.bf16.msra.mxu0 %v2480_v53  ;;  %2965 = vmatpush1.bf16.msra.mxu1 %v2482_v58  ;;  %v2547_v53 = vunpack.c.h.s8.bf16 %v2115_v11  ;;  %v2121_v58 = vld [vmem:[#allocation4 + $0x588] sm:$0xff] }
 0x4b0   :  { %2802 = vmatprep.subr.bf16.mxu0 %v2489_v59  ;;  %2966 = vmatprep.subr.bf16.mxu1 %v2491_v60  ;;  %v2123_v59 = vld [vmem:[#allocation4 + $0x598] sm:$0xff]  ;;  %v2544_v60 = vunpack.c.h.s8.bf16 %v2112_v46  ;;  %v2553_v2 = vunpack.c.l.s8.bf16 %v2121_v58  ;;  %v2561_v62 = vunpack.c.h.s8.bf16 %v2121_v58  ;;  %v4489_v46 = vpack.c.bf16 %v1929_v47, %v1929_v47 }
 0x4b3   :  { %2803 = vmatpush1.bf16.msra.mxu0 %v2488_v4  ;;  %2967 = vmatpush1.bf16.msra.mxu1 %v2490_v7  ;;  %v2555_v4 = vunpack.c.l.s8.bf16 %v2123_v59  ;;  %v2120_v7 = vld [vmem:[#allocation4 + $0x580] sm:$0xff] }
 0x4b4   :  { %2804 = vmatprep.subr.bf16.mxu0 %v2497_v56  ;;  %2968 = vmatprep.subr.bf16.mxu1 %v2499_v10  ;;  %v2122_v56 = vld [vmem:[#allocation4 + $0x590] sm:$0xff]  ;;  %v2552_v10 = vunpack.c.l.s8.bf16 %v2120_v7 }
 0x4b5   :  { %v2554_v14 = vunpack.c.l.s8.bf16 %v2122_v56  ;;  %v2562_v17 = vunpack.c.h.s8.bf16 %v2122_v56  ;;  %v2152_v56 = vld [vmem:[#allocation4 + $0x680] sm:$0xff] }
 0x4b7   :  { %2805 = vmatpush1.bf16.msra.mxu0 %v2496_v9  ;;  %2969 = vmatpush1.bf16.msra.mxu1 %v2498_v61  ;;  %v2563_v9 = vunpack.c.h.s8.bf16 %v2123_v59  ;;  %v2129_v61 = vld [vmem:[#allocation4 + $0x5c8] sm:$0xff] }
 0x4b8   :  { %2806 = vmatprep.subr.bf16.mxu0 %v2505_v3  ;;  %2970 = vmatprep.subr.bf16.mxu1 %v2507_v63  ;;  %v2131_v3 = vld [vmem:[#allocation4 + $0x5d8] sm:$0xff]  ;;  %v2560_v63 = vunpack.c.h.s8.bf16 %v2120_v7  ;;  %v2569_v22 = vunpack.c.l.s8.bf16 %v2129_v61  ;;  %v2577_v5 = vunpack.c.h.s8.bf16 %v2129_v61  ;;  %v2153_v59 = vld [vmem:[#allocation4 + $0x688] sm:$0xff] }
 0x4bb   :  { %2807 = vmatpush1.bf16.msra.mxu0 %v2504_v24  ;;  %2971 = vmatpush1.bf16.msra.mxu1 %v2506_v20  ;;  %v2571_v24 = vunpack.c.l.s8.bf16 %v2131_v3  ;;  %v2128_v20 = vld [vmem:[#allocation4 + $0x5c0] sm:$0xff] }
 0x4bc   :  { %2808 = vmatprep.subr.bf16.mxu0 %v2513_v30  ;;  %2972 = vmatprep.subr.bf16.mxu1 %v2515_v26  ;;  %v2130_v30 = vld [vmem:[#allocation4 + $0x5d0] sm:$0xff]  ;;  %v2568_v26 = vunpack.c.l.s8.bf16 %v2128_v20 }
 0x4bd   :  { %v2570_v23 = vunpack.c.l.s8.bf16 %v2130_v30  ;;  %v2578_v12 = vunpack.c.h.s8.bf16 %v2130_v30  ;;  %v2160_v30 = vld [vmem:[#allocation4 + $0x6c0] sm:$0xff] }
 0x4bf   :  { %2809 = vmatpush1.bf16.msra.mxu0 %v2512_v13  ;;  %2973 = vmatpush1.bf16.msra.mxu1 %v2514_v18  ;;  %v2579_v13 = vunpack.c.h.s8.bf16 %v2131_v3  ;;  %v2137_v18 = vld [vmem:[#allocation4 + $0x608] sm:$0xff] }
 0x4c0   :  { %2810 = vmatprep.subr.bf16.mxu0 %v2521_v35  ;;  %2974 = vmatprep.subr.bf16.mxu1 %v2523_v37  ;;  %v2139_v35 = vld [vmem:[#allocation4 + $0x618] sm:$0xff]  ;;  %v2576_v37 = vunpack.c.h.s8.bf16 %v2128_v20  ;;  %v2585_v15 = vunpack.c.l.s8.bf16 %v2137_v18  ;;  %v2161_v3 = vld [vmem:[#allocation4 + $0x6c8] sm:$0xff] }
 0x4c3   :  { %2811 = vmatpush1.bf16.msra.mxu0 %v2520_v25  ;;  %2975 = vmatpush1.bf16.msra.mxu1 %v2522_v0  ;;  %v2587_v25 = vunpack.c.l.s8.bf16 %v2139_v35  ;;  %v2136_v0 = vld [vmem:[#allocation4 + $0x600] sm:$0xff] }
 0x4c4   :  { %2812 = vmatprep.subr.bf16.mxu0 %v2529_v33  ;;  %2976 = vmatprep.subr.bf16.mxu1 %v2531_v6  ;;  %v2138_v33 = vld [vmem:[#allocation4 + $0x610] sm:$0xff]  ;;  %v4484_v6 = vpack.c.bf16 %v1926_v27, %v1926_v27  ;;  %v2584_v57 = vunpack.c.l.s8.bf16 %v2136_v0  ;;  %v2592_v40 = vunpack.c.h.s8.bf16 %v2136_v0 }
 0x4c5   :  { %v2586_v11 = vunpack.c.l.s8.bf16 %v2138_v33  ;;  %v2594_v27 = vunpack.c.h.s8.bf16 %v2138_v33  ;;  %v2168_v33 = vld [vmem:[#allocation4 + $0x700] sm:$0xff] }
 0x4c7   :  { %2813 = vmatpush1.bf16.msra.mxu0 %v2528_v38  ;;  %2977 = vmatpush1.bf16.msra.mxu1 %v2530_v39  ;;  %v2593_v38 = vunpack.c.h.s8.bf16 %v2137_v18  ;;  %v2595_v39 = vunpack.c.h.s8.bf16 %v2139_v35  ;;  %v2169_v35 = vld [vmem:[#allocation4 + $0x708] sm:$0xff] }
 0x4c8   :  { %2814 = vmatprep.subr.bf16.mxu0 %v2537_v42  ;;  %2978 = vmatprep.subr.bf16.mxu1 %v2539_v44  ;;  %v2145_v42 = vld [vmem:[#allocation4 + $0x648] sm:$0xff]  ;;  %v2147_v44 = vld [vmem:[#allocation4 + $0x658] sm:$0xff] }
 0x4c9   :  { %v2601_v43 = vunpack.c.l.s8.bf16 %v2145_v42  ;;  %v2611_v58 = vunpack.c.h.s8.bf16 %v2147_v44 }
 0x4cb   :  { %2815 = vmatpush1.bf16.msra.mxu0 %v2536_v50  ;;  %2979 = vmatpush1.bf16.msra.mxu1 %v2538_v51  ;;  %v2603_v50 = vunpack.c.l.s8.bf16 %v2147_v44  ;;  %v2144_v51 = vld [vmem:[#allocation4 + $0x640] sm:$0xff]  ;;  %v2177_v44 = vld [vmem:[#allocation4 + $0x748] sm:$0xff] }
 0x4cc   :  { %2816 = vmatprep.subr.bf16.mxu0 %v2545_v52  ;;  %2980 = vmatprep.subr.bf16.mxu1 %v2547_v53  ;;  %v2146_v52 = vld [vmem:[#allocation4 + $0x650] sm:$0xff]  ;;  %v2600_v8 = vunpack.c.l.s8.bf16 %v2144_v51  ;;  %v2609_v53 = vunpack.c.h.s8.bf16 %v2145_v42 }
 0x4cd   :  { %v2602_v47 = vunpack.c.l.s8.bf16 %v2146_v52 }
 0x4cf   :  { %2817 = vmatpush1.bf16.msra.mxu0 %v2544_v60  ;;  %2981 = vmatpush1.bf16.msra.mxu1 %v2546_v1  ;;  %v2155_v60 = vld [vmem:[#allocation4 + $0x698] sm:$0xff]  ;;  %v2608_v1 = vunpack.c.h.s8.bf16 %v2144_v51 }
 0x4d0   :  { %2818 = vmatprep.subr.bf16.mxu0 %v2553_v2  ;;  %2982 = vmatprep.subr.bf16.mxu1 %v2555_v4  ;;  %v2610_v2 = vunpack.c.h.s8.bf16 %v2146_v52  ;;  %v2617_v4 = vunpack.c.l.s8.bf16 %v2153_v59  ;;  %v2619_v7 = vunpack.c.l.s8.bf16 %v2155_v60  ;;  %v2627_v61 = vunpack.c.h.s8.bf16 %v2155_v60  ;;  %v2176_v52 = vld [vmem:[#allocation4 + $0x740] sm:$0xff]  ;;  %v2185_v60 = vld [vmem:[#allocation4 + $0x788] sm:$0xff] }
 0x4d3   :  { %2819 = vmatpush1.bf16.msra.mxu0 %v2552_v10  ;;  %2983 = vmatpush1.bf16.msra.mxu1 %v2554_v14  ;;  %v2154_v10 = vld [vmem:[#allocation4 + $0x690] sm:$0xff]  ;;  %v2616_v14 = vunpack.c.l.s8.bf16 %v2152_v56 }
 0x4d4   :  { %2820 = vmatprep.subr.bf16.mxu0 %v2561_v62  ;;  %2984 = vmatprep.subr.bf16.mxu1 %v2563_v9  ;;  %v2618_v62 = vunpack.c.l.s8.bf16 %v2154_v10  ;;  %v2625_v9 = vunpack.c.h.s8.bf16 %v2153_v59 }
 0x4d7   :  { %2821 = vmatpush1.bf16.msra.mxu0 %v2560_v63  ;;  %2985 = vmatpush1.bf16.msra.mxu1 %v2562_v17  ;;  %v2163_v63 = vld [vmem:[#allocation4 + $0x6d8] sm:$0xff]  ;;  %v2624_v17 = vunpack.c.h.s8.bf16 %v2152_v56 }
 0x4d8   :  { %2822 = vmatprep.subr.bf16.mxu0 %v2569_v22  ;;  %2986 = vmatprep.subr.bf16.mxu1 %v2571_v24  ;;  %v2626_v22 = vunpack.c.h.s8.bf16 %v2154_v10  ;;  %v2633_v24 = vunpack.c.l.s8.bf16 %v2161_v3  ;;  %v2635_v20 = vunpack.c.l.s8.bf16 %v2163_v63  ;;  %v2643_v18 = vunpack.c.h.s8.bf16 %v2163_v63  ;;  %v2184_v10 = vld [vmem:[#allocation4 + $0x780] sm:$0xff]  ;;  %v2193_v63 = vld [vmem:[#allocation4 + $0x7c8] sm:$0xff] }
 0x4db   :  { %2823 = vmatpush1.bf16.msra.mxu0 %v2568_v26  ;;  %2987 = vmatpush1.bf16.msra.mxu1 %v2570_v23  ;;  %v2162_v26 = vld [vmem:[#allocation4 + $0x6d0] sm:$0xff]  ;;  %v2632_v23 = vunpack.c.l.s8.bf16 %v2160_v30 }
 0x4dc   :  { %2824 = vmatprep.subr.bf16.mxu0 %v2577_v5  ;;  %2988 = vmatprep.subr.bf16.mxu1 %v2579_v13  ;;  %v2634_v5 = vunpack.c.l.s8.bf16 %v2162_v26  ;;  %v2641_v13 = vunpack.c.h.s8.bf16 %v2161_v3 }
 0x4df   :  { %2825 = vmatpush1.bf16.msra.mxu0 %v2576_v37  ;;  %2989 = vmatpush1.bf16.msra.mxu1 %v2578_v12  ;;  %v2171_v37 = vld [vmem:[#allocation4 + $0x718] sm:$0xff]  ;;  %v2640_v12 = vunpack.c.h.s8.bf16 %v2160_v30 }
 0x4e0   :  { %2835 = vmatprep.subr.bf16.mxu0 %v2585_v15  ;;  %2999 = vmatprep.subr.bf16.mxu1 %v2587_v25  ;;  %v2642_v15 = vunpack.c.h.s8.bf16 %v2162_v26  ;;  %v2649_v25 = vunpack.c.l.s8.bf16 %v2169_v35  ;;  %v2651_v0 = vunpack.c.l.s8.bf16 %v2171_v37  ;;  %v2659_v42 = vunpack.c.h.s8.bf16 %v2171_v37  ;;  %v2192_v26 = vld [vmem:[#allocation4 + $0x7c0] sm:$0xff]  ;;  %v1949_v37 = vld [vmem:[#allocation4 + $0x28] sm:$0xff] }
 0x4e2   :  { %2827 = vmatmul.mubr.bf16.vlgmr.msra.gmra.mrb[16].mxu0 %v4484_v6  ;;  %2991 = vmatmul.mubr.bf16.vlgmr.msra.gmra.mrb[16].mxu1 %v4484_v6 }
 0x4e3   :  { %2836 = vmatpush1.bf16.msra.mxu0 %v2584_v57  ;;  %3000 = vmatpush1.bf16.msra.mxu1 %v2586_v11  ;;  %v2170_v57 = vld [vmem:[#allocation4 + $0x710] sm:$0xff]  ;;  %v2648_v11 = vunpack.c.l.s8.bf16 %v2168_v33 }
 0x4e4   :  { %2837 = vmatprep.subr.bf16.mxu0 %v2593_v38  ;;  %3001 = vmatprep.subr.bf16.mxu1 %v2595_v39  ;;  %v2650_v38 = vunpack.c.l.s8.bf16 %v2170_v57  ;;  %v2657_v39 = vunpack.c.h.s8.bf16 %v2169_v35 }
 0x4e5   :  { %2867 = vmatprep.mubr.bf16.mxu0 %v4489_v46  ;;  %3031 = vmatprep.mubr.bf16.mxu1 %v4489_v46 }
 0x4e7   :  { %2838 = vmatpush1.bf16.msra.mxu0 %v2592_v40  ;;  %3002 = vmatpush1.bf16.msra.mxu1 %v2594_v27  ;;  %v2179_v40 = vld [vmem:[#allocation4 + $0x758] sm:$0xff]  ;;  %v2656_v27 = vunpack.c.h.s8.bf16 %v2168_v33 }
 0x4e8   :  { %2839 = vmatprep.subr.bf16.mxu0 %v2601_v43  ;;  %3003 = vmatprep.subr.bf16.mxu1 %v2603_v50  ;;  %v2658_v43 = vunpack.c.h.s8.bf16 %v2170_v57  ;;  %v2665_v50 = vunpack.c.l.s8.bf16 %v2177_v44  ;;  %v2667_v51 = vunpack.c.l.s8.bf16 %v2179_v40  ;;  %v2675_v59 = vunpack.c.h.s8.bf16 %v2179_v40  ;;  %v1948_v57 = vld [vmem:[#allocation4 + $0x20] sm:$0xff] }
 0x4e9   :  { %v2212_v41 = vunpack.c.h.s8.bf16 %v1948_v57 }
 0x4eb   :  { %2840 = vmatpush1.bf16.msra.mxu0 %v2600_v8  ;;  %3004 = vmatpush1.bf16.msra.mxu1 %v2602_v47  ;;  %v2178_v8 = vld [vmem:[#allocation4 + $0x750] sm:$0xff]  ;;  %v2664_v47 = vunpack.c.l.s8.bf16 %v2176_v52 }
 0x4ec   :  { %2841 = vmatprep.subr.bf16.mxu0 %v2609_v53  ;;  %3005 = vmatprep.subr.bf16.mxu1 %v2611_v58  ;;  %v2666_v53 = vunpack.c.l.s8.bf16 %v2178_v8  ;;  %v2673_v58 = vunpack.c.h.s8.bf16 %v2177_v44  ;;  %v2213_v44 = vunpack.c.h.s8.bf16 %v1949_v37 }
 0x4ef   :  { %2842 = vmatpush1.bf16.msra.mxu0 %v2608_v1  ;;  %3006 = vmatpush1.bf16.msra.mxu1 %v2610_v2  ;;  %v2187_v1 = vld [vmem:[#allocation4 + $0x798] sm:$0xff]  ;;  %v2672_v2 = vunpack.c.h.s8.bf16 %v2176_v52  ;;  %v1956_v52 = vld [vmem:[#allocation4 + $0x60] sm:$0xff] }
 0x4f0   :  { %2843 = vmatprep.subr.bf16.mxu0 %v2617_v4  ;;  %3007 = vmatprep.subr.bf16.mxu1 %v2619_v7  ;;  %v2674_v4 = vunpack.c.h.s8.bf16 %v2178_v8  ;;  %v2681_v7 = vunpack.c.l.s8.bf16 %v2185_v60  ;;  %v2683_v56 = vunpack.c.l.s8.bf16 %v2187_v1  ;;  %v2691_v3 = vunpack.c.h.s8.bf16 %v2187_v1  ;;  %v1958_v8 = vld [vmem:[#allocation4 + $0x70] sm:$0xff]  ;;  %v1967_v1 = vld [vmem:[#allocation4 + $0xb8] sm:$0xff] }
 0x4f3   :  { %2844 = vmatpush1.bf16.msra.mxu0 %v2616_v14  ;;  %3008 = vmatpush1.bf16.msra.mxu1 %v2618_v62  ;;  %v2186_v14 = vld [vmem:[#allocation4 + $0x790] sm:$0xff]  ;;  %v2680_v62 = vunpack.c.l.s8.bf16 %v2184_v10 }
 0x4f4   :  { %2845 = vmatprep.subr.bf16.mxu0 %v2625_v9  ;;  %3009 = vmatprep.subr.bf16.mxu1 %v2627_v61  ;;  %v2682_v9 = vunpack.c.l.s8.bf16 %v2186_v14  ;;  %v2689_v61 = vunpack.c.h.s8.bf16 %v2185_v60  ;;  %v1965_v60 = vld [vmem:[#allocation4 + $0xa8] sm:$0xff] }
 0x4f7   :  { %2846 = vmatpush1.bf16.msra.mxu0 %v2624_v17  ;;  %3010 = vmatpush1.bf16.msra.mxu1 %v2626_v22  ;;  %v2195_v17 = vld [vmem:[#allocation4 + $0x7d8] sm:$0xff]  ;;  %v2688_v22 = vunpack.c.h.s8.bf16 %v2184_v10  ;;  %v1964_v10 = vld [vmem:[#allocation4 + $0xa0] sm:$0xff] }
 0x4f8   :  { %2847 = vmatprep.subr.bf16.mxu0 %v2633_v24  ;;  %3011 = vmatprep.subr.bf16.mxu1 %v2635_v20  ;;  %v2690_v24 = vunpack.c.h.s8.bf16 %v2186_v14  ;;  %v2697_v20 = vunpack.c.l.s8.bf16 %v2193_v63  ;;  %v2699_v30 = vunpack.c.l.s8.bf16 %v2195_v17  ;;  %v2707_v35 = vunpack.c.h.s8.bf16 %v2195_v17 }
 0x4f9   :  { %v2236_v14 = vunpack.c.l.s8.bf16 %v1964_v10  ;;  %v2244_v17 = vunpack.c.h.s8.bf16 %v1964_v10  ;;  %v1998_v10 = vld [vmem:[#allocation4 + $0x1b0] sm:$0xff] }
 0x4fb   :  { %2848 = vmatpush1.bf16.msra.mxu0 %v2632_v23  ;;  %3012 = vmatpush1.bf16.msra.mxu1 %v2634_v5  ;;  %v2194_v23 = vld [vmem:[#allocation4 + $0x7d0] sm:$0xff]  ;;  %v2696_v5 = vunpack.c.l.s8.bf16 %v2192_v26 }
 0x4fc   :  { %2849 = vmatprep.subr.bf16.mxu0 %v2641_v13  ;;  %3013 = vmatprep.subr.bf16.mxu1 %v2643_v18  ;;  %v2698_v13 = vunpack.c.l.s8.bf16 %v2194_v23  ;;  %v2705_v18 = vunpack.c.h.s8.bf16 %v2193_v63  ;;  %v1975_v63 = vld [vmem:[#allocation4 + $0xf8] sm:$0xff] }
 0x4ff   :  { %2850 = vmatpush1.bf16.msra.mxu0 %v2640_v12  ;;  %3014 = vmatpush1.bf16.msra.mxu1 %v2642_v15  ;;  %v1951_v12 = vld [vmem:[#allocation4 + $0x38] sm:$0xff]  ;;  %v2704_v15 = vunpack.c.h.s8.bf16 %v2192_v26  ;;  %v1974_v26 = vld [vmem:[#allocation4 + $0xf0] sm:$0xff] }
 0x500   :  { %2851 = vmatprep.subr.bf16.mxu0 %v2649_v25  ;;  %3015 = vmatprep.subr.bf16.mxu1 %v2651_v0  ;;  %v2706_v25 = vunpack.c.h.s8.bf16 %v2194_v23  ;;  %v2205_v0 = vunpack.c.l.s8.bf16 %v1949_v37  ;;  %v2207_v33 = vunpack.c.l.s8.bf16 %v1951_v12  ;;  %v2215_v40 = vunpack.c.h.s8.bf16 %v1951_v12  ;;  %v1983_v37 = vld [vmem:[#allocation4 + $0x138] sm:$0xff] }
 0x503   :  { %2852 = vmatpush1.bf16.msra.mxu0 %v2648_v11  ;;  %3016 = vmatpush1.bf16.msra.mxu1 %v2650_v38  ;;  %v1950_v11 = vld [vmem:[#allocation4 + $0x30] sm:$0xff]  ;;  %v4498_v38 = vpack.c.bf16 %v1928_v45, %v1928_v45 }
 0x504   :  { %2853 = vmatprep.subr.bf16.mxu0 %v2657_v39  ;;  %3017 = vmatprep.subr.bf16.mxu1 %v2659_v42  ;;  %v2204_v39 = vunpack.c.l.s8.bf16 %v1948_v57  ;;  %v2206_v42 = vunpack.c.l.s8.bf16 %v1950_v11  ;;  %v1982_v57 = vld [vmem:[#allocation4 + $0x130] sm:$0xff] }
 0x507   :  { %2854 = vmatpush1.bf16.msra.mxu0 %v2656_v27  ;;  %3018 = vmatpush1.bf16.msra.mxu1 %v2658_v43  ;;  %v1957_v27 = vld [vmem:[#allocation4 + $0x68] sm:$0xff]  ;;  %v1959_v43 = vld [vmem:[#allocation4 + $0x78] sm:$0xff] }
 0x508   :  { %2855 = vmatprep.subr.bf16.mxu0 %v2665_v50  ;;  %3019 = vmatprep.subr.bf16.mxu1 %v2667_v51  ;;  %v2214_v50 = vunpack.c.h.s8.bf16 %v1950_v11  ;;  %v2221_v45 = vunpack.c.l.s8.bf16 %v1957_v27  ;;  %v2223_v51 = vunpack.c.l.s8.bf16 %v1959_v43 }
 0x50b   :  { %2856 = vmatpush1.bf16.msra.mxu0 %v2664_v47  ;;  %3020 = vmatpush1.bf16.msra.mxu1 %v2666_v53  ;;  %v2220_v47 = vunpack.c.l.s8.bf16 %v1956_v52  ;;  %v2222_v53 = vunpack.c.l.s8.bf16 %v1958_v8 }
 0x50c   :  { %2857 = vmatprep.subr.bf16.mxu0 %v2673_v58  ;;  %3021 = vmatprep.subr.bf16.mxu1 %v2675_v59  ;;  %v2229_v58 = vunpack.c.h.s8.bf16 %v1957_v27  ;;  %v2231_v59 = vunpack.c.h.s8.bf16 %v1959_v43  ;;  %v1991_v27 = vld [vmem:[#allocation4 + $0x178] sm:$0xff] }
 0x50f   :  { %2858 = vmatpush1.bf16.msra.mxu0 %v2672_v2  ;;  %3022 = vmatpush1.bf16.msra.mxu1 %v2674_v4  ;;  %v2228_v2 = vunpack.c.h.s8.bf16 %v1956_v52  ;;  %v2230_v4 = vunpack.c.h.s8.bf16 %v1958_v8  ;;  %v1990_v52 = vld [vmem:[#allocation4 + $0x170] sm:$0xff] }
 0x510   :  { %2859 = vmatprep.subr.bf16.mxu0 %v2681_v7  ;;  %3023 = vmatprep.subr.bf16.mxu1 %v2683_v56  ;;  %v2237_v7 = vunpack.c.l.s8.bf16 %v1965_v60  ;;  %v2239_v56 = vunpack.c.l.s8.bf16 %v1967_v1 }
 0x513   :  { %2860 = vmatpush1.bf16.msra.mxu0 %v2680_v62  ;;  %3024 = vmatpush1.bf16.msra.mxu1 %v2682_v9  ;;  %v2245_v9 = vunpack.c.h.s8.bf16 %v1965_v60  ;;  %v1999_v60 = vld [vmem:[#allocation4 + $0x1b8] sm:$0xff] }
 0x514   :  { %2861 = vmatprep.subr.bf16.mxu0 %v2689_v61  ;;  %3025 = vmatprep.subr.bf16.mxu1 %v2691_v3  ;;  %v2247_v61 = vunpack.c.h.s8.bf16 %v1967_v1  ;;  %v1973_v3 = vld [vmem:[#allocation4 + $0xe8] sm:$0xff] }
 0x517   :  { %2862 = vmatpush1.bf16.msra.mxu0 %v2688_v22  ;;  %3026 = vmatpush1.bf16.msra.mxu1 %v2690_v24  ;;  %v2253_v24 = vunpack.c.l.s8.bf16 %v1973_v3 }
 0x518   :  { %2863 = vmatprep.subr.bf16.mxu0 %v2697_v20  ;;  %3027 = vmatprep.subr.bf16.mxu1 %v2699_v30  ;;  %v2255_v20 = vunpack.c.l.s8.bf16 %v1975_v63  ;;  %v1972_v30 = vld [vmem:[#allocation4 + $0xe0] sm:$0xff] }
 0x519   :  { %v2252_v23 = vunpack.c.l.s8.bf16 %v1972_v30  ;;  %v2260_v12 = vunpack.c.h.s8.bf16 %v1972_v30  ;;  %v2006_v30 = vld [vmem:[#allocation4 + $0x1f0] sm:$0xff] }
 0x51b   :  { %2864 = vmatpush1.bf16.msra.mxu0 %v2696_v5  ;;  %3028 = vmatpush1.bf16.msra.mxu1 %v2698_v13  ;;  %v2254_v5 = vunpack.c.l.s8.bf16 %v1974_v26  ;;  %v2261_v13 = vunpack.c.h.s8.bf16 %v1973_v3  ;;  %v2007_v3 = vld [vmem:[#allocation4 + $0x1f8] sm:$0xff] }
 0x51c   :  { %2865 = vmatprep.subr.bf16.mxu0 %v2705_v18  ;;  %3029 = vmatprep.subr.bf16.mxu1 %v2707_v35  ;;  %v2263_v18 = vunpack.c.h.s8.bf16 %v1975_v63  ;;  %v1981_v35 = vld [vmem:[#allocation4 + $0x128] sm:$0xff] }
 0x51f   :  { %2866 = vmatpush1.bf16.msra.mxu0 %v2704_v15  ;;  %3030 = vmatpush1.bf16.msra.mxu1 %v2706_v25  ;;  %v2262_v15 = vunpack.c.h.s8.bf16 %v1974_v26  ;;  %v2269_v25 = vunpack.c.l.s8.bf16 %v1981_v35 }
 0x520   :  { %3040 = vmatprep.subr.bf16.mxu0 %v2205_v0  ;;  %3204 = vmatprep.subr.bf16.mxu1 %v2207_v33  ;;  %v2271_v0 = vunpack.c.l.s8.bf16 %v1983_v37  ;;  %v1980_v33 = vld [vmem:[#allocation4 + $0x120] sm:$0xff] }
 0x521   :  { %v2268_v11 = vunpack.c.l.s8.bf16 %v1980_v33  ;;  %v2276_v43 = vunpack.c.h.s8.bf16 %v1980_v33  ;;  %v2014_v33 = vld [vmem:[#allocation4 + $0x230] sm:$0xff] }
 0x522   :  { %2868 = vmatmul.mubr.bf16.vlgmr.msra.gmra.mrb[16].mxu0 %v4498_v38  ;;  %3032 = vmatmul.mubr.bf16.vlgmr.msra.gmra.mrb[16].mxu1 %v4498_v38 }
 0x523   :  { %3041 = vmatpush1.bf16.msra.mxu0 %v2204_v39  ;;  %3205 = vmatpush1.bf16.msra.mxu1 %v2206_v42  ;;  %v2270_v39 = vunpack.c.l.s8.bf16 %v1982_v57  ;;  %v2277_v42 = vunpack.c.h.s8.bf16 %v1981_v35  ;;  %v2015_v35 = vld [vmem:[#allocation4 + $0x238] sm:$0xff] }
 0x524   :  { %3042 = vmatprep.subr.bf16.mxu0 %v2213_v44  ;;  %3206 = vmatprep.subr.bf16.mxu1 %v2215_v40  ;;  %v2279_v44 = vunpack.c.h.s8.bf16 %v1983_v37  ;;  %v1989_v40 = vld [vmem:[#allocation4 + $0x168] sm:$0xff] }
 0x525   :  { %3072 = vmatprep.mubr.bf16.mxu0 %v4449_v34  ;;  %3236 = vmatprep.mubr.bf16.mxu1 %v4449_v34  ;;  %v1966_v34 = vld [vmem:[#allocation4 + $0xb0] sm:$0xff] }
 0x526   :  { %v2238_v62 = vunpack.c.l.s8.bf16 %v1966_v34  ;;  %v2246_v22 = vunpack.c.h.s8.bf16 %v1966_v34 }
 0x527   :  { %3043 = vmatpush1.bf16.msra.mxu0 %v2212_v41  ;;  %3207 = vmatpush1.bf16.msra.mxu1 %v2214_v50  ;;  %v2278_v41 = vunpack.c.h.s8.bf16 %v1982_v57  ;;  %v2285_v50 = vunpack.c.l.s8.bf16 %v1989_v40 }
 0x528   :  { %3044 = vmatprep.subr.bf16.mxu0 %v2221_v45  ;;  %3208 = vmatprep.subr.bf16.mxu1 %v2223_v51  ;;  %v2287_v45 = vunpack.c.l.s8.bf16 %v1991_v27  ;;  %v1988_v51 = vld [vmem:[#allocation4 + $0x160] sm:$0xff] }
 0x529   :  { %v2284_v8 = vunpack.c.l.s8.bf16 %v1988_v51  ;;  %v2292_v1 = vunpack.c.h.s8.bf16 %v1988_v51  ;;  %v2022_v51 = vld [vmem:[#allocation4 + $0x270] sm:$0xff] }
 0x52b   :  { %3045 = vmatpush1.bf16.msra.mxu0 %v2220_v47  ;;  %3209 = vmatpush1.bf16.msra.mxu1 %v2222_v53  ;;  %v2286_v47 = vunpack.c.l.s8.bf16 %v1990_v52  ;;  %v2293_v53 = vunpack.c.h.s8.bf16 %v1989_v40  ;;  %v2023_v40 = vld [vmem:[#allocation4 + $0x278] sm:$0xff] }
 0x52c   :  { %3046 = vmatprep.subr.bf16.mxu0 %v2229_v58  ;;  %3210 = vmatprep.subr.bf16.mxu1 %v2231_v59  ;;  %v2295_v58 = vunpack.c.h.s8.bf16 %v1991_v27  ;;  %v1997_v59 = vld [vmem:[#allocation4 + $0x1a8] sm:$0xff] }
 0x52f   :  { %3047 = vmatpush1.bf16.msra.mxu0 %v2228_v2  ;;  %3211 = vmatpush1.bf16.msra.mxu1 %v2230_v4  ;;  %v2294_v2 = vunpack.c.h.s8.bf16 %v1990_v52  ;;  %v2301_v4 = vunpack.c.l.s8.bf16 %v1997_v59 }
 0x530   :  { %3048 = vmatprep.subr.bf16.mxu0 %v2237_v7  ;;  %3212 = vmatprep.subr.bf16.mxu1 %v2239_v56  ;;  %v2303_v7 = vunpack.c.l.s8.bf16 %v1999_v60  ;;  %v1996_v56 = vld [vmem:[#allocation4 + $0x1a0] sm:$0xff] }
 0x531   :  { %v2300_v34 = vunpack.c.l.s8.bf16 %v1996_v56  ;;  %v2308_v63 = vunpack.c.h.s8.bf16 %v1996_v56 }
 0x533   :  { %3049 = vmatpush1.bf16.msra.mxu0 %v2236_v14  ;;  %3213 = vmatpush1.bf16.msra.mxu1 %v2238_v62  ;;  %v2302_v14 = vunpack.c.l.s8.bf16 %v1998_v10  ;;  %v2309_v62 = vunpack.c.h.s8.bf16 %v1997_v59 }
 0x534   :  { %3050 = vmatprep.subr.bf16.mxu0 %v2245_v9  ;;  %3214 = vmatprep.subr.bf16.mxu1 %v2247_v61  ;;  %v2311_v9 = vunpack.c.h.s8.bf16 %v1999_v60  ;;  %v2005_v61 = vld [vmem:[#allocation4 + $0x1e8] sm:$0xff]  ;;  %v2358_v60 = vunpack.c.h.s8.bf16 %v2022_v51 }
 0x537   :  { %3051 = vmatpush1.bf16.msra.mxu0 %v2244_v17  ;;  %3215 = vmatpush1.bf16.msra.mxu1 %v2246_v22  ;;  %v2310_v17 = vunpack.c.h.s8.bf16 %v1998_v10  ;;  %v2317_v22 = vunpack.c.l.s8.bf16 %v2005_v61 }
 0x538   :  { %3052 = vmatprep.subr.bf16.mxu0 %v2253_v24  ;;  %3216 = vmatprep.subr.bf16.mxu1 %v2255_v20  ;;  %v2319_v24 = vunpack.c.l.s8.bf16 %v2007_v3  ;;  %v2004_v20 = vld [vmem:[#allocation4 + $0x1e0] sm:$0xff] }
 0x539   :  { %v2316_v26 = vunpack.c.l.s8.bf16 %v2004_v20  ;;  %v2324_v37 = vunpack.c.h.s8.bf16 %v2004_v20 }
 0x53b   :  { %3053 = vmatpush1.bf16.msra.mxu0 %v2252_v23  ;;  %3217 = vmatpush1.bf16.msra.mxu1 %v2254_v5  ;;  %v2318_v23 = vunpack.c.l.s8.bf16 %v2006_v30  ;;  %v2325_v5 = vunpack.c.h.s8.bf16 %v2005_v61 }
 0x53c   :  { %3054 = vmatprep.subr.bf16.mxu0 %v2261_v13  ;;  %3218 = vmatprep.subr.bf16.mxu1 %v2263_v18  ;;  %v2327_v13 = vunpack.c.h.s8.bf16 %v2007_v3  ;;  %v2013_v18 = vld [vmem:[#allocation4 + $0x228] sm:$0xff] }
 0x53f   :  { %3055 = vmatpush1.bf16.msra.mxu0 %v2260_v12  ;;  %3219 = vmatpush1.bf16.msra.mxu1 %v2262_v15  ;;  %v2326_v12 = vunpack.c.h.s8.bf16 %v2006_v30  ;;  %v2333_v15 = vunpack.c.l.s8.bf16 %v2013_v18 }
 0x540   :  { %3056 = vmatprep.subr.bf16.mxu0 %v2269_v25  ;;  %3220 = vmatprep.subr.bf16.mxu1 %v2271_v0  ;;  %v2335_v25 = vunpack.c.l.s8.bf16 %v2015_v35  ;;  %v2012_v0 = vld [vmem:[#allocation4 + $0x220] sm:$0xff] }
 0x541   :  { %v2332_v57 = vunpack.c.l.s8.bf16 %v2012_v0  ;;  %v2340_v27 = vunpack.c.h.s8.bf16 %v2012_v0 }
 0x543   :  { %3057 = vmatpush1.bf16.msra.mxu0 %v2268_v11  ;;  %3221 = vmatpush1.bf16.msra.mxu1 %v2270_v39  ;;  %v2334_v11 = vunpack.c.l.s8.bf16 %v2014_v33  ;;  %v2341_v39 = vunpack.c.h.s8.bf16 %v2013_v18 }
 0x544   :  { %3058 = vmatprep.subr.bf16.mxu0 %v2277_v42  ;;  %3222 = vmatprep.subr.bf16.mxu1 %v2279_v44  ;;  %v2343_v42 = vunpack.c.h.s8.bf16 %v2015_v35  ;;  %v2021_v44 = vld [vmem:[#allocation4 + $0x268] sm:$0xff] }
 0x547   :  { %3059 = vmatpush1.bf16.msra.mxu0 %v2276_v43  ;;  %3223 = vmatpush1.bf16.msra.mxu1 %v2278_v41  ;;  %v2342_v43 = vunpack.c.h.s8.bf16 %v2014_v33  ;;  %v2349_v41 = vunpack.c.l.s8.bf16 %v2021_v44 }
 0x548   :  { %3060 = vmatprep.subr.bf16.mxu0 %v2285_v50  ;;  %3224 = vmatprep.subr.bf16.mxu1 %v2287_v45  ;;  %v2351_v50 = vunpack.c.l.s8.bf16 %v2023_v40  ;;  %v2020_v45 = vld [vmem:[#allocation4 + $0x260] sm:$0xff] }
 0x549   :  { %v2348_v52 = vunpack.c.l.s8.bf16 %v2020_v45  ;;  %v2356_v59 = vunpack.c.h.s8.bf16 %v2020_v45 }
 0x54b   :  { %3061 = vmatpush1.bf16.msra.mxu0 %v2284_v8  ;;  %3225 = vmatpush1.bf16.msra.mxu1 %v2286_v47  ;;  %v2350_v8 = vunpack.c.l.s8.bf16 %v2022_v51  ;;  %v2359_v47 = vunpack.c.h.s8.bf16 %v2023_v40 }
 0x54c   :  { %3062 = vmatprep.subr.bf16.mxu0 %v2293_v53  ;;  %3226 = vmatprep.subr.bf16.mxu1 %v2295_v58  ;;  %v2029_v53 = vld [vmem:[#allocation4 + $0x2a8] sm:$0xff]  ;;  %v2031_v58 = vld [vmem:[#allocation4 + $0x2b8] sm:$0xff] }
 0x54d   :  { %v2373_v10 = vunpack.c.h.s8.bf16 %v2029_v53 }
 0x54f   :  { %3063 = vmatpush1.bf16.msra.mxu0 %v2292_v1  ;;  %3227 = vmatpush1.bf16.msra.mxu1 %v2294_v2  ;;  %v2365_v1 = vunpack.c.l.s8.bf16 %v2029_v53  ;;  %v2367_v2 = vunpack.c.l.s8.bf16 %v2031_v58 }
 0x550   :  { %3064 = vmatprep.subr.bf16.mxu0 %v2301_v4  ;;  %3228 = vmatprep.subr.bf16.mxu1 %v2303_v7  ;;  %v2028_v4 = vld [vmem:[#allocation4 + $0x2a0] sm:$0xff] }
 0x551   :  { %v2364_v7 = vunpack.c.l.s8.bf16 %v2028_v4 }
 0x553   :  { %3065 = vmatpush1.bf16.msra.mxu0 %v2300_v34  ;;  %3229 = vmatpush1.bf16.msra.mxu1 %v2302_v14  ;;  %v2375_v34 = vunpack.c.h.s8.bf16 %v2031_v58  ;;  %v2037_v14 = vld [vmem:[#allocation4 + $0x2e8] sm:$0xff] }
 0x554   :  { %3066 = vmatprep.subr.bf16.mxu0 %v2309_v62  ;;  %3230 = vmatprep.subr.bf16.mxu1 %v2311_v9  ;;  %v2039_v62 = vld [vmem:[#allocation4 + $0x2f8] sm:$0xff]  ;;  %v2372_v9 = vunpack.c.h.s8.bf16 %v2028_v4  ;;  %v2381_v3 = vunpack.c.l.s8.bf16 %v2037_v14  ;;  %v2389_v30 = vunpack.c.h.s8.bf16 %v2037_v14 }
 0x557   :  { %3067 = vmatpush1.bf16.msra.mxu0 %v2308_v63  ;;  %3231 = vmatpush1.bf16.msra.mxu1 %v2310_v17  ;;  %v2383_v63 = vunpack.c.l.s8.bf16 %v2039_v62  ;;  %v2036_v17 = vld [vmem:[#allocation4 + $0x2e0] sm:$0xff] }
 0x558   :  { %3068 = vmatprep.subr.bf16.mxu0 %v2317_v22  ;;  %3232 = vmatprep.subr.bf16.mxu1 %v2319_v24  ;;  %v2038_v22 = vld [vmem:[#allocation4 + $0x2f0] sm:$0xff]  ;;  %v2380_v24 = vunpack.c.l.s8.bf16 %v2036_v17 }
 0x559   :  { %v2382_v20 = vunpack.c.l.s8.bf16 %v2038_v22  ;;  %v2390_v18 = vunpack.c.h.s8.bf16 %v2038_v22 }
 0x55b   :  { %3069 = vmatpush1.bf16.msra.mxu0 %v2316_v26  ;;  %3233 = vmatpush1.bf16.msra.mxu1 %v2318_v23  ;;  %v2391_v26 = vunpack.c.h.s8.bf16 %v2039_v62  ;;  %v2045_v23 = vld [vmem:[#allocation4 + $0x328] sm:$0xff] }
 0x55c   :  { %3070 = vmatprep.subr.bf16.mxu0 %v2325_v5  ;;  %3234 = vmatprep.subr.bf16.mxu1 %v2327_v13  ;;  %v2047_v5 = vld [vmem:[#allocation4 + $0x338] sm:$0xff]  ;;  %v2388_v13 = vunpack.c.h.s8.bf16 %v2036_v17  ;;  %v2397_v35 = vunpack.c.l.s8.bf16 %v2045_v23  ;;  %v2405_v33 = vunpack.c.h.s8.bf16 %v2045_v23 }
 0x55f   :  { %3071 = vmatpush1.bf16.msra.mxu0 %v2324_v37  ;;  %3235 = vmatpush1.bf16.msra.mxu1 %v2326_v12  ;;  %v2399_v37 = vunpack.c.l.s8.bf16 %v2047_v5  ;;  %v2044_v12 = vld [vmem:[#allocation4 + $0x320] sm:$0xff] }
 0x560   :  { %3081 = vmatprep.subr.bf16.mxu0 %v2333_v15  ;;  %3245 = vmatprep.subr.bf16.mxu1 %v2335_v25  ;;  %v2046_v15 = vld [vmem:[#allocation4 + $0x330] sm:$0xff]  ;;  %v2396_v25 = vunpack.c.l.s8.bf16 %v2044_v12 }
 0x561   :  { %v2398_v0 = vunpack.c.l.s8.bf16 %v2046_v15 }
 0x562   :  { %3073 = vmatmul.mubr.bf16.vlgmr.msra.gmra.mrb[20].mxu0 %v4456_v19  ;;  %3237 = vmatmul.mubr.bf16.vlgmr.msra.gmra.mrb[20].mxu1 %v4456_v19  ;;  %v2357_v19 = vunpack.c.h.s8.bf16 %v2021_v44  ;;  %v2406_v44 = vunpack.c.h.s8.bf16 %v2046_v15 }
 0x563   :  { %3082 = vmatpush1.bf16.msra.mxu0 %v2332_v57  ;;  %3246 = vmatpush1.bf16.msra.mxu1 %v2334_v11  ;;  %v2407_v57 = vunpack.c.h.s8.bf16 %v2047_v5  ;;  %v2053_v11 = vld [vmem:[#allocation4 + $0x368] sm:$0xff] }
 0x564   :  { %3083 = vmatprep.subr.bf16.mxu0 %v2341_v39  ;;  %3247 = vmatprep.subr.bf16.mxu1 %v2343_v42  ;;  %v2055_v39 = vld [vmem:[#allocation4 + $0x378] sm:$0xff]  ;;  %v2404_v42 = vunpack.c.h.s8.bf16 %v2044_v12  ;;  %v2413_v40 = vunpack.c.l.s8.bf16 %v2053_v11  ;;  %v2421_v51 = vunpack.c.h.s8.bf16 %v2053_v11 }
 0x565   :  { %3113 = vmatprep.mubr.bf16.mxu0 %v4461_v21  ;;  %3277 = vmatprep.mubr.bf16.mxu1 %v4461_v21  ;;  %v2030_v21 = vld [vmem:[#allocation4 + $0x2b0] sm:$0xff] }
 0x566   :  { %v2366_v56 = vunpack.c.l.s8.bf16 %v2030_v21  ;;  %v2374_v61 = vunpack.c.h.s8.bf16 %v2030_v21 }
 0x567   :  { %3084 = vmatpush1.bf16.msra.mxu0 %v2340_v27  ;;  %3248 = vmatpush1.bf16.msra.mxu1 %v2342_v43  ;;  %v2415_v27 = vunpack.c.l.s8.bf16 %v2055_v39  ;;  %v2052_v43 = vld [vmem:[#allocation4 + $0x360] sm:$0xff] }
 0x568   :  { %3085 = vmatprep.subr.bf16.mxu0 %v2349_v41  ;;  %3249 = vmatprep.subr.bf16.mxu1 %v2351_v50  ;;  %v2054_v41 = vld [vmem:[#allocation4 + $0x370] sm:$0xff]  ;;  %v2412_v50 = vunpack.c.l.s8.bf16 %v2052_v43 }
 0x569   :  { %v2414_v45 = vunpack.c.l.s8.bf16 %v2054_v41  ;;  %v2422_v53 = vunpack.c.h.s8.bf16 %v2054_v41 }
 0x56b   :  { %3086 = vmatpush1.bf16.msra.mxu0 %v2348_v52  ;;  %3250 = vmatpush1.bf16.msra.mxu1 %v2350_v8  ;;  %v2423_v52 = vunpack.c.h.s8.bf16 %v2055_v39  ;;  %v2061_v8 = vld [vmem:[#allocation4 + $0x3a8] sm:$0xff] }
 0x56c   :  { %3087 = vmatprep.subr.bf16.mxu0 %v2357_v19  ;;  %3251 = vmatprep.subr.bf16.mxu1 %v2359_v47  ;;  %v2063_v19 = vld [vmem:[#allocation4 + $0x3b8] sm:$0xff]  ;;  %v2420_v47 = vunpack.c.h.s8.bf16 %v2052_v43  ;;  %v2429_v58 = vunpack.c.l.s8.bf16 %v2061_v8  ;;  %v2437_v21 = vunpack.c.h.s8.bf16 %v2061_v8 }
 0x56f   :  { %3088 = vmatpush1.bf16.msra.mxu0 %v2356_v59  ;;  %3252 = vmatpush1.bf16.msra.mxu1 %v2358_v60  ;;  %v2431_v59 = vunpack.c.l.s8.bf16 %v2063_v19  ;;  %v2060_v60 = vld [vmem:[#allocation4 + $0x3a0] sm:$0xff] }
 0x570   :  { %3089 = vmatprep.subr.bf16.mxu0 %v2365_v1  ;;  %3253 = vmatprep.subr.bf16.mxu1 %v2367_v2  ;;  %v2062_v1 = vld [vmem:[#allocation4 + $0x3b0] sm:$0xff]  ;;  %v2428_v2 = vunpack.c.l.s8.bf16 %v2060_v60 }
 0x571   :  { %v2430_v4 = vunpack.c.l.s8.bf16 %v2062_v1  ;;  %v2438_v14 = vunpack.c.h.s8.bf16 %v2062_v1  ;;  %v2101_v1 = vld [vmem:[#allocation4 + $0x4e8] sm:$0xff] }
 0x573   :  { %3090 = vmatpush1.bf16.msra.mxu0 %v2364_v7  ;;  %3254 = vmatpush1.bf16.msra.mxu1 %v2366_v56  ;;  %v2439_v7 = vunpack.c.h.s8.bf16 %v2063_v19  ;;  %v2069_v56 = vld [vmem:[#allocation4 + $0x3e8] sm:$0xff] }
 0x574   :  { %3091 = vmatprep.subr.bf16.mxu0 %v2373_v10  ;;  %3255 = vmatprep.subr.bf16.mxu1 %v2375_v34  ;;  %v2071_v10 = vld [vmem:[#allocation4 + $0x3f8] sm:$0xff]  ;;  %v2436_v34 = vunpack.c.h.s8.bf16 %v2060_v60  ;;  %v2445_v62 = vunpack.c.l.s8.bf16 %v2069_v56  ;;  %v2453_v22 = vunpack.c.h.s8.bf16 %v2069_v56 }
 0x577   :  { %3092 = vmatpush1.bf16.msra.mxu0 %v2372_v9  ;;  %3256 = vmatpush1.bf16.msra.mxu1 %v2374_v61  ;;  %v2447_v9 = vunpack.c.l.s8.bf16 %v2071_v10  ;;  %v2068_v61 = vld [vmem:[#allocation4 + $0x3e0] sm:$0xff] }
 0x578   :  { %3093 = vmatprep.subr.bf16.mxu0 %v2381_v3  ;;  %3257 = vmatprep.subr.bf16.mxu1 %v2383_v63  ;;  %v2070_v3 = vld [vmem:[#allocation4 + $0x3f0] sm:$0xff]  ;;  %v2444_v63 = vunpack.c.l.s8.bf16 %v2068_v61 }
 0x579   :  { %v2446_v17 = vunpack.c.l.s8.bf16 %v2070_v3  ;;  %v2454_v23 = vunpack.c.h.s8.bf16 %v2070_v3  ;;  %v2109_v3 = vld [vmem:[#allocation4 + $0x528] sm:$0xff] }
 0x57b   :  { %3094 = vmatpush1.bf16.msra.mxu0 %v2380_v24  ;;  %3258 = vmatpush1.bf16.msra.mxu1 %v2382_v20  ;;  %v2455_v24 = vunpack.c.h.s8.bf16 %v2071_v10  ;;  %v2077_v20 = vld [vmem:[#allocation4 + $0x428] sm:$0xff]  ;;  %v2100_v10 = vld [vmem:[#allocation4 + $0x4e0] sm:$0xff] }
 0x57c   :  { %3095 = vmatprep.subr.bf16.mxu0 %v2389_v30  ;;  %3259 = vmatprep.subr.bf16.mxu1 %v2391_v26  ;;  %v2079_v30 = vld [vmem:[#allocation4 + $0x438] sm:$0xff]  ;;  %v2452_v26 = vunpack.c.h.s8.bf16 %v2068_v61  ;;  %v2461_v5 = vunpack.c.l.s8.bf16 %v2077_v20  ;;  %v2469_v15 = vunpack.c.h.s8.bf16 %v2077_v20 }
 0x57f   :  { %3096 = vmatpush1.bf16.msra.mxu0 %v2388_v13  ;;  %3260 = vmatpush1.bf16.msra.mxu1 %v2390_v18  ;;  %v2463_v13 = vunpack.c.l.s8.bf16 %v2079_v30  ;;  %v2076_v18 = vld [vmem:[#allocation4 + $0x420] sm:$0xff] }
 0x580   :  { %3097 = vmatprep.subr.bf16.mxu0 %v2397_v35  ;;  %3261 = vmatprep.subr.bf16.mxu1 %v2399_v37  ;;  %v2078_v35 = vld [vmem:[#allocation4 + $0x430] sm:$0xff]  ;;  %v2460_v37 = vunpack.c.l.s8.bf16 %v2076_v18 }
 0x581   :  { %v2462_v12 = vunpack.c.l.s8.bf16 %v2078_v35  ;;  %v2470_v11 = vunpack.c.h.s8.bf16 %v2078_v35  ;;  %v2117_v35 = vld [vmem:[#allocation4 + $0x568] sm:$0xff] }
 0x583   :  { %3098 = vmatpush1.bf16.msra.mxu0 %v2396_v25  ;;  %3262 = vmatpush1.bf16.msra.mxu1 %v2398_v0  ;;  %v2471_v25 = vunpack.c.h.s8.bf16 %v2079_v30  ;;  %v2085_v0 = vld [vmem:[#allocation4 + $0x468] sm:$0xff]  ;;  %v2108_v30 = vld [vmem:[#allocation4 + $0x520] sm:$0xff] }
 0x584   :  { %3099 = vmatprep.subr.bf16.mxu0 %v2405_v33  ;;  %3263 = vmatprep.subr.bf16.mxu1 %v2407_v57  ;;  %v2087_v33 = vld [vmem:[#allocation4 + $0x478] sm:$0xff]  ;;  %v2468_v57 = vunpack.c.h.s8.bf16 %v2076_v18  ;;  %v2477_v39 = vunpack.c.l.s8.bf16 %v2085_v0 }
 0x585   :  { %v2487_v41 = vunpack.c.h.s8.bf16 %v2087_v33 }
 0x587   :  { %3100 = vmatpush1.bf16.msra.mxu0 %v2404_v42  ;;  %3264 = vmatpush1.bf16.msra.mxu1 %v2406_v44  ;;  %v2479_v42 = vunpack.c.l.s8.bf16 %v2087_v33  ;;  %v2084_v44 = vld [vmem:[#allocation4 + $0x460] sm:$0xff] }
 0x588   :  { %3101 = vmatprep.subr.bf16.mxu0 %v2413_v40  ;;  %3265 = vmatprep.subr.bf16.mxu1 %v2415_v27  ;;  %v2086_v40 = vld [vmem:[#allocation4 + $0x470] sm:$0xff]  ;;  %v2476_v27 = vunpack.c.l.s8.bf16 %v2084_v44  ;;  %v2116_v33 = vld [vmem:[#allocation4 + $0x560] sm:$0xff] }
 0x589   :  { %v2478_v43 = vunpack.c.l.s8.bf16 %v2086_v40 }
 0x58b   :  { %3102 = vmatpush1.bf16.msra.mxu0 %v2412_v50  ;;  %3266 = vmatpush1.bf16.msra.mxu1 %v2414_v45  ;;  %v2093_v50 = vld [vmem:[#allocation4 + $0x4a8] sm:$0xff]  ;;  %v2095_v45 = vld [vmem:[#allocation4 + $0x4b8] sm:$0xff] }
 0x58c   :  { %3103 = vmatprep.subr.bf16.mxu0 %v2421_v51  ;;  %3267 = vmatprep.subr.bf16.mxu1 %v2423_v52  ;;  %v2484_v51 = vunpack.c.h.s8.bf16 %v2084_v44  ;;  %v2486_v52 = vunpack.c.h.s8.bf16 %v2086_v40  ;;  %v2493_v8 = vunpack.c.l.s8.bf16 %v2093_v50  ;;  %v2495_v19 = vunpack.c.l.s8.bf16 %v2095_v45  ;;  %v2125_v40 = vld [vmem:[#allocation4 + $0x5a8] sm:$0xff] }
 0x58d   :  { %v2503_v60 = vunpack.c.h.s8.bf16 %v2095_v45  ;;  %v2124_v45 = vld [vmem:[#allocation4 + $0x5a0] sm:$0xff] }
 0x58f   :  { %3104 = vmatpush1.bf16.msra.mxu0 %v2420_v47  ;;  %3268 = vmatpush1.bf16.msra.mxu1 %v2422_v53  ;;  %v2092_v47 = vld [vmem:[#allocation4 + $0x4a0] sm:$0xff] }
 0x590   :  { %3105 = vmatprep.subr.bf16.mxu0 %v2429_v58  ;;  %3269 = vmatprep.subr.bf16.mxu1 %v2431_v59  ;;  %v2492_v53 = vunpack.c.l.s8.bf16 %v2092_v47  ;;  %v2501_v59 = vunpack.c.h.s8.bf16 %v2093_v50 }
 0x593   :  { %3106 = vmatpush1.bf16.msra.mxu0 %v2428_v2  ;;  %3270 = vmatpush1.bf16.msra.mxu1 %v2430_v4  ;;  %v2103_v2 = vld [vmem:[#allocation4 + $0x4f8] sm:$0xff]  ;;  %v2500_v4 = vunpack.c.h.s8.bf16 %v2092_v47 }
 0x594   :  { %3107 = vmatprep.subr.bf16.mxu0 %v2437_v21  ;;  %3271 = vmatprep.subr.bf16.mxu1 %v2439_v7  ;;  %v2509_v7 = vunpack.c.l.s8.bf16 %v2101_v1  ;;  %v2511_v56 = vunpack.c.l.s8.bf16 %v2103_v2  ;;  %v2519_v61 = vunpack.c.h.s8.bf16 %v2103_v2  ;;  %v2132_v2 = vld [vmem:[#allocation4 + $0x5e0] sm:$0xff] }
 0x597   :  { %3108 = vmatpush1.bf16.msra.mxu0 %v2436_v34  ;;  %3272 = vmatpush1.bf16.msra.mxu1 %v2438_v14  ;;  %v2102_v34 = vld [vmem:[#allocation4 + $0x4f0] sm:$0xff]  ;;  %v2508_v14 = vunpack.c.l.s8.bf16 %v2100_v10 }
 0x598   :  { %3109 = vmatprep.subr.bf16.mxu0 %v2445_v62  ;;  %3273 = vmatprep.subr.bf16.mxu1 %v2447_v9  ;;  %v2510_v62 = vunpack.c.l.s8.bf16 %v2102_v34  ;;  %v2517_v9 = vunpack.c.h.s8.bf16 %v2101_v1 }
 0x59b   :  { %3110 = vmatpush1.bf16.msra.mxu0 %v2444_v63  ;;  %3274 = vmatpush1.bf16.msra.mxu1 %v2446_v17  ;;  %v2111_v63 = vld [vmem:[#allocation4 + $0x538] sm:$0xff]  ;;  %v2516_v17 = vunpack.c.h.s8.bf16 %v2100_v10 }
 0x59c   :  { %3111 = vmatprep.subr.bf16.mxu0 %v2453_v22  ;;  %3275 = vmatprep.subr.bf16.mxu1 %v2455_v24  ;;  %v2518_v22 = vunpack.c.h.s8.bf16 %v2102_v34  ;;  %v2525_v24 = vunpack.c.l.s8.bf16 %v2109_v3  ;;  %v2527_v20 = vunpack.c.l.s8.bf16 %v2111_v63  ;;  %v2535_v18 = vunpack.c.h.s8.bf16 %v2111_v63  ;;  %v2141_v34 = vld [vmem:[#allocation4 + $0x628] sm:$0xff]  ;;  %v2140_v63 = vld [vmem:[#allocation4 + $0x620] sm:$0xff] }
 0x59f   :  { %3112 = vmatpush1.bf16.msra.mxu0 %v2452_v26  ;;  %3276 = vmatpush1.bf16.msra.mxu1 %v2454_v23  ;;  %v2110_v26 = vld [vmem:[#allocation4 + $0x530] sm:$0xff]  ;;  %v2524_v23 = vunpack.c.l.s8.bf16 %v2108_v30 }
 0x5a0   :  { %3122 = vmatprep.subr.bf16.mxu0 %v2461_v5  ;;  %3286 = vmatprep.subr.bf16.mxu1 %v2463_v13  ;;  %v2526_v5 = vunpack.c.l.s8.bf16 %v2110_v26  ;;  %v2533_v13 = vunpack.c.h.s8.bf16 %v2109_v3 }
 0x5a2   :  { %3114 = vmatmul.mubr.bf16.vlgmr.msra.gmra.mrb[20].mxu0 %v4470_v36  ;;  %3278 = vmatmul.mubr.bf16.vlgmr.msra.gmra.mrb[20].mxu1 %v4470_v36  ;;  %v2485_v36 = vunpack.c.h.s8.bf16 %v2085_v0 }
 0x5a3   :  { %3123 = vmatpush1.bf16.msra.mxu0 %v2460_v37  ;;  %3287 = vmatpush1.bf16.msra.mxu1 %v2462_v12  ;;  %v2119_v37 = vld [vmem:[#allocation4 + $0x578] sm:$0xff]  ;;  %v2532_v12 = vunpack.c.h.s8.bf16 %v2108_v30 }
 0x5a4   :  { %3124 = vmatprep.subr.bf16.mxu0 %v2469_v15  ;;  %3288 = vmatprep.subr.bf16.mxu1 %v2471_v25  ;;  %v2534_v15 = vunpack.c.h.s8.bf16 %v2110_v26  ;;  %v2541_v25 = vunpack.c.l.s8.bf16 %v2117_v35  ;;  %v2543_v0 = vunpack.c.l.s8.bf16 %v2119_v37  ;;  %v2551_v44 = vunpack.c.h.s8.bf16 %v2119_v37  ;;  %v2149_v26 = vld [vmem:[#allocation4 + $0x668] sm:$0xff]  ;;  %v2148_v37 = vld [vmem:[#allocation4 + $0x660] sm:$0xff] }
 0x5a5   :  { %3154 = vmatprep.mubr.bf16.mxu0 %v4475_v16  ;;  %3318 = vmatprep.mubr.bf16.mxu1 %v4475_v16  ;;  %v2094_v16 = vld [vmem:[#allocation4 + $0x4b0] sm:$0xff] }
 0x5a6   :  { %v2494_v58 = vunpack.c.l.s8.bf16 %v2094_v16  ;;  %v2502_v21 = vunpack.c.h.s8.bf16 %v2094_v16  ;;  %v2133_v16 = vld [vmem:[#allocation4 + $0x5e8] sm:$0xff] }
 0x5a7   :  { %3125 = vmatpush1.bf16.msra.mxu0 %v2468_v57  ;;  %3289 = vmatpush1.bf16.msra.mxu1 %v2470_v11  ;;  %v2118_v57 = vld [vmem:[#allocation4 + $0x570] sm:$0xff]  ;;  %v2540_v11 = vunpack.c.l.s8.bf16 %v2116_v33 }
 0x5a8   :  { %3126 = vmatprep.subr.bf16.mxu0 %v2477_v39  ;;  %3290 = vmatprep.subr.bf16.mxu1 %v2479_v42  ;;  %v2542_v39 = vunpack.c.l.s8.bf16 %v2118_v57  ;;  %v2549_v42 = vunpack.c.h.s8.bf16 %v2117_v35 }
 0x5ab   :  { %3127 = vmatpush1.bf16.msra.mxu0 %v2476_v27  ;;  %3291 = vmatpush1.bf16.msra.mxu1 %v2478_v43  ;;  %v2127_v27 = vld [vmem:[#allocation4 + $0x5b8] sm:$0xff]  ;;  %v2548_v43 = vunpack.c.h.s8.bf16 %v2116_v33  ;;  %v2157_v33 = vld [vmem:[#allocation4 + $0x6a8] sm:$0xff] }
 0x5ac   :  { %3128 = vmatprep.subr.bf16.mxu0 %v2485_v36  ;;  %3292 = vmatprep.subr.bf16.mxu1 %v2487_v41  ;;  %v2550_v36 = vunpack.c.h.s8.bf16 %v2118_v57  ;;  %v2557_v41 = vunpack.c.l.s8.bf16 %v2125_v40  ;;  %v2559_v50 = vunpack.c.l.s8.bf16 %v2127_v27  ;;  %v2567_v47 = vunpack.c.h.s8.bf16 %v2127_v27  ;;  %v2159_v57 = vld [vmem:[#allocation4 + $0x6b8] sm:$0xff] }
 0x5af   :  { %3129 = vmatpush1.bf16.msra.mxu0 %v2484_v51  ;;  %3293 = vmatpush1.bf16.msra.mxu1 %v2486_v52  ;;  %v2126_v51 = vld [vmem:[#allocation4 + $0x5b0] sm:$0xff]  ;;  %v2556_v52 = vunpack.c.l.s8.bf16 %v2124_v45 }
 0x5b0   :  { %3130 = vmatprep.subr.bf16.mxu0 %v2493_v8  ;;  %3294 = vmatprep.subr.bf16.mxu1 %v2495_v19  ;;  %v2558_v8 = vunpack.c.l.s8.bf16 %v2126_v51  ;;  %v2565_v19 = vunpack.c.h.s8.bf16 %v2125_v40  ;;  %v2156_v40 = vld [vmem:[#allocation4 + $0x6a0] sm:$0xff] }
 0x5b1   :  { %v2620_v27 = vunpack.c.l.s8.bf16 %v2156_v40 }
 0x5b3   :  { %3131 = vmatpush1.bf16.msra.mxu0 %v2492_v53  ;;  %3295 = vmatpush1.bf16.msra.mxu1 %v2494_v58  ;;  %v2135_v53 = vld [vmem:[#allocation4 + $0x5f8] sm:$0xff]  ;;  %v2564_v58 = vunpack.c.h.s8.bf16 %v2124_v45 }
 0x5b4   :  { %3132 = vmatprep.subr.bf16.mxu0 %v2501_v59  ;;  %3296 = vmatprep.subr.bf16.mxu1 %v2503_v60  ;;  %v2566_v59 = vunpack.c.h.s8.bf16 %v2126_v51  ;;  %v2573_v60 = vunpack.c.l.s8.bf16 %v2133_v16  ;;  %v2575_v1 = vunpack.c.l.s8.bf16 %v2135_v53  ;;  %v2583_v10 = vunpack.c.h.s8.bf16 %v2135_v53  ;;  %v4521_v45 = vld [vmem:[%s4626_s6 + $0x2] ss:$4 sm:$0xff] }
 0x5b5   :  { %v2165_v51 = vld [vmem:[#allocation4 + $0x6e8] sm:$0xff]  ;;  %v2628_v53 = vunpack.c.h.s8.bf16 %v2156_v40 }
 0x5b7   :  { %3133 = vmatpush1.bf16.msra.mxu0 %v2500_v4  ;;  %3297 = vmatpush1.bf16.msra.mxu1 %v2502_v21  ;;  %v2134_v4 = vld [vmem:[#allocation4 + $0x5f0] sm:$0xff]  ;;  %v2572_v21 = vunpack.c.l.s8.bf16 %v2132_v2 }
 0x5b8   :  { %3134 = vmatprep.subr.bf16.mxu0 %v2509_v7  ;;  %3298 = vmatprep.subr.bf16.mxu1 %v2511_v56  ;;  %v2574_v7 = vunpack.c.l.s8.bf16 %v2134_v4  ;;  %v2581_v56 = vunpack.c.h.s8.bf16 %v2133_v16 }
 0x5bb   :  { %3135 = vmatpush1.bf16.msra.mxu0 %v2508_v14  ;;  %3299 = vmatpush1.bf16.msra.mxu1 %v2510_v62  ;;  %v2143_v14 = vld [vmem:[#allocation4 + $0x638] sm:$0xff]  ;;  %v2580_v62 = vunpack.c.h.s8.bf16 %v2132_v2 }
 0x5bc   :  { %3136 = vmatprep.subr.bf16.mxu0 %v2517_v9  ;;  %3300 = vmatprep.subr.bf16.mxu1 %v2519_v61  ;;  %v2582_v9 = vunpack.c.h.s8.bf16 %v2134_v4  ;;  %v2589_v61 = vunpack.c.l.s8.bf16 %v2141_v34  ;;  %v2591_v3 = vunpack.c.l.s8.bf16 %v2143_v14  ;;  %v2599_v30 = vunpack.c.h.s8.bf16 %v2143_v14  ;;  %v2164_v4 = vld [vmem:[#allocation4 + $0x6e0] sm:$0xff] }
 0x5bf   :  { %3137 = vmatpush1.bf16.msra.mxu0 %v2516_v17  ;;  %3301 = vmatpush1.bf16.msra.mxu1 %v2518_v22  ;;  %v2142_v17 = vld [vmem:[#allocation4 + $0x630] sm:$0xff]  ;;  %v2588_v22 = vunpack.c.l.s8.bf16 %v2140_v63 }
 0x5c0   :  { %3138 = vmatprep.subr.bf16.mxu0 %v2525_v24  ;;  %3302 = vmatprep.subr.bf16.mxu1 %v2527_v20  ;;  %v2590_v24 = vunpack.c.l.s8.bf16 %v2142_v17  ;;  %v2597_v20 = vunpack.c.h.s8.bf16 %v2141_v34  ;;  %v3433_v34 = vrot.slane %v4521_v45, %v4264_v32 }
 0x5c3   :  { %3139 = vmatpush1.bf16.msra.mxu0 %v2524_v23  ;;  %3303 = vmatpush1.bf16.msra.mxu1 %v2526_v5  ;;  %v2151_v23 = vld [vmem:[#allocation4 + $0x678] sm:$0xff]  ;;  %v2596_v5 = vunpack.c.h.s8.bf16 %v2140_v63 }
 0x5c4   :  { %3140 = vmatprep.subr.bf16.mxu0 %v2533_v13  ;;  %3304 = vmatprep.subr.bf16.mxu1 %v2535_v18  ;;  %v2598_v13 = vunpack.c.h.s8.bf16 %v2142_v17  ;;  %v2605_v18 = vunpack.c.l.s8.bf16 %v2149_v26  ;;  %v2607_v35 = vunpack.c.l.s8.bf16 %v2151_v23  ;;  %v2636_v17 = vunpack.c.l.s8.bf16 %v2164_v4 }
 0x5c7   :  { %3141 = vmatpush1.bf16.msra.mxu0 %v2532_v12  ;;  %3305 = vmatpush1.bf16.msra.mxu1 %v2534_v15  ;;  %v2150_v12 = vld [vmem:[#allocation4 + $0x670] sm:$0xff]  ;;  %v2604_v15 = vunpack.c.l.s8.bf16 %v2148_v37 }
 0x5c8   :  { %3142 = vmatprep.subr.bf16.mxu0 %v2541_v25  ;;  %3306 = vmatprep.subr.bf16.mxu1 %v2543_v0  ;;  %v2606_v25 = vunpack.c.l.s8.bf16 %v2150_v12  ;;  %v2615_v0 = vunpack.c.h.s8.bf16 %v2151_v23 }
 0x5cb   :  { %3143 = vmatpush1.bf16.msra.mxu0 %v2540_v11  ;;  %3307 = vmatpush1.bf16.msra.mxu1 %v2542_v39  ;;  %v2612_v11 = vunpack.c.h.s8.bf16 %v2148_v37  ;;  %v2614_v39 = vunpack.c.h.s8.bf16 %v2150_v12 }
 0x5cc   :  { %3144 = vmatprep.subr.bf16.mxu0 %v2549_v42  ;;  %3308 = vmatprep.subr.bf16.mxu1 %v2551_v44  ;;  %v2621_v42 = vunpack.c.l.s8.bf16 %v2157_v33  ;;  %v2623_v44 = vunpack.c.l.s8.bf16 %v2159_v57 }
 0x5cf   :  { %3145 = vmatpush1.bf16.msra.mxu0 %v2548_v43  ;;  %3309 = vmatpush1.bf16.msra.mxu1 %v2550_v36  ;;  %v4516_v36 = vld [vmem:[#allocation7 + $0x2] ss:$4 sm:$0xff] }
 0x5d0   :  { %3146 = vmatprep.subr.bf16.mxu0 %v2557_v41  ;;  %3310 = vmatprep.subr.bf16.mxu1 %v2559_v50  ;;  %v2629_v41 = vunpack.c.h.s8.bf16 %v2157_v33  ;;  %v2631_v50 = vunpack.c.h.s8.bf16 %v2159_v57  ;;  %v3384_v16 = vrot.slane %v4516_v36, %v4264_v32  ;;  %v2645_v32 = vunpack.c.h.s8.bf16 %v2165_v51  ;;  %v2172_v57 = vld [vmem:[#allocation4 + $0x720] sm:$0xff] }
 0x5d3   :  { %3147 = vmatpush1.bf16.msra.mxu0 %v2556_v52  ;;  %3311 = vmatpush1.bf16.msra.mxu1 %v2558_v8  ;;  %v2167_v52 = vld [vmem:[#allocation4 + $0x6f8] sm:$0xff]  ;;  %v3372_v8 = vrot.slane %v4516_v36, %v4258_v28 }
 0x5d4   :  { %3148 = vmatprep.subr.bf16.mxu0 %v2565_v19  ;;  %3312 = vmatprep.subr.bf16.mxu1 %v2567_v47  ;;  %v3380_v19 = vrot.slane %v4516_v36, %v4260_v29  ;;  %v3376_v47 = vrot.slane %v4516_v36, %v4262_v31  ;;  %v2639_v2 = vunpack.c.l.s8.bf16 %v2167_v52 }
 0x5d7   :  { %3149 = vmatpush1.bf16.msra.mxu0 %v2564_v58  ;;  %3313 = vmatpush1.bf16.msra.mxu1 %v2566_v59  ;;  %v3421_v59 = vrot.slane %v4521_v45, %v4258_v28 }
 0x5d8   :  { %3150 = vmatprep.subr.bf16.mxu0 %v2573_v60  ;;  %3314 = vmatprep.subr.bf16.mxu1 %v2575_v1  ;;  %v3429_v60 = vrot.slane %v4521_v45, %v4260_v29  ;;  %v2637_v1 = vunpack.c.l.s8.bf16 %v2165_v51 }
 0x5db   :  { %3151 = vmatpush1.bf16.msra.mxu0 %v2572_v21  ;;  %3315 = vmatpush1.bf16.msra.mxu1 %v2574_v7  ;;  %v2166_v21 = vld [vmem:[#allocation4 + $0x6f0] sm:$0xff] }
 0x5dc   :  { %3152 = vmatprep.subr.bf16.mxu0 %v2581_v56  ;;  %3316 = vmatprep.subr.bf16.mxu1 %v2583_v10  ;;  %v3425_v10 = vrot.slane %v4521_v45, %v4262_v31 }
 0x5df   :  { %3153 = vmatpush1.bf16.msra.mxu0 %v2580_v62  ;;  %3317 = vmatpush1.bf16.msra.mxu1 %v2582_v9 }
 0x5e0   :  { %3163 = vmatprep.subr.bf16.mxu0 %v2589_v61  ;;  %3327 = vmatprep.subr.bf16.mxu1 %v2591_v3 }
 0x5e2   :  { %3155 = vmatmul.mubr.bf16.vlgmr.msra.gmra.mrb[20].mxu0 %v4484_v6  ;;  %3319 = vmatmul.mubr.bf16.vlgmr.msra.gmra.mrb[20].mxu1 %v4484_v6  ;;  %v2613_v6 = vunpack.c.h.s8.bf16 %v2149_v26  ;;  %v2647_v26 = vunpack.c.h.s8.bf16 %v2167_v52  ;;  %v2180_v52 = vld [vmem:[#allocation4 + $0x760] sm:$0xff] }
 0x5e3   :  { %3164 = vmatpush1.bf16.msra.mxu0 %v2588_v22  ;;  %3328 = vmatpush1.bf16.msra.mxu1 %v2590_v24  ;;  %v2638_v22 = vunpack.c.l.s8.bf16 %v2166_v21 }
 0x5e4   :  { %3165 = vmatprep.subr.bf16.mxu0 %v2597_v20  ;;  %3329 = vmatprep.subr.bf16.mxu1 %v2599_v30 }
 0x5e5   :  { %3195 = vmatprep.mubr.bf16.mxu0 %v4489_v46  ;;  %3359 = vmatprep.mubr.bf16.mxu1 %v4489_v46  ;;  %v2158_v46 = vld [vmem:[#allocation4 + $0x6b0] sm:$0xff] }
 0x5e6   :  { %v2622_v43 = vunpack.c.l.s8.bf16 %v2158_v46  ;;  %v2630_v58 = vunpack.c.h.s8.bf16 %v2158_v46  ;;  %v2181_v46 = vld [vmem:[#allocation4 + $0x768] sm:$0xff] }
 0x5e7   :  { %3166 = vmatpush1.bf16.msra.mxu0 %v2596_v5  ;;  %3330 = vmatpush1.bf16.msra.mxu1 %v2598_v13  ;;  %v2173_v13 = vld [vmem:[#allocation4 + $0x728] sm:$0xff] }
 0x5e8   :  { %3167 = vmatprep.subr.bf16.mxu0 %v2605_v18  ;;  %3331 = vmatprep.subr.bf16.mxu1 %v2607_v35  ;;  %v2175_v18 = vld [vmem:[#allocation4 + $0x738] sm:$0xff] }
 0x5e9   :  { %v2655_v33 = vunpack.c.l.s8.bf16 %v2175_v18  ;;  %v2663_v40 = vunpack.c.h.s8.bf16 %v2175_v18  ;;  %v3388_v18 = vrot.slane %v4516_v36, %v4277_v48 }
 0x5eb   :  { %3168 = vmatpush1.bf16.msra.mxu0 %v2604_v15  ;;  %3332 = vmatpush1.bf16.msra.mxu1 %v2606_v25  ;;  %v2644_v25 = vunpack.c.h.s8.bf16 %v2164_v4 }
 0x5ec   :  { %3169 = vmatprep.subr.bf16.mxu0 %v2613_v6  ;;  %3333 = vmatprep.subr.bf16.mxu1 %v2615_v0  ;;  %v2646_v6 = vunpack.c.h.s8.bf16 %v2166_v21  ;;  %v2653_v0 = vunpack.c.l.s8.bf16 %v2173_v13  ;;  %v2188_v21 = vld [vmem:[#allocation4 + $0x7a0] sm:$0xff] }
 0x5ef   :  { %3170 = vmatpush1.bf16.msra.mxu0 %v2612_v11  ;;  %3334 = vmatpush1.bf16.msra.mxu1 %v2614_v39  ;;  %v2174_v11 = vld [vmem:[#allocation4 + $0x730] sm:$0xff]  ;;  %v2652_v39 = vunpack.c.l.s8.bf16 %v2172_v57 }
 0x5f0   :  { %3171 = vmatprep.subr.bf16.mxu0 %v2621_v42  ;;  %3335 = vmatprep.subr.bf16.mxu1 %v2623_v44  ;;  %v2654_v42 = vunpack.c.l.s8.bf16 %v2174_v11  ;;  %v2661_v44 = vunpack.c.h.s8.bf16 %v2173_v13 }
 0x5f3   :  { %3172 = vmatpush1.bf16.msra.mxu0 %v2620_v27  ;;  %3336 = vmatpush1.bf16.msra.mxu1 %v2622_v43  ;;  %v2183_v27 = vld [vmem:[#allocation4 + $0x778] sm:$0xff]  ;;  %v2660_v43 = vunpack.c.h.s8.bf16 %v2172_v57  ;;  %v3445_v57 = vrot.slane %v4521_v45, %v4279_v49 }
 0x5f4   :  { %3173 = vmatprep.subr.bf16.mxu0 %v2629_v41  ;;  %3337 = vmatprep.subr.bf16.mxu1 %v2631_v50  ;;  %v2662_v41 = vunpack.c.h.s8.bf16 %v2174_v11  ;;  %v2669_v50 = vunpack.c.l.s8.bf16 %v2181_v46  ;;  %v2671_v51 = vunpack.c.l.s8.bf16 %v2183_v27 }
 0x5f5   :  { %v2869_v7 = vpop.f32.mrb[16].mxu0  ;;  %v3033_v56 = vpop.f32.mrb[16].mxu1 }
 0x5f6   :  { %v3409_v14 = vmul.f32 %v3372_v8, %v2869_v7  ;;  %v3411_v62 = vmul.f32 %v3380_v19, %v3033_v56  ;;  %v2871_v28 = vpop.f32.mrb[17].mxu0  ;;  %v3035_v9 = vpop.f32.mrb[17].mxu1  ;;  %v2182_v8 = vld [vmem:[#allocation4 + $0x770] sm:$0xff]  ;;  %v2668_v19 = vunpack.c.l.s8.bf16 %v2180_v52  ;;  %v2684_v56 = vunpack.c.l.s8.bf16 %v2188_v21 }
 0x5f7   :  { %v3410_v61 = vmul.f32 %v3376_v47, %v2871_v28  ;;  %v3412_v29 = vmul.f32 %v3384_v16, %v3035_v9  ;;  %v2873_v3 = vpop.f32.mrb[18].mxu0  ;;  %v3037_v63 = vpop.f32.mrb[18].mxu1  ;;  %3174 = vmatpush1.bf16.msra.mxu0 %v2628_v53  ;;  %3338 = vmatpush1.bf16.msra.mxu1 %v2630_v58  ;;  %v2670_v47 = vunpack.c.l.s8.bf16 %v2182_v8  ;;  %v2677_v16 = vunpack.c.h.s8.bf16 %v2181_v46  ;;  %v2189_v58 = vld [vmem:[#allocation4 + $0x7a8] sm:$0xff]  ;;  %v2190_v7 = vld [vmem:[#allocation4 + $0x7b0] sm:$0xff]  ;;  %v2199_v28 = vld [vmem:[#allocation4 + $0x7f8] sm:$0xff] }
 0x5f8   :  { %v4539_v24 = vadd.f32 %v3421_v59, %v3409_v14  ;;  %v4541_v20 = vadd.f32 %v3429_v60, %v3411_v62  ;;  %v2874_v31 = vpop.f32.mrb[19].mxu0  ;;  %v3038_v30 = vpop.f32.mrb[19].mxu1  ;;  %3175 = vmatprep.subr.bf16.mxu0 %v2637_v1  ;;  %3339 = vmatprep.subr.bf16.mxu1 %v2639_v2  ;;  %v2679_v53 = vunpack.c.h.s8.bf16 %v2183_v27  ;;  %v2191_v59 = vld [vmem:[#allocation4 + $0x7b8] sm:$0xff]  ;;  %v2676_v60 = vunpack.c.h.s8.bf16 %v2180_v52  ;;  %v2197_v62 = vld [vmem:[#allocation4 + $0x7e8] sm:$0xff]  ;;  %v2196_v63 = vld [vmem:[#allocation4 + $0x7e0] sm:$0xff] }
 0x5f9   :  { %v4543_v23 = vadd.f32 %v3425_v10, %v3410_v61  ;;  %v4545_v5 = vadd.f32 %v3433_v34, %v3412_v29  ;;  %v2678_v1 = vunpack.c.h.s8.bf16 %v2182_v8  ;;  %v2685_v2 = vunpack.c.l.s8.bf16 %v2189_v58 }
 0x5fa   :  { %v3466_v35 = vmax.f32 %v4539_v24, 0.0  ;;  %v3468_v37 = vmax.f32 %v4541_v20, 0.0  ;;  %v2687_v4 = vunpack.c.l.s8.bf16 %v2191_v59  ;;  %v2686_v10 = vunpack.c.l.s8.bf16 %v2190_v7 }
 0x5fb   :  { %v3467_v12 = vmax.f32 %v4543_v23, 0.0  ;;  %v3469_v15 = vmax.f32 %v4545_v5, 0.0  ;;  %3176 = vmatpush1.bf16.msra.mxu0 %v2636_v17  ;;  %3340 = vmatpush1.bf16.msra.mxu1 %v2638_v22  ;;  %v2693_v34 = vunpack.c.h.s8.bf16 %v2189_v58  ;;  %v2695_v14 = vunpack.c.h.s8.bf16 %v2191_v59  ;;  %v2198_v17 = vld [vmem:[#allocation4 + $0x7f0] sm:$0xff] }
 0x5fc   :  { %3177 = vmatprep.subr.bf16.mxu0 %v2645_v32  ;;  %3341 = vmatprep.subr.bf16.mxu1 %v2647_v26  ;;  %v2692_v9 = vunpack.c.h.s8.bf16 %v2188_v21  ;;  %v2694_v61 = vunpack.c.h.s8.bf16 %v2190_v7  ;;  %v2701_v29 = vunpack.c.l.s8.bf16 %v2197_v62  ;;  %v2703_v3 = vunpack.c.l.s8.bf16 %v2199_v28 }
 0x5fd   :  { %v2700_v22 = vunpack.c.l.s8.bf16 %v2196_v63  ;;  %v2702_v31 = vunpack.c.l.s8.bf16 %v2198_v17  ;;  %v2709_v30 = vunpack.c.h.s8.bf16 %v2197_v62  ;;  %v2711_v32 = vunpack.c.h.s8.bf16 %v2199_v28 }
 0x5fe   :  { %v2708_v26 = vunpack.c.h.s8.bf16 %v2196_v63  ;;  %v2710_v13 = vunpack.c.h.s8.bf16 %v2198_v17 }
 0x5ff   :  { %3178 = vmatpush1.bf16.msra.mxu0 %v2644_v25  ;;  %3342 = vmatpush1.bf16.msra.mxu1 %v2646_v6  ;;  %v3396_v25 = vrot.slane %v4516_v36, %v4279_v49  ;;  %v3392_v6 = vrot.slane %v4516_v36, %v4281_v54 }
 0x600   :  { %3179 = vmatprep.subr.bf16.mxu0 %v2653_v0  ;;  %3343 = vmatprep.subr.bf16.mxu1 %v2655_v33  ;;  %v3400_v0 = vrot.slane %v4516_v36, %v4283_v55  ;;  %v3437_v33 = vrot.slane %v4521_v45, %v4277_v48 }
 0x603   :  { %3180 = vmatpush1.bf16.msra.mxu0 %v2652_v39  ;;  %3344 = vmatpush1.bf16.msra.mxu1 %v2654_v42  ;;  %v3441_v39 = vrot.slane %v4521_v45, %v4281_v54  ;;  %v3449_v42 = vrot.slane %v4521_v45, %v4283_v55 }
 0x604   :  { %3181 = vmatprep.subr.bf16.mxu0 %v2661_v44  ;;  %3345 = vmatprep.subr.bf16.mxu1 %v2663_v40 }
 0x607   :  { %3182 = vmatpush1.bf16.msra.mxu0 %v2660_v43  ;;  %3346 = vmatpush1.bf16.msra.mxu1 %v2662_v41 }
 0x608   :  { %3183 = vmatprep.subr.bf16.mxu0 %v2669_v50  ;;  %3347 = vmatprep.subr.bf16.mxu1 %v2671_v51 }
 0x60b   :  { %3184 = vmatpush1.bf16.msra.mxu0 %v2668_v19  ;;  %3348 = vmatpush1.bf16.msra.mxu1 %v2670_v47 }
 0x60c   :  { %3185 = vmatprep.subr.bf16.mxu0 %v2677_v16  ;;  %3349 = vmatprep.subr.bf16.mxu1 %v2679_v53 }
 0x60f   :  { %3186 = vmatpush1.bf16.msra.mxu0 %v2676_v60  ;;  %3350 = vmatpush1.bf16.msra.mxu1 %v2678_v1 }
 0x610   :  { %3187 = vmatprep.subr.bf16.mxu0 %v2685_v2  ;;  %3351 = vmatprep.subr.bf16.mxu1 %v2687_v4 }
 0x613   :  { %3188 = vmatpush1.bf16.msra.mxu0 %v2684_v56  ;;  %3352 = vmatpush1.bf16.msra.mxu1 %v2686_v10 }
 0x614   :  { %3189 = vmatprep.subr.bf16.mxu0 %v2693_v34  ;;  %3353 = vmatprep.subr.bf16.mxu1 %v2695_v14 }
 0x617   :  { %3190 = vmatpush1.bf16.msra.mxu0 %v2692_v9  ;;  %3354 = vmatpush1.bf16.msra.mxu1 %v2694_v61 }
 0x618   :  { %3191 = vmatprep.subr.bf16.mxu0 %v2701_v29  ;;  %3355 = vmatprep.subr.bf16.mxu1 %v2703_v3 }
 0x61b   :  { %3192 = vmatpush1.bf16.msra.mxu0 %v2700_v22  ;;  %3356 = vmatpush1.bf16.msra.mxu1 %v2702_v31 }
 0x61c   :  { %3193 = vmatprep.subr.bf16.mxu0 %v2709_v30  ;;  %3357 = vmatprep.subr.bf16.mxu1 %v2711_v32 }
 0x61f   :  { %3194 = vmatpush1.bf16.msra.mxu0 %v2708_v26  ;;  %3358 = vmatpush1.bf16.msra.mxu1 %v2710_v13 }
 0x622   :  { %3196 = vmatmul.mubr.bf16.vlgmr.msra.gmra.mrb[20].mxu0 %v4498_v38  ;;  %3360 = vmatmul.mubr.bf16.vlgmr.msra.gmra.mrb[20].mxu1 %v4498_v38 }
 0x6f5   :  { %v3197_v11 = vpop.f32.mrb[20].mxu0  ;;  %v3361_v38 = vpop.f32.mrb[20].mxu1 }
 0x6f6   :  { %v3413_v44 = vmul.f32 %v3388_v18, %v3197_v11  ;;  %v3415_v40 = vmul.f32 %v3396_v25, %v3361_v38  ;;  %v3199_v46 = vpop.f32.mrb[21].mxu0  ;;  %v3363_v27 = vpop.f32.mrb[21].mxu1 }
 0x6f7   :  { %v3414_v43 = vmul.f32 %v3392_v6, %v3199_v46  ;;  %v3416_v36 = vmul.f32 %v3400_v0, %v3363_v27  ;;  %v3201_v41 = vpop.f32.mrb[22].mxu0  ;;  %v3365_v50 = vpop.f32.mrb[22].mxu1 }
 0x6f8   :  { %v4569_v48 = vadd.f32 %v3437_v33, %v3413_v44  ;;  %v4571_v51 = vadd.f32 %v3445_v57, %v3415_v40  ;;  %v3202_v49 = vpop.f32.mrb[23].mxu0  ;;  %v3366_v52 = vpop.f32.mrb[23].mxu1 }
 0x6f9   :  { %v4573_v8 = vadd.f32 %v3441_v39, %v3414_v43  ;;  %v4575_v54 = vadd.f32 %v3449_v42, %v3416_v36 }
 0x6fa   :  { %v3470_v55 = vmax.f32 %v4569_v48, 0.0  ;;  %v3472_v45 = vmax.f32 %v4571_v51, 0.0 }
 0x6fb   :  { %v3471_v19 = vmax.f32 %v4573_v8, 0.0  ;;  %v3473_v47 = vmax.f32 %v4575_v54, 0.0 }
 0x6fc   :  { %4140 = dma.done.wait [#allocation6 + $0x3], 4096 }
 0x6fd   :  { %4141 = vsyncadd [#allocation6 + $0x3], 4294963200  ;;  %v3478_v16 = vpack.c.bf16 %v3467_v12, %v3467_v12  ;;  %v3480_v53 = vpack.c.bf16 %v3469_v15, %v3469_v15  ;;  %v3491_v58 = vld [vmem:[#allocation5 + $0x20] sm:$0xff]  ;;  %v3492_v34 = vld [vmem:[#allocation5 + $0x28] sm:$0xff]  ;;  %v3482_v24 = vpack.c.bf16 %v3471_v19, %v3471_v19  ;;  %v3484_v20 = vpack.c.bf16 %v3473_v47, %v3473_v47  ;;  %s4150_s18 = smov [#allocation10]  }
 0x6fe   :  { %v3499_v59 = vld [vmem:[#allocation5 + $0x60] sm:$0xff]  ;;  %v3527_v1 = vunpack.c.l.s8.bf16 %v3491_v58  ;;  %v3528_v2 = vunpack.c.h.s8.bf16 %v3491_v58  ;;  %v3500_v23 = vld [vmem:[#allocation5 + $0x68] sm:$0xff]  ;;  %v3529_v15 = vunpack.c.l.s8.bf16 %v3492_v34  ;;  %v3530_v29 = vunpack.c.h.s8.bf16 %v3492_v34  ;;  %v3493_v63 = vld [vmem:[#allocation5 + $0x30] sm:$0xff]  ;;  %s3761_s19 = sshll.u32 %s4150_s18, 4  ;;  %s3762_s19 = int_to_ptr.vmem [resolvable:$true] %s3761_s19 }
 0x6ff   :  { %3615 = vmatprep.mubr.bf16.mxu0 %v3478_v16  ;;  %3655 = vmatprep.mubr.bf16.mxu1 %v3480_v53  ;;  %v3487_v60 = vld [vmem:[#allocation5] sm:$0xff]  ;;  %v3543_v4 = vunpack.c.l.s8.bf16 %v3499_v59  ;;  %v3544_v21 = vunpack.c.h.s8.bf16 %v3499_v59  ;;  %v3545_v14 = vunpack.c.l.s8.bf16 %v3500_v23  ;;  %v3488_v62 = vld [vmem:[#allocation5 + $0x8] sm:$0xff]  ;;  %v3546_v3 = vunpack.c.h.s8.bf16 %v3500_v23  ;;  %v3501_v17 = vld [vmem:[#allocation5 + $0x70] sm:$0xff]  ;;  %s4110_s20 = scalar_lea.vmem %s3762_s19, 128  ;;  %p4115_p13 = scmp.lt.s32.totalorder %s3762_s19, %s3762_s19 }
 0x700   :  { %v3495_v7 = vld [vmem:[#allocation5 + $0x40] sm:$0xff]  ;;  %v3519_v56 = vunpack.c.l.s8.bf16 %v3487_v60  ;;  %3809 = vmatprep.subr.bf16.mxu0 %v3527_v1  ;;  %v3520_v12 = vunpack.c.h.s8.bf16 %v3487_v60  ;;  %v3496_v28 = vld [vmem:[#allocation5 + $0x48] sm:$0xff]  ;;  %v3521_v9 = vunpack.c.l.s8.bf16 %v3488_v62  ;;  %v3522_v22 = vunpack.c.h.s8.bf16 %v3488_v62  ;;  %v3489_v26 = vld [vmem:[#allocation5 + $0x10] sm:$0xff]  ;;  %p4111_p12 = scmp.ne.s32.totalorder %s3762_s19, %s4110_s20  ;;  %p4116_p0 = scmp.lt.s32.totalorder %s4110_s20, %s4110_s20 }
 0x701   :  { %v3535_v10 = vunpack.c.l.s8.bf16 %v3495_v7  ;;  %3831 = vmatprep.subr.bf16.mxu1 %v3543_v4  ;;  %v3536_v5 = vunpack.c.h.s8.bf16 %v3495_v7  ;;  %v3537_v61 = vunpack.c.l.s8.bf16 %v3496_v28  ;;  %v3538_v31 = vunpack.c.h.s8.bf16 %v3496_v28  ;;  %v3497_v13 = vld [vmem:[#allocation5 + $0x50] sm:$0xff]  ;;  %v3494_v33 = vld [vmem:[#allocation5 + $0x38] sm:$0xff]  ;;  %v3507_v41 = vld [vmem:[#allocation5 + $0xa0] sm:$0xff] }
 0x702   :  { %3810 = vmatpush3.bf16.msra.mxu0 %v3519_v56  ;;  %v3531_v30 = vunpack.c.l.s8.bf16 %v3493_v63  ;;  %v3547_v32 = vunpack.c.l.s8.bf16 %v3501_v17  ;;  %v3523_v18 = vunpack.c.l.s8.bf16 %v3489_v26  ;;  %v3539_v25 = vunpack.c.l.s8.bf16 %v3497_v13  ;;  %v3502_v57 = vld [vmem:[#allocation5 + $0x78] sm:$0xff]  ;;  %v3515_v50 = vld [vmem:[#allocation5 + $0xe0] sm:$0xff]  ;;  %v3508_v56 = vld [vmem:[#allocation5 + $0xa8] sm:$0xff]  ;;  %p4117_p1 = por %p4116_p0, %p4115_p13 }
 0x703   :  { %3832 = vmatpush3.bf16.msra.mxu1 %v3535_v10  ;;  %3811 = vmatprep.subr.bf16.mxu0 %v3528_v2  ;;  %v3532_v6 = vunpack.c.h.s8.bf16 %v3493_v63  ;;  %v3548_v0 = vunpack.c.h.s8.bf16 %v3501_v17  ;;  %v3524_v11 = vunpack.c.h.s8.bf16 %v3489_v26  ;;  %v3540_v38 = vunpack.c.h.s8.bf16 %v3497_v13  ;;  %v3490_v44 = vld [vmem:[#allocation5 + $0x18] sm:$0xff]  ;;  %v3503_v58 = vld [vmem:[#allocation5 + $0x80] sm:$0xff]  ;;  %v3516_v10 = vld [vmem:[#allocation5 + $0xe8] sm:$0xff] }
 0x704   :  { %3833 = vmatprep.subr.bf16.mxu1 %v3544_v21  ;;  %v3533_v39 = vunpack.c.l.s8.bf16 %v3494_v33  ;;  %v3549_v42 = vunpack.c.l.s8.bf16 %v3502_v57  ;;  %v3498_v40 = vld [vmem:[#allocation5 + $0x58] sm:$0xff]  ;;  %v3525_v46 = vunpack.c.l.s8.bf16 %v3490_v44  ;;  %v3534_v43 = vunpack.c.h.s8.bf16 %v3494_v33  ;;  %v3511_v59 = vld [vmem:[#allocation5 + $0xc0] sm:$0xff]  ;;  %p4118_p2 = pnand %p4117_p1, %p4111_p12 }
 0x705   :  { %v3541_v27 = vunpack.c.l.s8.bf16 %v3498_v40  ;;  %v3550_v36 = vunpack.c.h.s8.bf16 %v3502_v57  ;;  %v3526_v49 = vunpack.c.h.s8.bf16 %v3490_v44  ;;  %v3542_v52 = vunpack.c.h.s8.bf16 %v3498_v40 }
 0x706   :  { %3812 = vmatpush3.bf16.msra.mxu0 %v3520_v12  ;;  %v3559_v16 = vunpack.c.l.s8.bf16 %v3507_v41  ;;  %v3575_v53 = vunpack.c.l.s8.bf16 %v3515_v50  ;;  %v3477_v60 = vpack.c.bf16 %v3466_v35, %v3466_v35  ;;  %v3479_v1 = vpack.c.bf16 %v3468_v37, %v3468_v37  ;;  %v3504_v12 = vld [vmem:[#allocation5 + $0x88] sm:$0xff] }
 0x707   :  { %3834 = vmatpush3.bf16.msra.mxu1 %v3536_v5  ;;  %3813 = vmatprep.subr.bf16.mxu0 %v3529_v15  ;;  %v3551_v2 = vunpack.c.l.s8.bf16 %v3503_v58  ;;  %v3567_v4 = vunpack.c.l.s8.bf16 %v3511_v59  ;;  %v3560_v21 = vunpack.c.h.s8.bf16 %v3507_v41  ;;  %v3576_v7 = vunpack.c.h.s8.bf16 %v3515_v50  ;;  %v3512_v5 = vld [vmem:[#allocation5 + $0xc8] sm:$0xff]  ;;  %v3509_v15 = vld [vmem:[#allocation5 + $0xb0] sm:$0xff] }
 0x708   :  { %3835 = vmatprep.subr.bf16.mxu1 %v3545_v14  ;;  %v3552_v35 = vunpack.c.h.s8.bf16 %v3503_v58  ;;  %v3568_v37 = vunpack.c.h.s8.bf16 %v3511_v59  ;;  %v3561_v34 = vunpack.c.l.s8.bf16 %v3508_v56  ;;  %v3577_v23 = vunpack.c.l.s8.bf16 %v3516_v10  ;;  %v3517_v14 = vld [vmem:[#allocation5 + $0xf0] sm:$0xff] }
 0x709   :  { %v3553_v8 = vunpack.c.l.s8.bf16 %v3504_v12  ;;  %v3569_v54 = vunpack.c.l.s8.bf16 %v3512_v5  ;;  %v3562_v19 = vunpack.c.h.s8.bf16 %v3508_v56  ;;  %v3578_v47 = vunpack.c.h.s8.bf16 %v3516_v10  ;;  %v3803_v56 = vld [vmem:[#allocation7 + $0x3] ss:$0 sm:$0xff] }
 0x70a   :  { %3814 = vmatpush3.bf16.msra.mxu0 %v3521_v9  ;;  %v3554_v62 = vunpack.c.h.s8.bf16 %v3504_v12  ;;  %v3570_v28 = vunpack.c.h.s8.bf16 %v3512_v5  ;;  %v3563_v9 = vunpack.c.l.s8.bf16 %v3509_v15  ;;  %v3481_v44 = vpack.c.bf16 %v3470_v55, %v3470_v55 }
 0x70b   :  { %3836 = vmatpush3.bf16.msra.mxu1 %v3537_v61  ;;  %3815 = vmatprep.subr.bf16.mxu0 %v3530_v29  ;;  %v3579_v61 = vunpack.c.l.s8.bf16 %v3517_v14  ;;  %v3505_v29 = vld [vmem:[#allocation5 + $0x90] sm:$0xff]  ;;  %v3483_v40 = vpack.c.bf16 %v3472_v45, %v3472_v45 }
 0x70c   :  { %3837 = vmatprep.subr.bf16.mxu1 %v3546_v3  ;;  %v3513_v3 = vld [vmem:[#allocation5 + $0xd0] sm:$0xff]  ;;  %v3555_v63 = vunpack.c.l.s8.bf16 %v3505_v29  ;;  %v3556_v26 = vunpack.c.h.s8.bf16 %v3505_v29 }
 0x70d   :  { %v3571_v17 = vunpack.c.l.s8.bf16 %v3513_v3  ;;  %v3572_v13 = vunpack.c.h.s8.bf16 %v3513_v3 }
 0x70e   :  { %3816 = vmatpush3.bf16.msra.mxu0 %v3522_v22  ;;  %v3564_v22 = vunpack.c.h.s8.bf16 %v3509_v15 }
 0x70f   :  { %3838 = vmatpush3.bf16.msra.mxu1 %v3538_v31  ;;  %3817 = vmatprep.subr.bf16.mxu0 %v3531_v30  ;;  %v3580_v31 = vunpack.c.h.s8.bf16 %v3517_v14  ;;  %v3510_v30 = vld [vmem:[#allocation5 + $0xb8] sm:$0xff] }
 0x710   :  { %3839 = vmatprep.subr.bf16.mxu1 %v3547_v32  ;;  %v3518_v32 = vld [vmem:[#allocation5 + $0xf8] sm:$0xff] }
 0x712   :  { %3818 = vmatpush3.bf16.msra.mxu0 %v3523_v18  ;;  %v3565_v18 = vunpack.c.l.s8.bf16 %v3510_v30 }
 0x713   :  { %3840 = vmatpush3.bf16.msra.mxu1 %v3539_v25  ;;  %3819 = vmatprep.subr.bf16.mxu0 %v3532_v6  ;;  %v3581_v25 = vunpack.c.l.s8.bf16 %v3518_v32  ;;  %v3506_v6 = vld [vmem:[#allocation5 + $0x98] sm:$0xff] }
 0x714   :  { %3841 = vmatprep.subr.bf16.mxu1 %v3548_v0  ;;  %v3514_v0 = vld [vmem:[#allocation5 + $0xd8] sm:$0xff]  ;;  %v3557_v33 = vunpack.c.l.s8.bf16 %v3506_v6 }
 0x715   :  { %v3573_v57 = vunpack.c.l.s8.bf16 %v3514_v0 }
 0x716   :  { %3820 = vmatpush3.bf16.msra.mxu0 %v3524_v11  ;;  %v3566_v11 = vunpack.c.h.s8.bf16 %v3510_v30 }
 0x717   :  { %3842 = vmatpush3.bf16.msra.mxu1 %v3540_v38  ;;  %3821 = vmatprep.subr.bf16.mxu0 %v3533_v39  ;;  %v3582_v38 = vunpack.c.h.s8.bf16 %v3518_v32  ;;  %v3558_v39 = vunpack.c.h.s8.bf16 %v3506_v6 }
 0x718   :  { %3843 = vmatprep.subr.bf16.mxu1 %v3549_v42  ;;  %v3574_v42 = vunpack.c.h.s8.bf16 %v3514_v0 }
 0x71a   :  { %3822 = vmatpush3.bf16.msra.mxu0 %v3525_v46 }
 0x71b   :  { %3844 = vmatpush3.bf16.msra.mxu1 %v3541_v27  ;;  %3823 = vmatprep.subr.bf16.mxu0 %v3534_v43 }
 0x71c   :  { %3845 = vmatprep.subr.bf16.mxu1 %v3550_v36 }
 0x71e   :  { %3824 = vmatpush3.bf16.msra.mxu0 %v3526_v49 }
 0x71f   :  { %3846 = vmatpush3.bf16.msra.mxu1 %v3542_v52  ;;  %3853 = vmatprep.subr.bf16.mxu0 %v3559_v16 }
 0x720   :  { %3875 = vmatprep.subr.bf16.mxu1 %v3575_v53 }
 0x721   :  { %3616 = vmatmul.mubr.bf16.vlgmr.msra.gmra.mrb[24].mxu0 %v3477_v60 }
 0x722   :  { %3656 = vmatmul.mubr.bf16.vlgmr.msra.gmra.mrb[24].mxu1 %v3479_v1  ;;  %3854 = vmatpush3.bf16.msra.mxu0 %v3551_v2 }
 0x723   :  { %3876 = vmatpush3.bf16.msra.mxu1 %v3567_v4  ;;  %3855 = vmatprep.subr.bf16.mxu0 %v3560_v21 }
 0x724   :  { %3877 = vmatprep.subr.bf16.mxu1 %v3576_v7  ;;  %3695 = vmatprep.mubr.bf16.mxu0 %v3482_v24  ;;  %v3804_v24 = vld [vmem:[%s4626_s6 + $0x3] ss:$0 sm:$0xff] }
 0x725   :  { %3735 = vmatprep.mubr.bf16.mxu1 %v3484_v20 }
 0x726   :  { %3856 = vmatpush3.bf16.msra.mxu0 %v3552_v35 }
 0x727   :  { %3878 = vmatpush3.bf16.msra.mxu1 %v3568_v37  ;;  %3857 = vmatprep.subr.bf16.mxu0 %v3561_v34 }
 0x728   :  { %3879 = vmatprep.subr.bf16.mxu1 %v3577_v23 }
 0x72a   :  { %3858 = vmatpush3.bf16.msra.mxu0 %v3553_v8 }
 0x72b   :  { %3880 = vmatpush3.bf16.msra.mxu1 %v3569_v54  ;;  %3859 = vmatprep.subr.bf16.mxu0 %v3562_v19 }
 0x72c   :  { %3881 = vmatprep.subr.bf16.mxu1 %v3578_v47 }
 0x72e   :  { %3860 = vmatpush3.bf16.msra.mxu0 %v3554_v62 }
 0x72f   :  { %3882 = vmatpush3.bf16.msra.mxu1 %v3570_v28  ;;  %3861 = vmatprep.subr.bf16.mxu0 %v3563_v9 }
 0x730   :  { %3883 = vmatprep.subr.bf16.mxu1 %v3579_v61 }
 0x732   :  { %3862 = vmatpush3.bf16.msra.mxu0 %v3555_v63 }
 0x733   :  { %3884 = vmatpush3.bf16.msra.mxu1 %v3571_v17  ;;  %3863 = vmatprep.subr.bf16.mxu0 %v3564_v22 }
 0x734   :  { %3885 = vmatprep.subr.bf16.mxu1 %v3580_v31 }
 0x736   :  { %3864 = vmatpush3.bf16.msra.mxu0 %v3556_v26 }
 0x737   :  { %3886 = vmatpush3.bf16.msra.mxu1 %v3572_v13  ;;  %3865 = vmatprep.subr.bf16.mxu0 %v3565_v18 }
 0x738   :  { %3887 = vmatprep.subr.bf16.mxu1 %v3581_v25 }
 0x73a   :  { %3866 = vmatpush3.bf16.msra.mxu0 %v3557_v33 }
 0x73b   :  { %3888 = vmatpush3.bf16.msra.mxu1 %v3573_v57  ;;  %3867 = vmatprep.subr.bf16.mxu0 %v3566_v11 }
 0x73c   :  { %3889 = vmatprep.subr.bf16.mxu1 %v3582_v38 }
 0x73e   :  { %3868 = vmatpush3.bf16.msra.mxu0 %v3558_v39 }
 0x73f   :  { %3890 = vmatpush3.bf16.msra.mxu1 %v3574_v42 }
 0x741   :  { %3696 = vmatmul.mubr.bf16.vlgmr.msra.gmra.mrb[28].mxu0 %v3481_v44 }
 0x742   :  { %3736 = vmatmul.mubr.bf16.vlgmr.msra.gmra.mrb[28].mxu1 %v3483_v40 }
 0x7f4   :  { %v3825_v46 = vpop.f32.mrb[24].mxu0 }
 0x7f5   :  { %v3847_v27 = vpop.f32.mrb[24].mxu1  ;;  %v3826_v43 = vpop.f32.mrb[25].mxu0 }
 0x7f6   :  { %v3848_v36 = vpop.f32.mrb[25].mxu1  ;;  %v3827_v41 = vadd.f32 %v3826_v43, %v3825_v46  ;;  %v3828_v49 = vpop.f32.mrb[26].mxu0 }
 0x7f7   :  { %v3849_v50 = vadd.f32 %v3848_v36, %v3847_v27  ;;  %v3850_v52 = vpop.f32.mrb[26].mxu1  ;;  %v3829_v16 = vpop.f32.mrb[27].mxu0 }
 0x7f8   :  { %v3851_v48 = vpop.f32.mrb[27].mxu1 }
 0x7f9   :  { %v3658_v53 = vadd.f32 %v3849_v50, %v3827_v41 }
 0x814   :  { %v3869_v55 = vpop.f32.mrb[28].mxu0 }
 0x815   :  { %v3891_v58 = vpop.f32.mrb[28].mxu1  ;;  %v3870_v51 = vpop.f32.mrb[29].mxu0 }
 0x816   :  { %v3892_v59 = vpop.f32.mrb[29].mxu1  ;;  %v3871_v45 = vadd.f32 %v3870_v51, %v3869_v55  ;;  %v3872_v1 = vpop.f32.mrb[30].mxu0 }
 0x817   :  { %v3893_v60 = vadd.f32 %v3892_v59, %v3891_v58  ;;  %v3894_v2 = vpop.f32.mrb[30].mxu1  ;;  %v3873_v4 = vpop.f32.mrb[31].mxu0 }
 0x818   :  { %v3895_v21 = vpop.f32.mrb[31].mxu1  ;;  %v3698_v7 = vadd.f32 %v3871_v45, %v3658_v53 }
 0x81a   :  { %v3738_v10 = vadd.f32 %v3893_v60, %v3698_v7 }
 0x81c   :  { %v3747_v20 = vmul.f32 %v3803_v56, %v3738_v10 }
 0x81e   :  { %v3752_v35 = vadd.f32 %v3804_v24, %v3747_v20 }
 0x820   :  { %v3753_v37 = vmax.f32 %v3752_v35, 0.0 }
 0x822   :  { %3754 = vst [vmem:[#allocation10] sm:$0xff] %v3753_v37 }
 0x823   :  { %4121 = shalt.err (!%p4118_p2)
}
 0x824   :  { %s4122_s23 = scalar_lea.hbm %s4627_s7, 128 }
 0x825   :  { %p4123_p3 = scmp.ne.s32.totalorder %s4627_s7, %s4122_s23  ;;  %p4126_p4 = scmp.lt.u32.totalorder %s4122_s23, %s4627_s7 }
 0x827   :  { %p4128_p5 = pnand %p4126_p4, %p4123_p3 }
 0x829   :  { %4131 = shalt.err (!%p4128_p5)
}
 0x82a   :  { %3764 = dma.vmem_to_hbm [thread:$0]  %s3762_s19, 128, %s4627_s7, [#allocation9]  }
 0x82b   :  { %4142 = dma.done.wait [#allocation9], 128  }
 0x82c   :  { %4143 = vsyncadd [#allocation9], 4294967168 }
 0x82d   :  { %3768 = vsyncpa [#allocation8], 1 }
 0x82e   :  { %3769 = vsyncpa [#allocation9], 1 }
 0x82f   :  { %3770 = vsyncmov [#allocation6] }
 0x832   :  { %s3771_s26 = vpop.sfrf %3770 }
 0x833   :  { %p3805_p6 = scmp.ne.s32.totalorder %s3771_s26, 0 }
 0x835   :  { %3775 = shalt.err (%p3805_p6)  }
 0x836   :  { %3777 = vsyncmov [#allocation6 + $0x1] }
 0x839   :  { %s3778_s27 = vpop.sfrf %3777 }
 0x83a   :  { %p3806_p7 = scmp.ne.s32.totalorder %s3778_s27, 0 }
 0x83c   :  { %3782 = shalt.err (%p3806_p7)  }
 0x83d   :  { %3784 = vsyncmov [#allocation6 + $0x2] }
 0x840   :  { %s3785_s28 = vpop.sfrf %3784 }
 0x841   :  { %p3807_p8 = scmp.ne.s32.totalorder %s3785_s28, 0 }
 0x843   :  { %3789 = shalt.err (%p3807_p8)  }
 0x844   :  { %3791 = vsyncmov [#allocation6 + $0x3] }
 0x847   :  { %s3792_s29 = vpop.sfrf %3791 }
 0x848   :  { %p3808_p9 = scmp.ne.s32.totalorder %s3792_s29, 0 }
 0x84a   :  { %3796 = shalt.err (%p3808_p9)  }

</bundles_post_ra>
